<compile_context>
chip_gen: v5e
topology: v5e:2x2
jax: 0.10.0
libtpu: 0.0.40
codegen_flags: <defaults>
</compile_context>

<pallas_src>
import functools

import jax
import jax.numpy as jnp
from jax.experimental import pallas as pl
from jax.experimental.pallas import tpu as pltpu

LRELU_SLOPE = 0.1  # modules.LRELU_SLOPE in voras
_VMEM_LIMIT = 48 * 1024 * 1024  # <= v7x physical 64 MiB; generous vs tiles used


def _round_up(x, m):
    return ((x + m - 1) // m) * m


def _cdiv(a, b):
    return -(-a // b)


def _pick_row_tile(m, max_tile):
    """Row tile that is a multiple of 8 and gives >=2 grid steps when possible."""
    if m <= 8:
        return m, m, 1
    tm = min(max_tile, _round_up(_cdiv(m, 2), 8))
    gm = _cdiv(m, tm)
    return tm, gm * tm, gm


# ----------------------------------------------------------------------------
# Pallas kernel 1: (M,K) @ (K,N) + bias, fused activation (init / post convs)
# ----------------------------------------------------------------------------
def _matmul_bias_act_kernel(x_ref, w_ref, b_ref, o_ref, *, act):
    acc = jnp.dot(x_ref[...], w_ref[...], preferred_element_type=jnp.float32)
    acc = acc + b_ref[...]
    if act == "leaky_relu":
        acc = jnp.where(acc >= 0.0, acc, LRELU_SLOPE * acc)
    o_ref[...] = acc.astype(o_ref.dtype)


def matmul_bias_act(x, w, b, act="none", max_tile=2048):
    """x:(M,K) @ w:(K,N) + b:(1,N) fused with activation; row-tiled grid."""
    M, K = x.shape
    _, N = w.shape
    tm, Mp, gm = _pick_row_tile(M, max_tile)
    if Mp != M:
        x = jnp.pad(x, ((0, Mp - M), (0, 0)))
    out = pl.pallas_call(
        functools.partial(_matmul_bias_act_kernel, act=act),
        out_shape=jax.ShapeDtypeStruct((Mp, N), jnp.float32),
        grid=(gm,),
        in_specs=[
            pl.BlockSpec((tm, K), lambda i: (i, 0)),
            pl.BlockSpec((K, N), lambda i: (0, 0)),   # resident weights
            pl.BlockSpec((1, N), lambda i: (0, 0)),
        ],
        out_specs=pl.BlockSpec((tm, N), lambda i: (i, 0)),
        compiler_params=pltpu.CompilerParams(
            dimension_semantics=("parallel",),
            vmem_limit_bytes=_VMEM_LIMIT),
    )(x, w, b)
    return out[:M] if Mp != M else out


# ----------------------------------------------------------------------------
# Pallas kernel 2: fused pointwise MLP of the ConvNeXt block
#   (rows, C) bf16 -> pw1 (C,4C) + GELU -> pw2 (4C, Co) + GELU -> (rows, Co)
# ----------------------------------------------------------------------------
def _pointwise_mlp_kernel(h_ref, w1_ref, b1_ref, w2_ref, b2_ref, o_ref):
    t = jnp.dot(h_ref[...], w1_ref[...], preferred_element_type=jnp.float32)
    t = jax.nn.gelu(t + b1_ref[...], approximate=True)       # tanh GELU -> EUP
    t = jnp.dot(t.astype(jnp.bfloat16), w2_ref[...],
                preferred_element_type=jnp.float32)
    t = jax.nn.gelu(t + b2_ref[...], approximate=True)
    o_ref[...] = t.astype(o_ref.dtype)


def pointwise_mlp(h, w1, b1, w2, b2, max_tile=512):
    M, C = h.shape
    inner = w1.shape[1]
    Co = w2.shape[1]
    tm, Mp, gm = _pick_row_tile(M, max_tile)
    if Mp != M:
        h = jnp.pad(h, ((0, Mp - M), (0, 0)))
    out = pl.pallas_call(
        _pointwise_mlp_kernel,
        out_shape=jax.ShapeDtypeStruct((Mp, Co), jnp.float32),
        grid=(gm,),
        in_specs=[
            pl.BlockSpec((tm, C), lambda i: (i, 0)),
            pl.BlockSpec((C, inner), lambda i: (0, 0)),
            pl.BlockSpec((1, inner), lambda i: (0, 0)),
            pl.BlockSpec((inner, Co), lambda i: (0, 0)),
            pl.BlockSpec((1, Co), lambda i: (0, 0)),
        ],
        out_specs=pl.BlockSpec((tm, Co), lambda i: (i, 0)),
        compiler_params=pltpu.CompilerParams(
            dimension_semantics=("parallel",),
            vmem_limit_bytes=_VMEM_LIMIT),
    )(h, w1, b1, w2, b2)
    return out[:M] if Mp != M else out


# ----------------------------------------------------------------------------
# ConvNeXt block = [XLA: vectorized DW conv + cond bias] + [Pallas: MLP]
# ----------------------------------------------------------------------------
def convnext_block(x, g2d, blk, u):
    """x: (B, Hin, W, C) f32 -> (B, Ho, W, Co) f32."""
    # TODO(synk): ConvNext2d source (lib/voras/modules.py) was not provided;
    # approximated as depthwise (3u,1)/(u,1) conv + speaker conditioning +
    # pointwise expand/GELU/project/GELU (the `r` argument is unused).
    B, Hin, W, C = x.shape
    K, S = 3 * u, u
    Ho = (Hin - S) // S + 1
    Co = blk["pw2_w"].shape[1]

    # Depthwise conv + cond bias: K whole-tensor strided multiply-adds in one
    # XLA fusion; bias added once; implicit zero pad at the bottom.
    pad_rows = (Ho - 1) * S + K - Hin
    xp = jnp.pad(x, ((0, 0), (0, pad_rows), (0, 0), (0, 0)))
    cond = jnp.dot(g2d, blk["cond_w"]) + blk["cond_b"]               # (B, C)
    h = cond[:, None, None, :] + blk["dw_b"][None, None, None, :]
    for k in range(K):
        h = h + (xp[:, k: k + (Ho - 1) * S + 1: S, :, :]
                 * blk["dw_w"][k][None, None, None, :])

    # Pointwise MLP on the MXU over lane/sublane-dense (rows, C) slabs.
    h = h.reshape(B * Ho * W, C).astype(jnp.bfloat16)
    out = pointwise_mlp(h, blk["pw1_w"], blk["pw1_b"],
                        blk["pw2_w"], blk["pw2_b"])
    return out.reshape(B, Ho, W, Co)


# ----------------------------------------------------------------------------
# Parameters (deterministic synthetic init; weight_norm folded: w = g*v/||v||)
# ----------------------------------------------------------------------------
def _wn(v, g):
    norm = jnp.sqrt(jnp.sum(v * v, axis=(1, 2, 3), keepdims=True))
    return g * v / norm


def _init_conv(key, shape, scale=0.05):
    kv, kb = jax.random.split(key)
    v = scale * jax.random.normal(kv, shape, jnp.float32)
    g = jnp.sqrt(jnp.sum(v * v, axis=(1, 2, 3), keepdims=True))  # torch weight_norm init
    b = 0.01 * jax.random.normal(kb, (shape[0],), jnp.float32)
    return {"w": _wn(v, g), "b": b}


def init_disc_p_params(key, upsample_rates, gin_channels, final_dim=256):
    N = len(upsample_rates)
    u_last = upsample_rates[-1]
    K0 = u_last * 3
    keys = jax.random.split(key, 2 + 4 * max(1, N - 1))
    ki = iter(keys)

    params = {}
    c0 = final_dim // 2 ** (N - 1)
    params["init"] = _init_conv(next(ki), (c0, 1, K0, 1))

    convs = []
    for i, u in enumerate(upsample_rates[::-1][1:], start=1):
        cin = final_dim // 2 ** (N - i)
        cout = final_dim // 2 ** (N - i - 1)
        inner = cin * 4  # extend_ratio = 4
        convs.append({
            "dw": _init_conv(next(ki), (cin, 1, u * 3, 1)),
            "cond": _init_conv(next(ki), (cin, gin_channels, 1, 1)),
            "pw1": _init_conv(next(ki), (inner, cin, 1, 1)),
            "pw2": _init_conv(next(ki), (cout, inner, 1, 1)),
        })
    params["convs"] = convs
    params["post"] = _init_conv(next(ki), (1, final_dim, 3, 1))
    return params


def prepare_disc_params(params):
    """Transpose / cast weights ONCE so the hot path never re-pads in HBM."""
    prep = {}

    # init conv (c0,1,K0,1): taps k-major, rows REVERSED (folds the two flips)
    w = params["init"]["w"]
    prep["init_w"] = jnp.transpose(w[:, 0, :, 0], (1, 0))[::-1].astype(jnp.bfloat16)
    prep["init_b"] = params["init"]["b"].reshape(1, -1).astype(jnp.float32)

    convs = []
    for blk in params["convs"]:
        dw = blk["dw"]["w"]                                        # (C,1,K,1)
        convs.append({
            "dw_w": jnp.transpose(dw[:, 0, :, 0], (1, 0)).astype(jnp.float32),
            "dw_b": blk["dw"]["b"].astype(jnp.float32),
            "cond_w": jnp.transpose(blk["cond"]["w"][:, :, 0, 0], (1, 0)).astype(jnp.float32),
            "cond_b": blk["cond"]["b"].astype(jnp.float32),
            "pw1_w": jnp.transpose(blk["pw1"]["w"][:, :, 0, 0], (1, 0)).astype(jnp.bfloat16),
            "pw1_b": blk["pw1"]["b"].reshape(1, -1).astype(jnp.float32),
            "pw2_w": jnp.transpose(blk["pw2"]["w"][:, :, 0, 0], (1, 0)).astype(jnp.bfloat16),
            "pw2_b": blk["pw2"]["b"].reshape(1, -1).astype(jnp.float32),
        })
    prep["convs"] = convs

    # post conv (1, Cf, 3, 1): (Cf, 3) tap matrix; score assembled by shift-add
    pw = params["post"]["w"]
    prep["post_w"] = pw[0, :, :, 0].astype(jnp.bfloat16)           # (Cf, 3)
    prep["post_zero_b"] = jnp.zeros((1, 3), jnp.float32)
    prep["post_b"] = params["post"]["b"][0].astype(jnp.float32)
    return prep


# ----------------------------------------------------------------------------
# Forward passes (channels-last internally; fmap returned NCHW like PyTorch)
# ----------------------------------------------------------------------------
def disc_p_forward(x, g2d, prep, period, upsample_rates):
    fmap = []
    u_last = upsample_rates[-1]
    K0, S0 = 3 * u_last, u_last
    B, C, T = x.shape                                   # C == 1
    if T % period != 0:
        n_pad = period - T % period
        x = jnp.pad(x, ((0, 0), (0, 0), (n_pad, 0)), mode="reflect")
        T = T + n_pad
    H, W = T // period, period
    x = x[:, 0, :].reshape(B, H, W)

    # init conv + leaky relu.  Both torch.flip passes are folded away by using
    # reversed taps (prep["init_w"]) and a TOP zero pad of K0-1-((H-1)%S0).
    Ho = (H - 1) // S0 + 1
    pad_top = K0 - 1 - ((H - 1) % S0)
    xp = jnp.pad(x, ((0, 0), (pad_top, 0), (0, 0)))
    patches = jnp.stack(
        [xp[:, k: k + (Ho - 1) * S0 + 1: S0, :] for k in range(K0)], axis=-1
    )                                                    # (B, Ho, W, K0)
    c0 = prep["init_b"].shape[1]
    h = matmul_bias_act(patches.reshape(B * Ho * W, K0).astype(jnp.bfloat16),
                        prep["init_w"], prep["init_b"],
                        act="leaky_relu", max_tile=2048)
    x4 = h.reshape(B, Ho, W, c0)
    fmap.append(jnp.transpose(x4, (0, 3, 1, 2)))         # NCHW fmap

    # ConvNeXt blocks
    for blk, u in zip(prep["convs"], list(upsample_rates[::-1][1:])):
        x4 = convnext_block(x4, g2d, blk, u)
        fmap.append(jnp.transpose(x4, (0, 3, 1, 2)))

    # post conv (kernel (3,1), stride 1, Cout=1): one (rows,Cf)@(Cf,3) matmul
    # + tap shift-add.  No 3x im2col duplicate, no 128-wide inflated output.
    Bx, Hf, Wf, Cf = x4.shape
    taps = matmul_bias_act(x4.reshape(Bx * Hf * Wf, Cf).astype(jnp.bfloat16),
                           prep["post_w"], prep["post_zero_b"],
                           act="none", max_tile=2048)
    taps = taps.reshape(Bx, Hf, Wf, 3)
    score = taps[:, :, :, 2] + prep["post_b"]            # k=2 tap: no shift
    for k in (0, 1):
        d = 2 - k
        n = max(Hf - d, 0)
        score = score + jnp.pad(taps[:, :n, :, k], ((0, 0), (Hf - n, 0), (0, 0)))
    return score.reshape(Bx, Hf * Wf), fmap


def multi_period_discriminator_forward(y, y_hat, g, all_prep, upsample_rates, periods):
    B = y.shape[0]
    # batch y and y_hat through each discriminator in one pass (shared params)
    x_all = jnp.concatenate([y, y_hat], axis=0)
    g2d = jnp.concatenate([g[:, :, 0], g[:, :, 0]], axis=0)

    y_d_rs, y_d_gs, fmap_rs, fmap_gs = [], [], [], []
    for period, prep in zip(periods, all_prep):
        score, fmap = disc_p_forward(x_all, g2d, prep, period, upsample_rates)
        y_d_rs.append(score[:B])
        y_d_gs.append(score[B:])
        fmap_rs.append([f[:B] for f in fmap])
        fmap_gs.append([f[B:] for f in fmap])
    return y_d_rs, y_d_gs, fmap_rs, fmap_gs


# ----------------------------------------------------------------------------
if __name__ == "__main__":
    upsample_rates = [2, 2]
    gin_channels = 8
    periods = [2, 3, 5, 7, 11, 17]
    B, T = 2, 64

    key = jax.random.PRNGKey(0)
    k_y, k_yh, k_g, k_p = jax.random.split(key, 4)
    y = jax.random.normal(k_y, (B, 1, T), jnp.float32)
    y_hat = jax.random.normal(k_yh, (B, 1, T), jnp.float32)
    g = jax.random.normal(k_g, (B, gin_channels, 1), jnp.float32)

    param_keys = jax.random.split(k_p, len(periods))
    raw_params = [init_disc_p_params(pk, upsample_rates, gin_channels) for pk in param_keys]
    prepared = [prepare_disc_params(p) for p in raw_params]

    fwd = jax.jit(functools.partial(
        multi_period_discriminator_forward,
        upsample_rates=tuple(upsample_rates), periods=tuple(periods)))

    outs = fwd(y, y_hat, g, prepared)
    jax.block_until_ready(outs)
    print("KERNEL_OK")
</pallas_src>

<mosaic_0001>
module attributes {stable_mosaic.version = 11 : i64} {
  func.func @_matmul_bias_act_kernel(%arg0: i32, %arg1: memref<72x6xbf16, #tpu.memory_space<vmem>>, %arg2: memref<6x128xbf16, #tpu.memory_space<vmem>>, %arg3: memref<1x128xf32, #tpu.memory_space<vmem>>, %arg4: memref<72x128xf32, #tpu.memory_space<vmem>>) attributes {dimension_semantics = [#tpu.dimension_semantics<parallel>], iteration_bounds = array<i64: 2>, scalar_prefetch = 0 : i64, scratch_operands = 0 : i64, tpu.core_type = #tpu.core_type<tc>, window_params = [{transform_indices = @transform_0, window_bounds = array<i64: 72, 6>}, {pipeline_mode = #tpu.pipeline_mode<synchronous>, transform_indices = @transform_1, window_bounds = array<i64: 6, 128>}, {pipeline_mode = #tpu.pipeline_mode<synchronous>, transform_indices = @transform_2, window_bounds = array<i64: 1, 128>}, {transform_indices = @transform_3, window_bounds = array<i64: 72, 128>}]} {
    %c0 = arith.constant 0 : index
    %c0_0 = arith.constant 0 : index
    %0 = vector.load %arg1[%c0, %c0_0] : memref<72x6xbf16, #tpu.memory_space<vmem>>, vector<72x6xbf16>
    %c0_1 = arith.constant 0 : index
    %c0_2 = arith.constant 0 : index
    %1 = vector.load %arg2[%c0_1, %c0_2] : memref<6x128xbf16, #tpu.memory_space<vmem>>, vector<6x128xbf16>
    %cst = arith.constant dense<0.000000e+00> : vector<72x128xf32>
    %2 = tpu.matmul %0, %1, %cst {dimension_numbers = #tpu.dot_dimension_numbers<[1], [0], [0], [1], [0, 0, 1, 1], [], []>} : vector<72x6xbf16>, vector<6x128xbf16>, vector<72x128xf32> -> vector<72x128xf32>
    %c0_3 = arith.constant 0 : index
    %c0_4 = arith.constant 0 : index
    %3 = vector.load %arg3[%c0_3, %c0_4] : memref<1x128xf32, #tpu.memory_space<vmem>>, vector<1x128xf32>
    %4 = vector.broadcast %3 : vector<1x128xf32> to vector<72x128xf32>
    %5 = arith.addf %2, %4 : vector<72x128xf32>
    %cst_5 = arith.constant 0.000000e+00 : f32
    %6 = vector.broadcast %cst_5 : f32 to vector<72x128xf32>
    %7 = arith.cmpf oge, %5, %6 : vector<72x128xf32>
    %cst_6 = arith.constant 1.000000e-01 : f32
    %8 = vector.broadcast %cst_6 : f32 to vector<72x128xf32>
    %9 = arith.mulf %8, %5 : vector<72x128xf32>
    %10 = arith.select %7, %5, %9 : vector<72x128xi1>, vector<72x128xf32>
    %c0_7 = arith.constant 0 : index
    %c0_8 = arith.constant 0 : index
    %11 = vector.load %arg4[%c0_7, %c0_8] : memref<72x128xf32, #tpu.memory_space<vmem>>, vector<72x128xf32>
    tpu.vector_store %arg4[%c0_7, %c0_8], %10 {strides = array<i32>} : memref<72x128xf32, #tpu.memory_space<vmem>>, vector<72x128xf32>,
    return
  }
  func.func @transform_0(%arg0: i32) -> (i32, i32) {
    %c0_i32 = arith.constant 0 : i32
    %c0_i32_0 = arith.constant 0 : i32
    return %arg0, %c0_i32 : i32, i32
  }
  func.func @transform_1(%arg0: i32) -> (i32, i32) {
    %c0_i32 = arith.constant 0 : i32
    %c0_i32_0 = arith.constant 0 : i32
    %c0_i32_1 = arith.constant 0 : i32
    return %c0_i32, %c0_i32_0 : i32, i32
  }
  func.func @transform_2(%arg0: i32) -> (i32, i32) {
    %c0_i32 = arith.constant 0 : i32
    %c0_i32_0 = arith.constant 0 : i32
    %c0_i32_1 = arith.constant 0 : i32
    return %c0_i32, %c0_i32_0 : i32, i32
  }
  func.func @transform_3(%arg0: i32) -> (i32, i32) {
    %c0_i32 = arith.constant 0 : i32
    %c0_i32_0 = arith.constant 0 : i32
    return %arg0, %c0_i32 : i32, i32
  }
}

module attributes {stable_mosaic.version = 11 : i64} {
  func.func @_pointwise_mlp_kernel(%arg0: i32, %arg1: memref<32x128xbf16, #tpu.memory_space<vmem>>, %arg2: memref<128x512xbf16, #tpu.memory_space<vmem>>, %arg3: memref<1x512xf32, #tpu.memory_space<vmem>>, %arg4: memref<512x256xbf16, #tpu.memory_space<vmem>>, %arg5: memref<1x256xf32, #tpu.memory_space<vmem>>, %arg6: memref<32x256xf32, #tpu.memory_space<vmem>>) attributes {dimension_semantics = [#tpu.dimension_semantics<parallel>], iteration_bounds = array<i64: 2>, scalar_prefetch = 0 : i64, scratch_operands = 0 : i64, tpu.core_type = #tpu.core_type<tc>, window_params = [{transform_indices = @transform_0, window_bounds = array<i64: 32, 128>}, {pipeline_mode = #tpu.pipeline_mode<synchronous>, transform_indices = @transform_1, window_bounds = array<i64: 128, 512>}, {pipeline_mode = #tpu.pipeline_mode<synchronous>, transform_indices = @transform_2, window_bounds = array<i64: 1, 512>}, {pipeline_mode = #tpu.pipeline_mode<synchronous>, transform_indices = @transform_3, window_bounds = array<i64: 512, 256>}, {pipeline_mode = #tpu.pipeline_mode<synchronous>, transform_indices = @transform_4, window_bounds = array<i64: 1, 256>}, {transform_indices = @transform_5, window_bounds = array<i64: 32, 256>}]} {
    %c0 = arith.constant 0 : index
    %c0_0 = arith.constant 0 : index
    %0 = vector.load %arg1[%c0, %c0_0] : memref<32x128xbf16, #tpu.memory_space<vmem>>, vector<32x128xbf16>
    %c0_1 = arith.constant 0 : index
    %c0_2 = arith.constant 0 : index
    %1 = vector.load %arg2[%c0_1, %c0_2] : memref<128x512xbf16, #tpu.memory_space<vmem>>, vector<128x512xbf16>
    %cst = arith.constant dense<0.000000e+00> : vector<32x512xf32>
    %2 = tpu.matmul %0, %1, %cst {dimension_numbers = #tpu.dot_dimension_numbers<[1], [0], [0], [1], [0, 0, 1, 1], [], []>} : vector<32x128xbf16>, vector<128x512xbf16>, vector<32x512xf32> -> vector<32x512xf32>
    %c0_3 = arith.constant 0 : index
    %c0_4 = arith.constant 0 : index
    %3 = vector.load %arg3[%c0_3, %c0_4] : memref<1x512xf32, #tpu.memory_space<vmem>>, vector<1x512xf32>
    %4 = vector.broadcast %3 : vector<1x512xf32> to vector<32x512xf32>
    %5 = arith.addf %2, %4 : vector<32x512xf32>
    %6 = arith.mulf %5, %5 : vector<32x512xf32>
    %7 = arith.mulf %5, %6 : vector<32x512xf32>
    %cst_5 = arith.constant 4.471500e-02 : f32
    %8 = vector.broadcast %cst_5 : f32 to vector<32x512xf32>
    %9 = arith.mulf %8, %7 : vector<32x512xf32>
    %10 = arith.addf %5, %9 : vector<32x512xf32>
    %cst_6 = arith.constant 0.797884583 : f32
    %11 = vector.broadcast %cst_6 : f32 to vector<32x512xf32>
    %12 = arith.mulf %11, %10 : vector<32x512xf32>
    %13 = math.tanh %12 : vector<32x512xf32>
    %cst_7 = arith.constant 1.000000e+00 : f32
    %14 = vector.broadcast %cst_7 : f32 to vector<32x512xf32>
    %15 = arith.addf %14, %13 : vector<32x512xf32>
    %cst_8 = arith.constant 5.000000e-01 : f32
    %16 = vector.broadcast %cst_8 : f32 to vector<32x512xf32>
    %17 = arith.mulf %16, %15 : vector<32x512xf32>
    %18 = arith.mulf %5, %17 : vector<32x512xf32>
    %19 = arith.truncf %18 : vector<32x512xf32> to vector<32x512xbf16>
    %c0_9 = arith.constant 0 : index
    %c0_10 = arith.constant 0 : index
    %20 = vector.load %arg4[%c0_9, %c0_10] : memref<512x256xbf16, #tpu.memory_space<vmem>>, vector<512x256xbf16>
    %cst_11 = arith.constant dense<0.000000e+00> : vector<32x256xf32>
    %21 = tpu.matmul %19, %20, %cst_11 {dimension_numbers = #tpu.dot_dimension_numbers<[1], [0], [0], [1], [0, 0, 1, 1], [], []>} : vector<32x512xbf16>, vector<512x256xbf16>, vector<32x256xf32> -> vector<32x256xf32>
    %c0_12 = arith.constant 0 : index
    %c0_13 = arith.constant 0 : index
    %22 = vector.load %arg5[%c0_12, %c0_13] : memref<1x256xf32, #tpu.memory_space<vmem>>, vector<1x256xf32>
    %23 = vector.broadcast %22 : vector<1x256xf32> to vector<32x256xf32>
    %24 = arith.addf %21, %23 : vector<32x256xf32>
    %25 = arith.mulf %24, %24 : vector<32x256xf32>
    %26 = arith.mulf %24, %25 : vector<32x256xf32>
    %cst_14 = arith.constant 4.471500e-02 : f32
    %27 = vector.broadcast %cst_14 : f32 to vector<32x256xf32>
    %28 = arith.mulf %27, %26 : vector<32x256xf32>
    %29 = arith.addf %24, %28 : vector<32x256xf32>
    %cst_15 = arith.constant 0.797884583 : f32
    %30 = vector.broadcast %cst_15 : f32 to vector<32x256xf32>
    %31 = arith.mulf %30, %29 : vector<32x256xf32>
    %32 = math.tanh %31 : vector<32x256xf32>
    %cst_16 = arith.constant 1.000000e+00 : f32
    %33 = vector.broadcast %cst_16 : f32 to vector<32x256xf32>
    %34 = arith.addf %33, %32 : vector<32x256xf32>
    %cst_17 = arith.constant 5.000000e-01 : f32
    %35 = vector.broadcast %cst_17 : f32 to vector<32x256xf32>
    %36 = arith.mulf %35, %34 : vector<32x256xf32>
    %37 = arith.mulf %24, %36 : vector<32x256xf32>
    %c0_18 = arith.constant 0 : index
    %c0_19 = arith.constant 0 : index
    %38 = vector.load %arg6[%c0_18, %c0_19] : memref<32x256xf32, #tpu.memory_space<vmem>>, vector<32x256xf32>
    tpu.vector_store %arg6[%c0_18, %c0_19], %37 {strides = array<i32>} : memref<32x256xf32, #tpu.memory_space<vmem>>, vector<32x256xf32>,
    return
  }
  func.func @transform_0(%arg0: i32) -> (i32, i32) {
    %c0_i32 = arith.constant 0 : i32
    %c0_i32_0 = arith.constant 0 : i32
    return %arg0, %c0_i32 : i32, i32
  }
  func.func @transform_1(%arg0: i32) -> (i32, i32) {
    %c0_i32 = arith.constant 0 : i32
    %c0_i32_0 = arith.constant 0 : i32
    %c0_i32_1 = arith.constant 0 : i32
    return %c0_i32, %c0_i32_0 : i32, i32
  }
  func.func @transform_2(%arg0: i32) -> (i32, i32) {
    %c0_i32 = arith.constant 0 : i32
    %c0_i32_0 = arith.constant 0 : i32
    %c0_i32_1 = arith.constant 0 : i32
    return %c0_i32, %c0_i32_0 : i32, i32
  }
  func.func @transform_3(%arg0: i32) -> (i32, i32) {
    %c0_i32 = arith.constant 0 : i32
    %c0_i32_0 = arith.constant 0 : i32
    %c0_i32_1 = arith.constant 0 : i32
    return %c0_i32, %c0_i32_0 : i32, i32
  }
  func.func @transform_4(%arg0: i32) -> (i32, i32) {
    %c0_i32 = arith.constant 0 : i32
    %c0_i32_0 = arith.constant 0 : i32
    %c0_i32_1 = arith.constant 0 : i32
    return %c0_i32, %c0_i32_0 : i32, i32
  }
  func.func @transform_5(%arg0: i32) -> (i32, i32) {
    %c0_i32 = arith.constant 0 : i32
    %c0_i32_0 = arith.constant 0 : i32
    return %arg0, %c0_i32 : i32, i32
  }
}

module attributes {stable_mosaic.version = 11 : i64} {
  func.func @_matmul_bias_act_kernel(%arg0: i32, %arg1: memref<32x256xbf16, #tpu.memory_space<vmem>>, %arg2: memref<256x3xbf16, #tpu.memory_space<vmem>>, %arg3: memref<1x3xf32, #tpu.memory_space<vmem>>, %arg4: memref<32x3xf32, #tpu.memory_space<vmem>>) attributes {dimension_semantics = [#tpu.dimension_semantics<parallel>], iteration_bounds = array<i64: 2>, scalar_prefetch = 0 : i64, scratch_operands = 0 : i64, tpu.core_type = #tpu.core_type<tc>, window_params = [{transform_indices = @transform_0, window_bounds = array<i64: 32, 256>}, {pipeline_mode = #tpu.pipeline_mode<synchronous>, transform_indices = @transform_1, window_bounds = array<i64: 256, 3>}, {pipeline_mode = #tpu.pipeline_mode<synchronous>, transform_indices = @transform_2, window_bounds = array<i64: 1, 3>}, {transform_indices = @transform_3, window_bounds = array<i64: 32, 3>}]} {
    %c0 = arith.constant 0 : index
    %c0_0 = arith.constant 0 : index
    %0 = vector.load %arg1[%c0, %c0_0] : memref<32x256xbf16, #tpu.memory_space<vmem>>, vector<32x256xbf16>
    %c0_1 = arith.constant 0 : index
    %c0_2 = arith.constant 0 : index
    %1 = vector.load %arg2[%c0_1, %c0_2] : memref<256x3xbf16, #tpu.memory_space<vmem>>, vector<256x3xbf16>
    %cst = arith.constant dense<0.000000e+00> : vector<32x3xf32>
    %2 = tpu.matmul %0, %1, %cst {dimension_numbers = #tpu.dot_dimension_numbers<[1], [0], [0], [1], [0, 0, 1, 1], [], []>} : vector<32x256xbf16>, vector<256x3xbf16>, vector<32x3xf32> -> vector<32x3xf32>
    %c0_3 = arith.constant 0 : index
    %c0_4 = arith.constant 0 : index
    %3 = vector.load %arg3[%c0_3, %c0_4] : memref<1x3xf32, #tpu.memory_space<vmem>>, vector<1x3xf32>
    %4 = vector.broadcast %3 : vector<1x3xf32> to vector<32x3xf32>
    %5 = arith.addf %2, %4 : vector<32x3xf32>
    %c0_5 = arith.constant 0 : index
    %c0_6 = arith.constant 0 : index
    %6 = vector.load %arg4[%c0_5, %c0_6] : memref<32x3xf32, #tpu.memory_space<vmem>>, vector<32x3xf32>
    tpu.vector_store %arg4[%c0_5, %c0_6], %5 {strides = array<i32>} : memref<32x3xf32, #tpu.memory_space<vmem>>, vector<32x3xf32>,
    return
  }
  func.func @transform_0(%arg0: i32) -> (i32, i32) {
    %c0_i32 = arith.constant 0 : i32
    %c0_i32_0 = arith.constant 0 : i32
    return %arg0, %c0_i32 : i32, i32
  }
  func.func @transform_1(%arg0: i32) -> (i32, i32) {
    %c0_i32 = arith.constant 0 : i32
    %c0_i32_0 = arith.constant 0 : i32
    %c0_i32_1 = arith.constant 0 : i32
    return %c0_i32, %c0_i32_0 : i32, i32
  }
  func.func @transform_2(%arg0: i32) -> (i32, i32) {
    %c0_i32 = arith.constant 0 : i32
    %c0_i32_0 = arith.constant 0 : i32
    %c0_i32_1 = arith.constant 0 : i32
    return %c0_i32, %c0_i32_0 : i32, i32
  }
  func.func @transform_3(%arg0: i32) -> (i32, i32) {
    %c0_i32 = arith.constant 0 : i32
    %c0_i32_0 = arith.constant 0 : i32
    return %arg0, %c0_i32 : i32, i32
  }
}

module attributes {stable_mosaic.version = 11 : i64} {
  func.func @_matmul_bias_act_kernel(%arg0: i32, %arg1: memref<64x6xbf16, #tpu.memory_space<vmem>>, %arg2: memref<6x128xbf16, #tpu.memory_space<vmem>>, %arg3: memref<1x128xf32, #tpu.memory_space<vmem>>, %arg4: memref<64x128xf32, #tpu.memory_space<vmem>>) attributes {dimension_semantics = [#tpu.dimension_semantics<parallel>], iteration_bounds = array<i64: 2>, scalar_prefetch = 0 : i64, scratch_operands = 0 : i64, tpu.core_type = #tpu.core_type<tc>, window_params = [{transform_indices = @transform_0, window_bounds = array<i64: 64, 6>}, {pipeline_mode = #tpu.pipeline_mode<synchronous>, transform_indices = @transform_1, window_bounds = array<i64: 6, 128>}, {pipeline_mode = #tpu.pipeline_mode<synchronous>, transform_indices = @transform_2, window_bounds = array<i64: 1, 128>}, {transform_indices = @transform_3, window_bounds = array<i64: 64, 128>}]} {
    %c0 = arith.constant 0 : index
    %c0_0 = arith.constant 0 : index
    %0 = vector.load %arg1[%c0, %c0_0] : memref<64x6xbf16, #tpu.memory_space<vmem>>, vector<64x6xbf16>
    %c0_1 = arith.constant 0 : index
    %c0_2 = arith.constant 0 : index
    %1 = vector.load %arg2[%c0_1, %c0_2] : memref<6x128xbf16, #tpu.memory_space<vmem>>, vector<6x128xbf16>
    %cst = arith.constant dense<0.000000e+00> : vector<64x128xf32>
    %2 = tpu.matmul %0, %1, %cst {dimension_numbers = #tpu.dot_dimension_numbers<[1], [0], [0], [1], [0, 0, 1, 1], [], []>} : vector<64x6xbf16>, vector<6x128xbf16>, vector<64x128xf32> -> vector<64x128xf32>
    %c0_3 = arith.constant 0 : index
    %c0_4 = arith.constant 0 : index
    %3 = vector.load %arg3[%c0_3, %c0_4] : memref<1x128xf32, #tpu.memory_space<vmem>>, vector<1x128xf32>
    %4 = vector.broadcast %3 : vector<1x128xf32> to vector<64x128xf32>
    %5 = arith.addf %2, %4 : vector<64x128xf32>
    %cst_5 = arith.constant 0.000000e+00 : f32
    %6 = vector.broadcast %cst_5 : f32 to vector<64x128xf32>
    %7 = arith.cmpf oge, %5, %6 : vector<64x128xf32>
    %cst_6 = arith.constant 1.000000e-01 : f32
    %8 = vector.broadcast %cst_6 : f32 to vector<64x128xf32>
    %9 = arith.mulf %8, %5 : vector<64x128xf32>
    %10 = arith.select %7, %5, %9 : vector<64x128xi1>, vector<64x128xf32>
    %c0_7 = arith.constant 0 : index
    %c0_8 = arith.constant 0 : index
    %11 = vector.load %arg4[%c0_7, %c0_8] : memref<64x128xf32, #tpu.memory_space<vmem>>, vector<64x128xf32>
    tpu.vector_store %arg4[%c0_7, %c0_8], %10 {strides = array<i32>} : memref<64x128xf32, #tpu.memory_space<vmem>>, vector<64x128xf32>,
    return
  }
  func.func @transform_0(%arg0: i32) -> (i32, i32) {
    %c0_i32 = arith.constant 0 : i32
    %c0_i32_0 = arith.constant 0 : i32
    return %arg0, %c0_i32 : i32, i32
  }
  func.func @transform_1(%arg0: i32) -> (i32, i32) {
    %c0_i32 = arith.constant 0 : i32
    %c0_i32_0 = arith.constant 0 : i32
    %c0_i32_1 = arith.constant 0 : i32
    return %c0_i32, %c0_i32_0 : i32, i32
  }
  func.func @transform_2(%arg0: i32) -> (i32, i32) {
    %c0_i32 = arith.constant 0 : i32
    %c0_i32_0 = arith.constant 0 : i32
    %c0_i32_1 = arith.constant 0 : i32
    return %c0_i32, %c0_i32_0 : i32, i32
  }
  func.func @transform_3(%arg0: i32) -> (i32, i32) {
    %c0_i32 = arith.constant 0 : i32
    %c0_i32_0 = arith.constant 0 : i32
    return %arg0, %c0_i32 : i32, i32
  }
}

module attributes {stable_mosaic.version = 11 : i64} {
  func.func @_matmul_bias_act_kernel(%arg0: i32, %arg1: memref<24x256xbf16, #tpu.memory_space<vmem>>, %arg2: memref<256x3xbf16, #tpu.memory_space<vmem>>, %arg3: memref<1x3xf32, #tpu.memory_space<vmem>>, %arg4: memref<24x3xf32, #tpu.memory_space<vmem>>) attributes {dimension_semantics = [#tpu.dimension_semantics<parallel>], iteration_bounds = array<i64: 2>, scalar_prefetch = 0 : i64, scratch_operands = 0 : i64, tpu.core_type = #tpu.core_type<tc>, window_params = [{transform_indices = @transform_0, window_bounds = array<i64: 24, 256>}, {pipeline_mode = #tpu.pipeline_mode<synchronous>, transform_indices = @transform_1, window_bounds = array<i64: 256, 3>}, {pipeline_mode = #tpu.pipeline_mode<synchronous>, transform_indices = @transform_2, window_bounds = array<i64: 1, 3>}, {transform_indices = @transform_3, window_bounds = array<i64: 24, 3>}]} {
    %c0 = arith.constant 0 : index
    %c0_0 = arith.constant 0 : index
    %0 = vector.load %arg1[%c0, %c0_0] : memref<24x256xbf16, #tpu.memory_space<vmem>>, vector<24x256xbf16>
    %c0_1 = arith.constant 0 : index
    %c0_2 = arith.constant 0 : index
    %1 = vector.load %arg2[%c0_1, %c0_2] : memref<256x3xbf16, #tpu.memory_space<vmem>>, vector<256x3xbf16>
    %cst = arith.constant dense<0.000000e+00> : vector<24x3xf32>
    %2 = tpu.matmul %0, %1, %cst {dimension_numbers = #tpu.dot_dimension_numbers<[1], [0], [0], [1], [0, 0, 1, 1], [], []>} : vector<24x256xbf16>, vector<256x3xbf16>, vector<24x3xf32> -> vector<24x3xf32>
    %c0_3 = arith.constant 0 : index
    %c0_4 = arith.constant 0 : index
    %3 = vector.load %arg3[%c0_3, %c0_4] : memref<1x3xf32, #tpu.memory_space<vmem>>, vector<1x3xf32>
    %4 = vector.broadcast %3 : vector<1x3xf32> to vector<24x3xf32>
    %5 = arith.addf %2, %4 : vector<24x3xf32>
    %c0_5 = arith.constant 0 : index
    %c0_6 = arith.constant 0 : index
    %6 = vector.load %arg4[%c0_5, %c0_6] : memref<24x3xf32, #tpu.memory_space<vmem>>, vector<24x3xf32>
    tpu.vector_store %arg4[%c0_5, %c0_6], %5 {strides = array<i32>} : memref<24x3xf32, #tpu.memory_space<vmem>>, vector<24x3xf32>,
    return
  }
  func.func @transform_0(%arg0: i32) -> (i32, i32) {
    %c0_i32 = arith.constant 0 : i32
    %c0_i32_0 = arith.constant 0 : i32
    return %arg0, %c0_i32 : i32, i32
  }
  func.func @transform_1(%arg0: i32) -> (i32, i32) {
    %c0_i32 = arith.constant 0 : i32
    %c0_i32_0 = arith.constant 0 : i32
    %c0_i32_1 = arith.constant 0 : i32
    return %c0_i32, %c0_i32_0 : i32, i32
  }
  func.func @transform_2(%arg0: i32) -> (i32, i32) {
    %c0_i32 = arith.constant 0 : i32
    %c0_i32_0 = arith.constant 0 : i32
    %c0_i32_1 = arith.constant 0 : i32
    return %c0_i32, %c0_i32_0 : i32, i32
  }
  func.func @transform_3(%arg0: i32) -> (i32, i32) {
    %c0_i32 = arith.constant 0 : i32
    %c0_i32_0 = arith.constant 0 : i32
    return %arg0, %c0_i32 : i32, i32
  }
}

module attributes {stable_mosaic.version = 11 : i64} {
  func.func @_pointwise_mlp_kernel(%arg0: i32, %arg1: memref<24x128xbf16, #tpu.memory_space<vmem>>, %arg2: memref<128x512xbf16, #tpu.memory_space<vmem>>, %arg3: memref<1x512xf32, #tpu.memory_space<vmem>>, %arg4: memref<512x256xbf16, #tpu.memory_space<vmem>>, %arg5: memref<1x256xf32, #tpu.memory_space<vmem>>, %arg6: memref<24x256xf32, #tpu.memory_space<vmem>>) attributes {dimension_semantics = [#tpu.dimension_semantics<parallel>], iteration_bounds = array<i64: 2>, scalar_prefetch = 0 : i64, scratch_operands = 0 : i64, tpu.core_type = #tpu.core_type<tc>, window_params = [{transform_indices = @transform_0, window_bounds = array<i64: 24, 128>}, {pipeline_mode = #tpu.pipeline_mode<synchronous>, transform_indices = @transform_1, window_bounds = array<i64: 128, 512>}, {pipeline_mode = #tpu.pipeline_mode<synchronous>, transform_indices = @transform_2, window_bounds = array<i64: 1, 512>}, {pipeline_mode = #tpu.pipeline_mode<synchronous>, transform_indices = @transform_3, window_bounds = array<i64: 512, 256>}, {pipeline_mode = #tpu.pipeline_mode<synchronous>, transform_indices = @transform_4, window_bounds = array<i64: 1, 256>}, {transform_indices = @transform_5, window_bounds = array<i64: 24, 256>}]} {
    %c0 = arith.constant 0 : index
    %c0_0 = arith.constant 0 : index
    %0 = vector.load %arg1[%c0, %c0_0] : memref<24x128xbf16, #tpu.memory_space<vmem>>, vector<24x128xbf16>
    %c0_1 = arith.constant 0 : index
    %c0_2 = arith.constant 0 : index
    %1 = vector.load %arg2[%c0_1, %c0_2] : memref<128x512xbf16, #tpu.memory_space<vmem>>, vector<128x512xbf16>
    %cst = arith.constant dense<0.000000e+00> : vector<24x512xf32>
    %2 = tpu.matmul %0, %1, %cst {dimension_numbers = #tpu.dot_dimension_numbers<[1], [0], [0], [1], [0, 0, 1, 1], [], []>} : vector<24x128xbf16>, vector<128x512xbf16>, vector<24x512xf32> -> vector<24x512xf32>
    %c0_3 = arith.constant 0 : index
    %c0_4 = arith.constant 0 : index
    %3 = vector.load %arg3[%c0_3, %c0_4] : memref<1x512xf32, #tpu.memory_space<vmem>>, vector<1x512xf32>
    %4 = vector.broadcast %3 : vector<1x512xf32> to vector<24x512xf32>
    %5 = arith.addf %2, %4 : vector<24x512xf32>
    %6 = arith.mulf %5, %5 : vector<24x512xf32>
    %7 = arith.mulf %5, %6 : vector<24x512xf32>
    %cst_5 = arith.constant 4.471500e-02 : f32
    %8 = vector.broadcast %cst_5 : f32 to vector<24x512xf32>
    %9 = arith.mulf %8, %7 : vector<24x512xf32>
    %10 = arith.addf %5, %9 : vector<24x512xf32>
    %cst_6 = arith.constant 0.797884583 : f32
    %11 = vector.broadcast %cst_6 : f32 to vector<24x512xf32>
    %12 = arith.mulf %11, %10 : vector<24x512xf32>
    %13 = math.tanh %12 : vector<24x512xf32>
    %cst_7 = arith.constant 1.000000e+00 : f32
    %14 = vector.broadcast %cst_7 : f32 to vector<24x512xf32>
    %15 = arith.addf %14, %13 : vector<24x512xf32>
    %cst_8 = arith.constant 5.000000e-01 : f32
    %16 = vector.broadcast %cst_8 : f32 to vector<24x512xf32>
    %17 = arith.mulf %16, %15 : vector<24x512xf32>
    %18 = arith.mulf %5, %17 : vector<24x512xf32>
    %19 = arith.truncf %18 : vector<24x512xf32> to vector<24x512xbf16>
    %c0_9 = arith.constant 0 : index
    %c0_10 = arith.constant 0 : index
    %20 = vector.load %arg4[%c0_9, %c0_10] : memref<512x256xbf16, #tpu.memory_space<vmem>>, vector<512x256xbf16>
    %cst_11 = arith.constant dense<0.000000e+00> : vector<24x256xf32>
    %21 = tpu.matmul %19, %20, %cst_11 {dimension_numbers = #tpu.dot_dimension_numbers<[1], [0], [0], [1], [0, 0, 1, 1], [], []>} : vector<24x512xbf16>, vector<512x256xbf16>, vector<24x256xf32> -> vector<24x256xf32>
    %c0_12 = arith.constant 0 : index
    %c0_13 = arith.constant 0 : index
    %22 = vector.load %arg5[%c0_12, %c0_13] : memref<1x256xf32, #tpu.memory_space<vmem>>, vector<1x256xf32>
    %23 = vector.broadcast %22 : vector<1x256xf32> to vector<24x256xf32>
    %24 = arith.addf %21, %23 : vector<24x256xf32>
    %25 = arith.mulf %24, %24 : vector<24x256xf32>
    %26 = arith.mulf %24, %25 : vector<24x256xf32>
    %cst_14 = arith.constant 4.471500e-02 : f32
    %27 = vector.broadcast %cst_14 : f32 to vector<24x256xf32>
    %28 = arith.mulf %27, %26 : vector<24x256xf32>
    %29 = arith.addf %24, %28 : vector<24x256xf32>
    %cst_15 = arith.constant 0.797884583 : f32
    %30 = vector.broadcast %cst_15 : f32 to vector<24x256xf32>
    %31 = arith.mulf %30, %29 : vector<24x256xf32>
    %32 = math.tanh %31 : vector<24x256xf32>
    %cst_16 = arith.constant 1.000000e+00 : f32
    %33 = vector.broadcast %cst_16 : f32 to vector<24x256xf32>
    %34 = arith.addf %33, %32 : vector<24x256xf32>
    %cst_17 = arith.constant 5.000000e-01 : f32
    %35 = vector.broadcast %cst_17 : f32 to vector<24x256xf32>
    %36 = arith.mulf %35, %34 : vector<24x256xf32>
    %37 = arith.mulf %24, %36 : vector<24x256xf32>
    %c0_18 = arith.constant 0 : index
    %c0_19 = arith.constant 0 : index
    %38 = vector.load %arg6[%c0_18, %c0_19] : memref<24x256xf32, #tpu.memory_space<vmem>>, vector<24x256xf32>
    tpu.vector_store %arg6[%c0_18, %c0_19], %37 {strides = array<i32>} : memref<24x256xf32, #tpu.memory_space<vmem>>, vector<24x256xf32>,
    return
  }
  func.func @transform_0(%arg0: i32) -> (i32, i32) {
    %c0_i32 = arith.constant 0 : i32
    %c0_i32_0 = arith.constant 0 : i32
    return %arg0, %c0_i32 : i32, i32
  }
  func.func @transform_1(%arg0: i32) -> (i32, i32) {
    %c0_i32 = arith.constant 0 : i32
    %c0_i32_0 = arith.constant 0 : i32
    %c0_i32_1 = arith.constant 0 : i32
    return %c0_i32, %c0_i32_0 : i32, i32
  }
  func.func @transform_2(%arg0: i32) -> (i32, i32) {
    %c0_i32 = arith.constant 0 : i32
    %c0_i32_0 = arith.constant 0 : i32
    %c0_i32_1 = arith.constant 0 : i32
    return %c0_i32, %c0_i32_0 : i32, i32
  }
  func.func @transform_3(%arg0: i32) -> (i32, i32) {
    %c0_i32 = arith.constant 0 : i32
    %c0_i32_0 = arith.constant 0 : i32
    %c0_i32_1 = arith.constant 0 : i32
    return %c0_i32, %c0_i32_0 : i32, i32
  }
  func.func @transform_4(%arg0: i32) -> (i32, i32) {
    %c0_i32 = arith.constant 0 : i32
    %c0_i32_0 = arith.constant 0 : i32
    %c0_i32_1 = arith.constant 0 : i32
    return %c0_i32, %c0_i32_0 : i32, i32
  }
  func.func @transform_5(%arg0: i32) -> (i32, i32) {
    %c0_i32 = arith.constant 0 : i32
    %c0_i32_0 = arith.constant 0 : i32
    return %arg0, %c0_i32 : i32, i32
  }
}

module attributes {stable_mosaic.version = 11 : i64} {
  func.func @_matmul_bias_act_kernel(%arg0: i32, %arg1: memref<40x256xbf16, #tpu.memory_space<vmem>>, %arg2: memref<256x3xbf16, #tpu.memory_space<vmem>>, %arg3: memref<1x3xf32, #tpu.memory_space<vmem>>, %arg4: memref<40x3xf32, #tpu.memory_space<vmem>>) attributes {dimension_semantics = [#tpu.dimension_semantics<parallel>], iteration_bounds = array<i64: 2>, scalar_prefetch = 0 : i64, scratch_operands = 0 : i64, tpu.core_type = #tpu.core_type<tc>, window_params = [{transform_indices = @transform_0, window_bounds = array<i64: 40, 256>}, {pipeline_mode = #tpu.pipeline_mode<synchronous>, transform_indices = @transform_1, window_bounds = array<i64: 256, 3>}, {pipeline_mode = #tpu.pipeline_mode<synchronous>, transform_indices = @transform_2, window_bounds = array<i64: 1, 3>}, {transform_indices = @transform_3, window_bounds = array<i64: 40, 3>}]} {
    %c0 = arith.constant 0 : index
    %c0_0 = arith.constant 0 : index
    %0 = vector.load %arg1[%c0, %c0_0] : memref<40x256xbf16, #tpu.memory_space<vmem>>, vector<40x256xbf16>
    %c0_1 = arith.constant 0 : index
    %c0_2 = arith.constant 0 : index
    %1 = vector.load %arg2[%c0_1, %c0_2] : memref<256x3xbf16, #tpu.memory_space<vmem>>, vector<256x3xbf16>
    %cst = arith.constant dense<0.000000e+00> : vector<40x3xf32>
    %2 = tpu.matmul %0, %1, %cst {dimension_numbers = #tpu.dot_dimension_numbers<[1], [0], [0], [1], [0, 0, 1, 1], [], []>} : vector<40x256xbf16>, vector<256x3xbf16>, vector<40x3xf32> -> vector<40x3xf32>
    %c0_3 = arith.constant 0 : index
    %c0_4 = arith.constant 0 : index
    %3 = vector.load %arg3[%c0_3, %c0_4] : memref<1x3xf32, #tpu.memory_space<vmem>>, vector<1x3xf32>
    %4 = vector.broadcast %3 : vector<1x3xf32> to vector<40x3xf32>
    %5 = arith.addf %2, %4 : vector<40x3xf32>
    %c0_5 = arith.constant 0 : index
    %c0_6 = arith.constant 0 : index
    %6 = vector.load %arg4[%c0_5, %c0_6] : memref<40x3xf32, #tpu.memory_space<vmem>>, vector<40x3xf32>
    tpu.vector_store %arg4[%c0_5, %c0_6], %5 {strides = array<i32>} : memref<40x3xf32, #tpu.memory_space<vmem>>, vector<40x3xf32>,
    return
  }
  func.func @transform_0(%arg0: i32) -> (i32, i32) {
    %c0_i32 = arith.constant 0 : i32
    %c0_i32_0 = arith.constant 0 : i32
    return %arg0, %c0_i32 : i32, i32
  }
  func.func @transform_1(%arg0: i32) -> (i32, i32) {
    %c0_i32 = arith.constant 0 : i32
    %c0_i32_0 = arith.constant 0 : i32
    %c0_i32_1 = arith.constant 0 : i32
    return %c0_i32, %c0_i32_0 : i32, i32
  }
  func.func @transform_2(%arg0: i32) -> (i32, i32) {
    %c0_i32 = arith.constant 0 : i32
    %c0_i32_0 = arith.constant 0 : i32
    %c0_i32_1 = arith.constant 0 : i32
    return %c0_i32, %c0_i32_0 : i32, i32
  }
  func.func @transform_3(%arg0: i32) -> (i32, i32) {
    %c0_i32 = arith.constant 0 : i32
    %c0_i32_0 = arith.constant 0 : i32
    return %arg0, %c0_i32 : i32, i32
  }
}

module attributes {stable_mosaic.version = 11 : i64} {
  func.func @_pointwise_mlp_kernel(%arg0: i32, %arg1: memref<40x128xbf16, #tpu.memory_space<vmem>>, %arg2: memref<128x512xbf16, #tpu.memory_space<vmem>>, %arg3: memref<1x512xf32, #tpu.memory_space<vmem>>, %arg4: memref<512x256xbf16, #tpu.memory_space<vmem>>, %arg5: memref<1x256xf32, #tpu.memory_space<vmem>>, %arg6: memref<40x256xf32, #tpu.memory_space<vmem>>) attributes {dimension_semantics = [#tpu.dimension_semantics<parallel>], iteration_bounds = array<i64: 2>, scalar_prefetch = 0 : i64, scratch_operands = 0 : i64, tpu.core_type = #tpu.core_type<tc>, window_params = [{transform_indices = @transform_0, window_bounds = array<i64: 40, 128>}, {pipeline_mode = #tpu.pipeline_mode<synchronous>, transform_indices = @transform_1, window_bounds = array<i64: 128, 512>}, {pipeline_mode = #tpu.pipeline_mode<synchronous>, transform_indices = @transform_2, window_bounds = array<i64: 1, 512>}, {pipeline_mode = #tpu.pipeline_mode<synchronous>, transform_indices = @transform_3, window_bounds = array<i64: 512, 256>}, {pipeline_mode = #tpu.pipeline_mode<synchronous>, transform_indices = @transform_4, window_bounds = array<i64: 1, 256>}, {transform_indices = @transform_5, window_bounds = array<i64: 40, 256>}]} {
    %c0 = arith.constant 0 : index
    %c0_0 = arith.constant 0 : index
    %0 = vector.load %arg1[%c0, %c0_0] : memref<40x128xbf16, #tpu.memory_space<vmem>>, vector<40x128xbf16>
    %c0_1 = arith.constant 0 : index
    %c0_2 = arith.constant 0 : index
    %1 = vector.load %arg2[%c0_1, %c0_2] : memref<128x512xbf16, #tpu.memory_space<vmem>>, vector<128x512xbf16>
    %cst = arith.constant dense<0.000000e+00> : vector<40x512xf32>
    %2 = tpu.matmul %0, %1, %cst {dimension_numbers = #tpu.dot_dimension_numbers<[1], [0], [0], [1], [0, 0, 1, 1], [], []>} : vector<40x128xbf16>, vector<128x512xbf16>, vector<40x512xf32> -> vector<40x512xf32>
    %c0_3 = arith.constant 0 : index
    %c0_4 = arith.constant 0 : index
    %3 = vector.load %arg3[%c0_3, %c0_4] : memref<1x512xf32, #tpu.memory_space<vmem>>, vector<1x512xf32>
    %4 = vector.broadcast %3 : vector<1x512xf32> to vector<40x512xf32>
    %5 = arith.addf %2, %4 : vector<40x512xf32>
    %6 = arith.mulf %5, %5 : vector<40x512xf32>
    %7 = arith.mulf %5, %6 : vector<40x512xf32>
    %cst_5 = arith.constant 4.471500e-02 : f32
    %8 = vector.broadcast %cst_5 : f32 to vector<40x512xf32>
    %9 = arith.mulf %8, %7 : vector<40x512xf32>
    %10 = arith.addf %5, %9 : vector<40x512xf32>
    %cst_6 = arith.constant 0.797884583 : f32
    %11 = vector.broadcast %cst_6 : f32 to vector<40x512xf32>
    %12 = arith.mulf %11, %10 : vector<40x512xf32>
    %13 = math.tanh %12 : vector<40x512xf32>
    %cst_7 = arith.constant 1.000000e+00 : f32
    %14 = vector.broadcast %cst_7 : f32 to vector<40x512xf32>
    %15 = arith.addf %14, %13 : vector<40x512xf32>
    %cst_8 = arith.constant 5.000000e-01 : f32
    %16 = vector.broadcast %cst_8 : f32 to vector<40x512xf32>
    %17 = arith.mulf %16, %15 : vector<40x512xf32>
    %18 = arith.mulf %5, %17 : vector<40x512xf32>
    %19 = arith.truncf %18 : vector<40x512xf32> to vector<40x512xbf16>
    %c0_9 = arith.constant 0 : index
    %c0_10 = arith.constant 0 : index
    %20 = vector.load %arg4[%c0_9, %c0_10] : memref<512x256xbf16, #tpu.memory_space<vmem>>, vector<512x256xbf16>
    %cst_11 = arith.constant dense<0.000000e+00> : vector<40x256xf32>
    %21 = tpu.matmul %19, %20, %cst_11 {dimension_numbers = #tpu.dot_dimension_numbers<[1], [0], [0], [1], [0, 0, 1, 1], [], []>} : vector<40x512xbf16>, vector<512x256xbf16>, vector<40x256xf32> -> vector<40x256xf32>
    %c0_12 = arith.constant 0 : index
    %c0_13 = arith.constant 0 : index
    %22 = vector.load %arg5[%c0_12, %c0_13] : memref<1x256xf32, #tpu.memory_space<vmem>>, vector<1x256xf32>
    %23 = vector.broadcast %22 : vector<1x256xf32> to vector<40x256xf32>
    %24 = arith.addf %21, %23 : vector<40x256xf32>
    %25 = arith.mulf %24, %24 : vector<40x256xf32>
    %26 = arith.mulf %24, %25 : vector<40x256xf32>
    %cst_14 = arith.constant 4.471500e-02 : f32
    %27 = vector.broadcast %cst_14 : f32 to vector<40x256xf32>
    %28 = arith.mulf %27, %26 : vector<40x256xf32>
    %29 = arith.addf %24, %28 : vector<40x256xf32>
    %cst_15 = arith.constant 0.797884583 : f32
    %30 = vector.broadcast %cst_15 : f32 to vector<40x256xf32>
    %31 = arith.mulf %30, %29 : vector<40x256xf32>
    %32 = math.tanh %31 : vector<40x256xf32>
    %cst_16 = arith.constant 1.000000e+00 : f32
    %33 = vector.broadcast %cst_16 : f32 to vector<40x256xf32>
    %34 = arith.addf %33, %32 : vector<40x256xf32>
    %cst_17 = arith.constant 5.000000e-01 : f32
    %35 = vector.broadcast %cst_17 : f32 to vector<40x256xf32>
    %36 = arith.mulf %35, %34 : vector<40x256xf32>
    %37 = arith.mulf %24, %36 : vector<40x256xf32>
    %c0_18 = arith.constant 0 : index
    %c0_19 = arith.constant 0 : index
    %38 = vector.load %arg6[%c0_18, %c0_19] : memref<40x256xf32, #tpu.memory_space<vmem>>, vector<40x256xf32>
    tpu.vector_store %arg6[%c0_18, %c0_19], %37 {strides = array<i32>} : memref<40x256xf32, #tpu.memory_space<vmem>>, vector<40x256xf32>,
    return
  }
  func.func @transform_0(%arg0: i32) -> (i32, i32) {
    %c0_i32 = arith.constant 0 : i32
    %c0_i32_0 = arith.constant 0 : i32
    return %arg0, %c0_i32 : i32, i32
  }
  func.func @transform_1(%arg0: i32) -> (i32, i32) {
    %c0_i32 = arith.constant 0 : i32
    %c0_i32_0 = arith.constant 0 : i32
    %c0_i32_1 = arith.constant 0 : i32
    return %c0_i32, %c0_i32_0 : i32, i32
  }
  func.func @transform_2(%arg0: i32) -> (i32, i32) {
    %c0_i32 = arith.constant 0 : i32
    %c0_i32_0 = arith.constant 0 : i32
    %c0_i32_1 = arith.constant 0 : i32
    return %c0_i32, %c0_i32_0 : i32, i32
  }
  func.func @transform_3(%arg0: i32) -> (i32, i32) {
    %c0_i32 = arith.constant 0 : i32
    %c0_i32_0 = arith.constant 0 : i32
    %c0_i32_1 = arith.constant 0 : i32
    return %c0_i32, %c0_i32_0 : i32, i32
  }
  func.func @transform_4(%arg0: i32) -> (i32, i32) {
    %c0_i32 = arith.constant 0 : i32
    %c0_i32_0 = arith.constant 0 : i32
    %c0_i32_1 = arith.constant 0 : i32
    return %c0_i32, %c0_i32_0 : i32, i32
  }
  func.func @transform_5(%arg0: i32) -> (i32, i32) {
    %c0_i32 = arith.constant 0 : i32
    %c0_i32_0 = arith.constant 0 : i32
    return %arg0, %c0_i32 : i32, i32
  }
}

</mosaic_0001>

<bundles_post_ra>
// kernel: squeeze.79
= control target key start
LH: loop header
LB: loop body
LE: loop exit
PB: predicated region body
PF: predicated region fallthrough
CT: control target
= control target key end

     0   :  { %s216_s8 = smov 123   ;;  %s217_s9 = smov 103   ;;  %vm18_vm0 = vcmask 39936   ;;  %s278_s0 = inlined_call_operand.vmem [shape: bf16[4,65], index: 0, kind: input, shape index: {}]   ;;  %s279_s1 = inlined_call_operand.vmem [shape: bf16[4,13,5], index: 1, kind: output, shape index: {}]  }
   0x1   :  { %v13_v0 = vld [vmem:[%s278_s0] sm:$0x3]  ;;  %s215_s0 = smov 113   ;;  %s218_s10 = smov 108  }
   0x2   :  { %v14_v1 = vunpack.c.l.bf16 %v13_v0  ;;  %s219_s11 = smov 118   ;;  %s220_s12 = smov 98  }
   0x3   :  { %s221_s13 = smov 88   ;;  %s222_s14 = smov 93  }
   0x4   :  { %16 = vst [vmem:[#allocation1] sm:$0xf] %v14_v1  ;;  %s223_s15 = smov 83   ;;  %s224_s16 = smov 73  }
   0x5   :  { %s225_s17 = smov 78   ;;  %s226_s18 = smov 68  }
   0xb   :  { %v37_v2 = vld [vmem:[#allocation1] sm:$0xf]  }
   0xc   :  { %v21_v3 = vld [vmem:[#allocation1] sm:$0xf]   ;;  %38 = vrot.lane.b32.xlu1 %v37_v2, %s215_s0 }
   0xd   :  { %22 = vrot.lane.b32.xlu0 %v21_v3, %s216_s8  ;;  %v53_v4 = vld [vmem:[#allocation1] sm:$0xf]  }
   0xe   :  { %54 = vrot.lane.b32.xlu2 %v53_v4, %s217_s9  ;;  %v45_v5 = vld [vmem:[#allocation1] sm:$0xf]  }
   0xf   :  { %v29_v6 = vld [vmem:[#allocation1] sm:$0xf]  }
  0x10   :  { %v61_v7 = vld [vmem:[#allocation1] sm:$0xf]  }
  0x11   :  { %v77_v8 = vld [vmem:[#allocation1] sm:$0xf]  }
  0x12   :  { %v69_v9 = vld [vmem:[#allocation1] sm:$0xf]  }
  0x13   :  { %v85_v10 = vld [vmem:[#allocation1] sm:$0xf]  }
  0x14   :  { %46 = vrot.lane.b32.xlu1 %v45_v5, %s218_s10  ;;  %v101_v11 = vld [vmem:[#allocation1] sm:$0xf]  }
  0x15   :  { %30 = vrot.lane.b32.xlu0 %v29_v6, %s219_s11  ;;  %v93_v12 = vld [vmem:[#allocation1] sm:$0xf]  }
  0x16   :  { %62 = vrot.lane.b32.xlu2 %v61_v7, %s220_s12  ;;  %v109_v13 = vld [vmem:[#allocation1] sm:$0xf]  }
  0x17   :  { %v17_v16 = vld [vmem:[#allocation1] sm:$0xf]  }
  0x18   :  { %19 = vst.msk [vmem:[#allocation0] ss:$16 sm:$0x3] %vm18_vm0, %v17_v16  }
  0x19   :  { %20 = vst.msk [vmem:[#allocation0] ss:$16 sm:$0xc] %vm18_vm0, %v17_v16  }
  0x1c   :  { %78 = vrot.lane.b32.xlu1 %v77_v8, %s221_s13 }
  0x1d   :  { %70 = vrot.lane.b32.xlu0 %v69_v9, %s222_s14 }
  0x1e   :  { %86 = vrot.lane.b32.xlu2 %v85_v10, %s223_s15 }
  0x24   :  { %102 = vrot.lane.b32.xlu1 %v101_v11, %s224_s16 }
  0x25   :  { %94 = vrot.lane.b32.xlu0 %v93_v12, %s225_s17 }
  0x26   :  { %110 = vrot.lane.b32.xlu2 %v109_v13, %s226_s18 }
  0x68   :  { %v55_v14 = vpop.permute.xlu2 %54  }
  0x69   :  { %58 = vst.msk [vmem:[#allocation0 + $0x5] ss:$16 sm:$0x3] %vm18_vm0, %v55_v14  }
  0x6a   :  { %60 = vst.msk [vmem:[#allocation0 + $0x5] ss:$16 sm:$0xc] %vm18_vm0, %v55_v14  }
  0x70   :  { %v63_v15 = vpop.permute.xlu2 %62  }
  0x71   :  { %66 = vst.msk [vmem:[#allocation0 + $0x6] ss:$16 sm:$0x3] %vm18_vm0, %v63_v15  }
  0x72   :  { %68 = vst.msk [vmem:[#allocation0 + $0x6] ss:$16 sm:$0xc] %vm18_vm0, %v63_v15  }
  0x78   :  { %v87_v17 = vpop.permute.xlu2 %86  }
  0x79   :  { %90 = vst.msk [vmem:[#allocation0 + $0x9] ss:$16 sm:$0x3] %vm18_vm0, %v87_v17  }
  0x7a   :  { %92 = vst.msk [vmem:[#allocation0 + $0x9] ss:$16 sm:$0xc] %vm18_vm0, %v87_v17  }
  0x7e   :  { %v39_v18 = vpop.permute.xlu1 %38  }
  0x7f   :  { %v23_v19 = vpop.permute.xlu0 %22   ;;  %42 = vst.msk [vmem:[#allocation0 + $0x3] ss:$16 sm:$0x3] %vm18_vm0, %v39_v18  }
  0x80   :  { %44 = vst.msk [vmem:[#allocation0 + $0x3] ss:$16 sm:$0xc] %vm18_vm0, %v39_v18   ;;  %v111_v20 = vpop.permute.xlu2 %110  }
  0x81   :  { %26 = vst.msk [vmem:[#allocation0 + $0x1] ss:$16 sm:$0x3] %vm18_vm0, %v23_v19  }
  0x82   :  { %28 = vst.msk [vmem:[#allocation0 + $0x1] ss:$16 sm:$0xc] %vm18_vm0, %v23_v19  }
  0x83   :  { %114 = vst.msk [vmem:[#allocation0 + $0xc] ss:$16 sm:$0x3] %vm18_vm0, %v111_v20  }
  0x84   :  { %116 = vst.msk [vmem:[#allocation0 + $0xc] ss:$16 sm:$0xc] %vm18_vm0, %v111_v20  }
  0x86   :  { %v47_v21 = vpop.permute.xlu1 %46  }
  0x87   :  { %v31_v22 = vpop.permute.xlu0 %30   ;;  %50 = vst.msk [vmem:[#allocation0 + $0x4] ss:$16 sm:$0x3] %vm18_vm0, %v47_v21  }
  0x88   :  { %52 = vst.msk [vmem:[#allocation0 + $0x4] ss:$16 sm:$0xc] %vm18_vm0, %v47_v21  }
  0x89   :  { %34 = vst.msk [vmem:[#allocation0 + $0x2] ss:$16 sm:$0x3] %vm18_vm0, %v31_v22  }
  0x8a   :  { %36 = vst.msk [vmem:[#allocation0 + $0x2] ss:$16 sm:$0xc] %vm18_vm0, %v31_v22  }
  0x8e   :  { %v79_v23 = vpop.permute.xlu1 %78  }
  0x8f   :  { %v71_v24 = vpop.permute.xlu0 %70   ;;  %82 = vst.msk [vmem:[#allocation0 + $0x8] ss:$16 sm:$0x3] %vm18_vm0, %v79_v23  }
  0x90   :  { %84 = vst.msk [vmem:[#allocation0 + $0x8] ss:$16 sm:$0xc] %vm18_vm0, %v79_v23  }
  0x91   :  { %74 = vst.msk [vmem:[#allocation0 + $0x7] ss:$16 sm:$0x3] %vm18_vm0, %v71_v24  }
  0x92   :  { %76 = vst.msk [vmem:[#allocation0 + $0x7] ss:$16 sm:$0xc] %vm18_vm0, %v71_v24  }
  0x96   :  { %v103_v25 = vpop.permute.xlu1 %102  }
  0x97   :  { %v95_v26 = vpop.permute.xlu0 %94   ;;  %106 = vst.msk [vmem:[#allocation0 + $0xb] ss:$16 sm:$0x3] %vm18_vm0, %v103_v25  }
  0x98   :  { %108 = vst.msk [vmem:[#allocation0 + $0xb] ss:$16 sm:$0xc] %vm18_vm0, %v103_v25   ;;  %v119_v27 = vld [vmem:[#allocation0] sm:$0xff]  ;;  %v132_v28 = vld [vmem:[#allocation0 + $0x10] sm:$0xff] }
  0x99   :  { %98 = vst.msk [vmem:[#allocation0 + $0xa] ss:$16 sm:$0x3] %vm18_vm0, %v95_v26   ;;  %v146_v29 = vld [vmem:[#allocation0 + $0x20] sm:$0xff]  ;;  %v160_v32 = vld [vmem:[#allocation0 + $0x30] sm:$0xff] }
  0x9a   :  { %100 = vst.msk [vmem:[#allocation0 + $0xa] ss:$16 sm:$0xc] %vm18_vm0, %v95_v26  }
  0xa0   :  { %v125_v30 = vld [vmem:[#allocation0 + $0x8] sm:$0xff]  ;;  %v139_v31 = vld [vmem:[#allocation0 + $0x18] sm:$0xff] }
  0xa1   :  { %v183_v33 = vpack.c.bf16 %v125_v30, %v119_v27  ;;  %v188_v34 = vpack.c.bf16 %v139_v31, %v132_v28  ;;  %v153_v35 = vld [vmem:[#allocation0 + $0x28] sm:$0xff]  ;;  %v167_v36 = vld [vmem:[#allocation0 + $0x38] sm:$0xff] }
  0xa2   :  { %v193_v37 = vpack.c.bf16 %v153_v35, %v146_v29  ;;  %v198_v38 = vpack.c.bf16 %v167_v36, %v160_v32 }
  0xa3   :  { %184 = vst [vmem:[%s279_s1] sm:$0xff] %v183_v33  }
  0xa4   :  { %200 = vst [vmem:[%s279_s1 + $0x8] sm:$0xff] %v188_v34  }
  0xa5   :  { %201 = vst [vmem:[%s279_s1 + $0x10] sm:$0xff] %v193_v37  }
  0xa6   :  { %202 = vst [vmem:[%s279_s1 + $0x18] sm:$0xff] %v198_v38  }

// kernel: multi_period_discriminator_forward.24
= control target key start
LH: loop header
LB: loop body
LE: loop exit
PB: predicated region body
PF: predicated region fallthrough
CT: control target
= control target key end

     0   :  { %s431_s12 = smov 0   ;;  %s465_s0 = inlined_call_operand.vmem [shape: bf16[144,6], index: 0, kind: input, shape index: {}]   ;;  %s466_s1 = inlined_call_operand.vmem [shape: bf16[6,128], index: 1, kind: input, shape index: {}]   ;;  %s467_s2 = inlined_call_operand.vmem [shape: f32[1,128], index: 2, kind: input, shape index: {}]   ;;  %s468_s3 = inlined_call_operand.vmem [shape: f32[144,128], index: 3, kind: output, shape index: {}]  }
   0x1 LB: > { %s357_s13 = sadd.s32 4294967295, %s409_s12   ;;  %p361_p0 = scmp.ge.s32.totalorder %s409_s12, 1  ;;  %s409_s12 = sphi %s431_s12, %s13_s12  }
   0x2   : > { %p138_p1 = scmp.lt.s32.totalorder %s409_s12, 3 }
   0x4   : > { %p139_p2 = pnand %p361_p0, %p138_p1 }
   0x5   : > { %s162_s16 = smul.u32 (!%p139_p2), 9, %s357_s13 }
   0x6   : > { %142 = sbr.rel (%p139_p2) target bundleno = 178 (0xb2), region = 32 }
   0x7   : > { %p163_p3 = scmp.lt.s32.totalorder (!%p139_p2), %s162_s16, 17 }
   0xb   : > { %v184_v0 = vld [vmem:[%s466_s1] sm:$0x7]  ;;  %vm228_vm0 = vcmask 1042432   ;;  %s470_s16 = smov (!%p163_p3, %s162_s16), 17  ;;  %vm212_vm1 = vcmask 48128  }
   0xc   : > { %v230_v1 = vsel %vm228_vm0, %v184_v0, 0  ;;  %s362_s17 = sshll.u32 %s470_s16, 2  ;;  %v402_v9 = vld [vmem:[%s467_s2] ss:$0 sm:$0xff]  ;;  %s363_s23 = sshll.u32 %s470_s16, 3 }
   0xd   : > { %392 = vmatpush.bf16.msra.mxu2 %v230_v1  ;;  %239 = vmatpush.bf16.msra.mxu0 %v230_v1  ;;  %s166_s20 = scalar_lea.vmem %s465_s0, %s362_s17  ;;  %s451_s26 = scalar_lea.vmem %s468_s3, %s363_s23 }
   0xe   : > { %391 = vmatpush.bf16.msra.mxu1 %v230_v1  ;;  %393 = vmatpush.bf16.msra.mxu3 %v230_v1  ;;  %v389_v2 = vld [vmem:[%s166_s20 + $0x10] sm:$0xff]  ;;  %v387_v3 = vld [vmem:[%s166_s20] sm:$0xff]  ;;  %v388_v4 = vld [vmem:[%s166_s20 + $0x8] sm:$0xff] }
   0xf   : > { %v183_v5 = vld [vmem:[%s166_s20 + $0x20] sm:$0xf]  ;;  %v390_v8 = vld [vmem:[%s166_s20 + $0x18] sm:$0xff] }
  0x10   : > { %382 = vmatmul.msk.bf16.vlgmr.msra.gmra.mxu2 %vm212_vm1, %v389_v2  ;;  %380 = vmatmul.msk.bf16.vlgmr.msra.gmra.mxu0 %vm212_vm1, %v387_v3  ;;  %v206_v6 = vunpack.c.l.b16 %v183_v5 }
  0x11   : > { %381 = vmatmul.msk.bf16.vlgmr.msra.gmra.mxu1 %vm212_vm1, %v388_v4 }
  0x12   : > { %v211_v7 = vpack.c.b16 %v206_v6, %v206_v6 }
  0x14   : > { %384 = vmatmul.msk.bf16.vlgmr.msra.gmra.mxu3 %vm212_vm1, %v211_v7 }
  0x20   : > { %383 = vmatmul.msk.bf16.gmra.mxu2 %vm212_vm1, %v390_v8 }
  0x8d   : > { %v241_v10 = vpop.f32.mrf.mxu0 }
  0x8e   : > { %v242_v11 = vadd.f32 %v402_v9, %v241_v10  ;;  %v246_v12 = vpop.f32.mrf.mxu1 }
  0x8f   : > { %v247_v13 = vadd.f32 %v402_v9, %v246_v12 }
  0x90   : > { %vm265_vm2 = vcmp.ge.f32.partialorder %v242_v11, 0.0  ;;  %v274_v14 = vmul.f32 0.1, %v242_v11 }
  0x91   : > { %vm267_vm3 = vcmp.ge.f32.partialorder %v247_v13, 0.0  ;;  %v276_v15 = vmul.f32 0.1, %v247_v13 }
  0x92   : > { %v283_v16 = vsel %vm265_vm2, %v242_v11, %v274_v14 }
  0x93   : > { %v251_v17 = vpop.f32.mrf.mxu2  ;;  %292 = vst [vmem:[%s451_s26] sm:$0xff] %v283_v16  ;;  %v285_v18 = vsel %vm267_vm3, %v247_v13, %v276_v15 }
  0x94   : > { %v252_v19 = vadd.f32 %v402_v9, %v251_v17  ;;  %294 = vst [vmem:[%s451_s26 + $0x10] sm:$0xff] %v285_v18 }
  0x95   : > { %v243_v20 = vpop.f32.mrf.mxu0 }
  0x96   : > { %vm269_vm4 = vcmp.ge.f32.partialorder %v252_v19, 0.0  ;;  %v278_v21 = vmul.f32 0.1, %v252_v19  ;;  %v244_v22 = vadd.f32 %v402_v9, %v243_v20  ;;  %v248_v23 = vpop.f32.mrf.mxu1 }
  0x97   : > { %v249_v24 = vadd.f32 %v402_v9, %v248_v23  ;;  %v261_v25 = vpop.f32.mrf.mxu3 }
  0x98   : > { %v287_v26 = vsel %vm269_vm4, %v252_v19, %v278_v21  ;;  %vm266_vm5 = vcmp.ge.f32.partialorder %v244_v22, 0.0  ;;  %v275_v27 = vmul.f32 0.1, %v244_v22  ;;  %v262_v28 = vadd.f32 %v402_v9, %v261_v25 }
  0x99   : > { %296 = vst [vmem:[%s451_s26 + $0x20] sm:$0xff] %v287_v26  ;;  %vm268_vm6 = vcmp.ge.f32.partialorder %v249_v24, 0.0  ;;  %v277_v29 = vmul.f32 0.1, %v249_v24 }
  0x9a   : > { %v284_v30 = vsel %vm266_vm5, %v244_v22, %v275_v27  ;;  %vm273_vm7 = vcmp.ge.f32.partialorder %v262_v28, 0.0  ;;  %v282_v31 = vmul.f32 0.1, %v262_v28 }
  0x9b   : > { %v253_v32 = vpop.f32.mrf.mxu2  ;;  %293 = vst [vmem:[%s451_s26 + $0x8] sm:$0xff] %v284_v30  ;;  %v286_v33 = vsel %vm268_vm6, %v249_v24, %v277_v29 }
  0x9c   : > { %v254_v34 = vadd.f32 %v402_v9, %v253_v32  ;;  %295 = vst [vmem:[%s451_s26 + $0x18] sm:$0xff] %v286_v33  ;;  %v291_v35 = vsel %vm273_vm7, %v262_v28, %v282_v31 }
  0x9d   : > { %300 = vst [vmem:[%s451_s26 + $0x40] sm:$0xff] %v291_v35 }
  0x9e   : > { %vm270_vm8 = vcmp.ge.f32.partialorder %v254_v34, 0.0  ;;  %v279_v36 = vmul.f32 0.1, %v254_v34 }
  0x9f   : > { %v263_v37 = vpop.f32.mrf.mxu3 }
  0xa0   : > { %v288_v38 = vsel %vm270_vm8, %v254_v34, %v279_v36 }
  0xa1   : > { %297 = vst [vmem:[%s451_s26 + $0x28] sm:$0xff] %v288_v38 }
  0xa3   : > { %v256_v39 = vpop.f32.mrf.mxu2 }
  0xa4   : > { %v257_v40 = vadd.f32 %v402_v9, %v256_v39 }
  0xa6   : > { %vm271_vm9 = vcmp.ge.f32.partialorder %v257_v40, 0.0  ;;  %v280_v41 = vmul.f32 0.1, %v257_v40 }
  0xa8   : > { %v289_v42 = vsel %vm271_vm9, %v257_v40, %v280_v41 }
  0xa9   : > { %298 = vst [vmem:[%s451_s26 + $0x30] sm:$0xff] %v289_v42 }
  0xab   : > { %v258_v43 = vpop.f32.mrf.mxu2 }
  0xac   : > { %v259_v44 = vadd.f32 %v402_v9, %v258_v43 }
  0xae   : > { %vm272_vm10 = vcmp.ge.f32.partialorder %v259_v44, 0.0  ;;  %v281_v45 = vmul.f32 0.1, %v259_v44 }
  0xb0   : > { %v290_v46 = vsel %vm272_vm10, %v259_v44, %v281_v45 }
  0xb1   : > { %299 = vst [vmem:[%s451_s26 + $0x38] sm:$0xff] %v290_v46 }
  0xb2 PF: > { %s13_s12 = sadd.s32 1, %s409_s12  }
  0xb3   : > { %p10_p4 = scmp.ge.s32.totalorder %s13_s12, 4  }
  0xb5   :  { %12 = sbr.rel (!%p10_p4) target bundleno = 1 (0x1), region = 62 }

// kernel: multi_period_discriminator_forward.26
= control target key start
LH: loop header
LB: loop body
LE: loop exit
PB: predicated region body
PF: predicated region fallthrough
CT: control target
= control target key end

     0   :  { %s598_s12 = smov 0   ;;  %s677_s0 = inlined_call_operand.vmem [shape: bf16[64,256], index: 0, kind: input, shape index: {}]   ;;  %s678_s1 = inlined_call_operand.vmem [shape: bf16[256,3], index: 1, kind: input, shape index: {}]   ;;  %s679_s2 = inlined_call_operand.vmem [shape: f32[1,3], index: 2, kind: input, shape index: {}]   ;;  %s680_s3 = inlined_call_operand.vmem [shape: f32[64,3], index: 3, kind: output, shape index: {}]  }
   0x1 LB: > { %s432_s13 = sadd.s32 4294967295, %s576_s12   ;;  %p436_p0 = scmp.ge.s32.totalorder %s576_s12, 1  ;;  %s576_s12 = sphi %s598_s12, %s13_s12  }
   0x2   : > { %p139_p1 = scmp.lt.s32.totalorder %s576_s12, 3 }
   0x4   : > { %p140_p2 = pnand %p436_p0, %p139_p1 }
   0x5   : > { %s437_s26 = sshll.u32 (!%p140_p2), %s432_s13, 2 }
   0x6   : > { %143 = sbr.rel (%p140_p2) target bundleno = 188 (0xbc), region = 32  ;;  %p165_p3 = scmp.lt.s32.totalorder (!%p140_p2), %s437_s26, 7 }
   0xb   : > { %v536_v0 = vld [vmem:[%s678_s1 + $0x38] sm:$0xff]  ;;  %v535_v2 = vld [vmem:[%s678_s1 + $0x30] sm:$0xff]  ;;  %v534_v4 = vld [vmem:[%s678_s1 + $0x28] sm:$0xff]  ;;  %s682_s26 = smov (!%p165_p3, %s437_s26), 7  ;;  %vm371_vm0 = vcmask 23552  }
   0xc   : > { %v544_v1 = vld [vmem:[%s678_s1 + $0x78] sm:$0xff]  ;;  %333 = vmatpush.bf16.msra.mxu0 %v536_v0  ;;  %545 = vmatpush.bf16.msra.mxu2 %v536_v0  ;;  %v543_v3 = vld [vmem:[%s678_s1 + $0x70] sm:$0xff]  ;;  %v542_v5 = vld [vmem:[%s678_s1 + $0x68] sm:$0xff]  ;;  %s524_s13 = sshll.u32 %s682_s26, 3 }
   0xd   : > { %352 = vmatpush.bf16.msra.mxu1 %v544_v1  ;;  %553 = vmatpush.bf16.msra.mxu3 %v544_v1  ;;  %v533_v6 = vld [vmem:[%s678_s1 + $0x20] sm:$0xff]  ;;  %v532_v8 = vld [vmem:[%s678_s1 + $0x18] sm:$0xff]  ;;  %v531_v10 = vld [vmem:[%s678_s1 + $0x10] sm:$0xff]  ;;  %s169_s18 = scalar_lea.vmem %s677_s0, %s524_s13  ;;  %s175_s30 = scalar_lea.vmem %s680_s3, %s524_s13 }
   0xe   : > { %v541_v7 = vld [vmem:[%s678_s1 + $0x60] sm:$0xff]  ;;  %v540_v9 = vld [vmem:[%s678_s1 + $0x58] sm:$0xff]  ;;  %v539_v11 = vld [vmem:[%s678_s1 + $0x50] sm:$0xff] }
   0xf   : > { %v530_v12 = vld [vmem:[%s678_s1 + $0x8] sm:$0xff]  ;;  %v529_v14 = vld [vmem:[%s678_s1] sm:$0xff]  ;;  %v452_v18 = vld [vmem:[%s169_s18 + $0x10] sm:$0xf] }
  0x10   : > { %334 = vmatpush.bf16.msra.mxu0 %v535_v2  ;;  %546 = vmatpush.bf16.msra.mxu2 %v535_v2  ;;  %v538_v13 = vld [vmem:[%s678_s1 + $0x48] sm:$0xff]  ;;  %v537_v15 = vld [vmem:[%s678_s1 + $0x40] sm:$0xff]  ;;  %v528_v19 = vld [vmem:[%s169_s18 + $0x14] sm:$0xf0] }
  0x11   : > { %353 = vmatpush.bf16.msra.mxu1 %v543_v3  ;;  %554 = vmatpush.bf16.msra.mxu3 %v543_v3  ;;  %v444_v16 = vld [vmem:[%s169_s18] sm:$0xf]  ;;  %v526_v17 = vld [vmem:[%s169_s18 + $0x4] sm:$0xf0]  ;;  %v525_v20 = vld [vmem:[%s169_s18 + $0x4] sm:$0xf]  ;;  %v453_v25 = vor.u32 %v528_v19, %v452_v18 }
  0x12   : > { %v446_v21 = vld [vmem:[%s169_s18 + $0x8] sm:$0xf0]  ;;  %v527_v22 = vld [vmem:[%s169_s18 + $0x14] sm:$0xf]  ;;  %v454_v23 = vld [vmem:[%s169_s18 + $0x18] sm:$0xf0]  ;;  %v445_v24 = vor.u32 %v526_v17, %v444_v16 }
  0x13   : > { %v449_v26 = vor.u32 %v525_v20, %v446_v21  ;;  %v457_v27 = vor.u32 %v527_v22, %v454_v23  ;;  %v569_v28 = vld [vmem:[%s679_s2] ss:$0 sm:$0xff] }
  0x14   : > { %335 = vmatpush.bf16.msra.mxu0 %v534_v4  ;;  %547 = vmatpush.bf16.msra.mxu2 %v534_v4 }
  0x15   : > { %354 = vmatpush.bf16.msra.mxu1 %v542_v5  ;;  %555 = vmatpush.bf16.msra.mxu3 %v542_v5 }
  0x18   : > { %336 = vmatpush.bf16.msra.mxu0 %v533_v6  ;;  %548 = vmatpush.bf16.msra.mxu2 %v533_v6 }
  0x19   : > { %355 = vmatpush.bf16.msra.mxu1 %v541_v7  ;;  %556 = vmatpush.bf16.msra.mxu3 %v541_v7 }
  0x1c   : > { %337 = vmatpush.bf16.msra.mxu0 %v532_v8  ;;  %549 = vmatpush.bf16.msra.mxu2 %v532_v8 }
  0x1d   : > { %356 = vmatpush.bf16.msra.mxu1 %v540_v9  ;;  %557 = vmatpush.bf16.msra.mxu3 %v540_v9 }
  0x20   : > { %338 = vmatpush.bf16.msra.mxu0 %v531_v10  ;;  %550 = vmatpush.bf16.msra.mxu2 %v531_v10 }
  0x21   : > { %357 = vmatpush.bf16.msra.mxu1 %v539_v11  ;;  %558 = vmatpush.bf16.msra.mxu3 %v539_v11 }
  0x24   : > { %339 = vmatpush.bf16.msra.mxu0 %v530_v12  ;;  %551 = vmatpush.bf16.msra.mxu2 %v530_v12 }
  0x25   : > { %358 = vmatpush.bf16.msra.mxu1 %v538_v13  ;;  %559 = vmatpush.bf16.msra.mxu3 %v538_v13 }
  0x28   : > { %340 = vmatpush.bf16.msra.mxu0 %v529_v14  ;;  %552 = vmatpush.bf16.msra.mxu2 %v529_v14 }
  0x29   : > { %359 = vmatpush.bf16.msra.mxu1 %v537_v15  ;;  %560 = vmatpush.bf16.msra.mxu3 %v537_v15 }
  0x2b   : > { %341 = vmatmul.bf16.vlgmr.msra.gmra.mxu0 %v445_v24  ;;  %346 = vmatmul.bf16.vlgmr.msra.gmra.mxu2 %v453_v25 }
  0x2c   : > { %360 = vmatmul.bf16.vlgmr.msra.gmra.mxu1 %v449_v26  ;;  %365 = vmatmul.bf16.vlgmr.msra.gmra.mxu3 %v457_v27 }
  0xa8   : > { %v342_v29 = vpop.f32.mrf.mxu0 }
  0xa9   : > { %v343_v30 = vadd.f32 %v569_v28, %v342_v29  ;;  %v361_v31 = vpop.f32.mrf.mxu1 }
  0xab   : > { %v362_v32 = vadd.f32 %v361_v31, %v343_v30 }
  0xad   : > { %372 = vst.msk [vmem:[%s175_s30] sm:$0xff] %vm371_vm0, %v362_v32 }
  0xae   : > { %v347_v33 = vpop.f32.mrf.mxu2 }
  0xaf   : > { %v366_v34 = vpop.f32.mrf.mxu3  ;;  %v348_v35 = vadd.f32 %v569_v28, %v347_v33 }
  0xb0   : > { %v344_v36 = vpop.f32.mrf.mxu0 }
  0xb1   : > { %v345_v37 = vadd.f32 %v569_v28, %v344_v36  ;;  %v363_v38 = vpop.f32.mrf.mxu1  ;;  %v367_v40 = vadd.f32 %v366_v34, %v348_v35 }
  0xb3   : > { %v364_v39 = vadd.f32 %v363_v38, %v345_v37  ;;  %374 = vst.msk [vmem:[%s175_s30 + $0x10] sm:$0xff] %vm371_vm0, %v367_v40 }
  0xb5   : > { %373 = vst.msk [vmem:[%s175_s30 + $0x8] sm:$0xff] %vm371_vm0, %v364_v39 }
  0xb6   : > { %v349_v41 = vpop.f32.mrf.mxu2 }
  0xb7   : > { %v350_v42 = vadd.f32 %v569_v28, %v349_v41  ;;  %v368_v43 = vpop.f32.mrf.mxu3 }
  0xb9   : > { %v369_v44 = vadd.f32 %v368_v43, %v350_v42 }
  0xbb   : > { %375 = vst.msk [vmem:[%s175_s30 + $0x18] sm:$0xff] %vm371_vm0, %v369_v44 }
  0xbc PF: > { %s13_s12 = sadd.s32 1, %s576_s12  }
  0xbd   : > { %p10_p4 = scmp.ge.s32.totalorder %s13_s12, 4  }
  0xbf   :  { %12 = sbr.rel (!%p10_p4) target bundleno = 1 (0x1), region = 62 }

// kernel: squeeze.69
= control target key start
LH: loop header
LB: loop body
LE: loop exit
PB: predicated region body
PF: predicated region fallthrough
CT: control target
= control target key end

     0   :  { %s340_s8 = smov 125   ;;  %s341_s9 = smov 113   ;;  %vm18_vm0 = vcmask 23552   ;;  %s434_s0 = inlined_call_operand.vmem [shape: bf16[4,66], index: 0, kind: input, shape index: {}]   ;;  %s435_s1 = inlined_call_operand.vmem [shape: bf16[4,22,3], index: 1, kind: output, shape index: {}]  }
   0x1   :  { %v13_v0 = vld [vmem:[%s434_s0] sm:$0x3]  ;;  %s339_s0 = smov 119   ;;  %s342_s10 = smov 116  }
   0x2   :  { %v14_v1 = vunpack.c.l.bf16 %v13_v0  ;;  %s343_s11 = smov 122   ;;  %s344_s12 = smov 110  }
   0x3   :  { %s345_s13 = smov 104   ;;  %s346_s14 = smov 107  }
   0x4   :  { %16 = vst [vmem:[#allocation1] sm:$0xf] %v14_v1  ;;  %s347_s15 = smov 101   ;;  %s348_s16 = smov 95  }
   0x5   :  { %s349_s17 = smov 98   ;;  %s350_s18 = smov 92  }
   0x6   :  { %s351_s19 = smov 86   ;;  %s352_s20 = smov 89  }
   0x7   :  { %s353_s21 = smov 83   ;;  %s354_s22 = smov 77  }
   0x8   :  { %s355_s23 = smov 80   ;;  %s356_s24 = smov 74  }
   0x9   :  { %s357_s25 = smov 68   ;;  %s358_s26 = smov 71  }
   0xa   :  { %s359_s27 = smov 65  }
   0xb   :  { %v36_v2 = vld.sshfl [vmem:[#allocation1] sm:$0xff pattern:$0x11111230]  }
   0xc   :  { %37 = vrot.lane.b32.xlu1 %v36_v2, %s339_s0  ;;  %21 = vrot.lane.b32.xlu0 %v36_v2, %s340_s8  ;;  %v76_v3 = vld.sshfl [vmem:[#allocation1] sm:$0xff pattern:$0x22222301]  }
   0xd   :  { %53 = vrot.lane.b32.xlu2 %v36_v2, %s341_s9  ;;  %v148_v4 = vld.sshfl [vmem:[#allocation1] sm:$0xff pattern:$0x33333012]  }
   0xe   :  { %v17_v7 = vld [vmem:[#allocation1] sm:$0xf]  }
   0xf   :  { %19 = vst.msk [vmem:[#allocation0] ss:$24 sm:$0xf] %vm18_vm0, %v17_v7  }
  0x14   :  { %45 = vrot.lane.b32.xlu1 %v36_v2, %s342_s10  ;;  %29 = vrot.lane.b32.xlu0 %v36_v2, %s343_s11 }
  0x15   :  { %61 = vrot.lane.b32.xlu2 %v36_v2, %s344_s12 }
  0x1c   :  { %77 = vrot.lane.b32.xlu1 %v76_v3, %s345_s13  ;;  %69 = vrot.lane.b32.xlu0 %v36_v2, %s346_s14 }
  0x1d   :  { %85 = vrot.lane.b32.xlu2 %v76_v3, %s347_s15 }
  0x24   :  { %101 = vrot.lane.b32.xlu1 %v76_v3, %s348_s16  ;;  %93 = vrot.lane.b32.xlu0 %v76_v3, %s349_s17 }
  0x25   :  { %109 = vrot.lane.b32.xlu2 %v76_v3, %s350_s18 }
  0x2c   :  { %125 = vrot.lane.b32.xlu1 %v76_v3, %s351_s19  ;;  %117 = vrot.lane.b32.xlu0 %v76_v3, %s352_s20 }
  0x2d   :  { %133 = vrot.lane.b32.xlu2 %v76_v3, %s353_s21 }
  0x34   :  { %149 = vrot.lane.b32.xlu1 %v148_v4, %s354_s22  ;;  %141 = vrot.lane.b32.xlu0 %v148_v4, %s355_s23 }
  0x35   :  { %157 = vrot.lane.b32.xlu2 %v148_v4, %s356_s24 }
  0x3c   :  { %173 = vrot.lane.b32.xlu1 %v148_v4, %s357_s25  ;;  %165 = vrot.lane.b32.xlu0 %v148_v4, %s358_s26 }
  0x3d   :  { %181 = vrot.lane.b32.xlu2 %v148_v4, %s359_s27 }
  0x67   :  { %v54_v5 = vpop.permute.xlu2 %53  }
  0x68   :  { %57 = vst.msk [vmem:[#allocation0 + $0x5] ss:$72 sm:$0x3] %vm18_vm0, %v54_v5  }
  0x69   :  { %59 = vst.msk [vmem:[#allocation0 + $0x65] ss:$-24 sm:$0xc] %vm18_vm0, %v54_v5  }
  0x6f   :  { %v62_v6 = vpop.permute.xlu2 %61  }
  0x70   :  { %65 = vst.msk [vmem:[#allocation0 + $0x6] ss:$72 sm:$0x3] %vm18_vm0, %v62_v6  }
  0x71   :  { %67 = vst.msk [vmem:[#allocation0 + $0x66] ss:$-24 sm:$0xc] %vm18_vm0, %v62_v6  }
  0x77   :  { %v86_v8 = vpop.permute.xlu2 %85  }
  0x78   :  { %89 = vst.msk [vmem:[#allocation0 + $0x21] ss:$-24 sm:$0x3] %vm18_vm0, %v86_v8  }
  0x79   :  { %91 = vst.msk [vmem:[#allocation0 + $0x81] ss:$-24 sm:$0xc] %vm18_vm0, %v86_v8  }
  0x7e   :  { %v38_v9 = vpop.permute.xlu1 %37   ;;  %v22_v10 = vpop.permute.xlu0 %21  }
  0x7f   :  { %41 = vst.msk [vmem:[#allocation0 + $0x3] ss:$72 sm:$0x3] %vm18_vm0, %v38_v9   ;;  %v110_v11 = vpop.permute.xlu2 %109  }
  0x80   :  { %43 = vst.msk [vmem:[#allocation0 + $0x63] ss:$-24 sm:$0xc] %vm18_vm0, %v38_v9  }
  0x81   :  { %25 = vst.msk [vmem:[#allocation0 + $0x1] ss:$72 sm:$0x3] %vm18_vm0, %v22_v10  }
  0x82   :  { %27 = vst.msk [vmem:[#allocation0 + $0x61] ss:$-24 sm:$0xc] %vm18_vm0, %v22_v10  }
  0x83   :  { %113 = vst.msk [vmem:[#allocation0 + $0x24] ss:$-24 sm:$0x3] %vm18_vm0, %v110_v11  }
  0x84   :  { %115 = vst.msk [vmem:[#allocation0 + $0x84] ss:$-24 sm:$0xc] %vm18_vm0, %v110_v11  }
  0x86   :  { %v46_v12 = vpop.permute.xlu1 %45   ;;  %v30_v13 = vpop.permute.xlu0 %29  }
  0x87   :  { %49 = vst.msk [vmem:[#allocation0 + $0x4] ss:$72 sm:$0x3] %vm18_vm0, %v46_v12   ;;  %v134_v14 = vpop.permute.xlu2 %133  }
  0x88   :  { %51 = vst.msk [vmem:[#allocation0 + $0x64] ss:$-24 sm:$0xc] %vm18_vm0, %v46_v12  }
  0x89   :  { %33 = vst.msk [vmem:[#allocation0 + $0x2] ss:$72 sm:$0x3] %vm18_vm0, %v30_v13  }
  0x8a   :  { %35 = vst.msk [vmem:[#allocation0 + $0x62] ss:$-24 sm:$0xc] %vm18_vm0, %v30_v13  }
  0x8b   :  { %137 = vst.msk [vmem:[#allocation0 + $0x27] ss:$-24 sm:$0x3] %vm18_vm0, %v134_v14  }
  0x8c   :  { %139 = vst.msk [vmem:[#allocation0 + $0x87] ss:$-24 sm:$0xc] %vm18_vm0, %v134_v14  }
  0x8e   :  { %v78_v15 = vpop.permute.xlu1 %77   ;;  %v70_v16 = vpop.permute.xlu0 %69  }
  0x8f   :  { %81 = vst.msk [vmem:[#allocation0 + $0x20] ss:$-24 sm:$0x3] %vm18_vm0, %v78_v15   ;;  %v158_v17 = vpop.permute.xlu2 %157  }
  0x90   :  { %83 = vst.msk [vmem:[#allocation0 + $0x80] ss:$-24 sm:$0xc] %vm18_vm0, %v78_v15  }
  0x91   :  { %73 = vst.msk [vmem:[#allocation0 + $0x7] ss:$72 sm:$0x3] %vm18_vm0, %v70_v16  }
  0x92   :  { %75 = vst.msk [vmem:[#allocation0 + $0x67] ss:$-24 sm:$0xc] %vm18_vm0, %v70_v16  }
  0x93   :  { %161 = vst.msk [vmem:[#allocation0 + $0x42] ss:$-24 sm:$0x7] %vm18_vm0, %v158_v17  }
  0x94   :  { %163 = vst.msk [vmem:[#allocation0 + $0x57] sm:$0x8] %vm18_vm0, %v158_v17  }
  0x96   :  { %v102_v18 = vpop.permute.xlu1 %101   ;;  %v94_v19 = vpop.permute.xlu0 %93  }
  0x97   :  { %105 = vst.msk [vmem:[#allocation0 + $0x23] ss:$-24 sm:$0x3] %vm18_vm0, %v102_v18   ;;  %v182_v20 = vpop.permute.xlu2 %181  }
  0x98   :  { %107 = vst.msk [vmem:[#allocation0 + $0x83] ss:$-24 sm:$0xc] %vm18_vm0, %v102_v18   ;;  %v190_v25 = vld [vmem:[#allocation0] sm:$0xff]  ;;  %v252_v35 = vld [vmem:[#allocation0 + $0x48] sm:$0xff] }
  0x99   :  { %97 = vst.msk [vmem:[#allocation0 + $0x22] ss:$-24 sm:$0x3] %vm18_vm0, %v94_v19   ;;  %v231_v27 = vld [vmem:[#allocation0 + $0x30] sm:$0xff]  ;;  %v210_v33 = vld [vmem:[#allocation0 + $0x18] sm:$0xff] }
  0x9a   :  { %99 = vst.msk [vmem:[#allocation0 + $0x82] ss:$-24 sm:$0xc] %vm18_vm0, %v94_v19  }
  0x9b   :  { %185 = vst.msk [vmem:[#allocation0 + $0x45] ss:$-24 sm:$0x7] %vm18_vm0, %v182_v20  }
  0x9c   :  { %187 = vst.msk [vmem:[#allocation0 + $0x5a] sm:$0x8] %vm18_vm0, %v182_v20  }
  0x9e   :  { %v126_v21 = vpop.permute.xlu1 %125   ;;  %v118_v22 = vpop.permute.xlu0 %117  }
  0x9f   :  { %129 = vst.msk [vmem:[#allocation0 + $0x26] ss:$-24 sm:$0x3] %vm18_vm0, %v126_v21  }
  0xa0   :  { %131 = vst.msk [vmem:[#allocation0 + $0x86] ss:$-24 sm:$0xc] %vm18_vm0, %v126_v21  }
  0xa1   :  { %121 = vst.msk [vmem:[#allocation0 + $0x25] ss:$-24 sm:$0x3] %vm18_vm0, %v118_v22  }
  0xa2   :  { %123 = vst.msk [vmem:[#allocation0 + $0x85] ss:$-24 sm:$0xc] %vm18_vm0, %v118_v22  }
  0xa6   :  { %v150_v23 = vpop.permute.xlu1 %149   ;;  %v142_v24 = vpop.permute.xlu0 %141  }
  0xa7   :  { %153 = vst.msk [vmem:[#allocation0 + $0x41] ss:$-24 sm:$0x7] %vm18_vm0, %v150_v23  }
  0xa8   :  { %v196_v26 = vld [vmem:[#allocation0 + $0x8] sm:$0xff]  ;;  %155 = vst.msk [vmem:[#allocation0 + $0x56] sm:$0x8] %vm18_vm0, %v150_v23   ;;  %v217_v34 = vld [vmem:[#allocation0 + $0x20] sm:$0xff] }
  0xa9   :  { %v238_v28 = vld [vmem:[#allocation0 + $0x38] sm:$0xff]  ;;  %v286_v29 = vpack.c.bf16 %v196_v26, %v190_v25  ;;  %145 = vst.msk [vmem:[#allocation0 + $0x40] ss:$-24 sm:$0x7] %vm18_vm0, %v142_v24   ;;  %v259_v39 = vld [vmem:[#allocation0 + $0x50] sm:$0xff] }
  0xaa   :  { %v301_v30 = vpack.c.bf16 %v238_v28, %v231_v27  ;;  %147 = vst.msk [vmem:[#allocation0 + $0x55] sm:$0x8] %vm18_vm0, %v142_v24  }
  0xab   :  { %287 = vst [vmem:[%s435_s1] sm:$0xff] %v286_v29  }
  0xac   :  { %315 = vst [vmem:[%s435_s1 + $0x18] sm:$0xff] %v301_v30  }
  0xae   :  { %v174_v31 = vpop.permute.xlu1 %173   ;;  %v166_v32 = vpop.permute.xlu0 %165  }
  0xaf   :  { %177 = vst.msk [vmem:[#allocation0 + $0x44] ss:$-24 sm:$0x7] %vm18_vm0, %v174_v31  }
  0xb0   :  { %179 = vst.msk [vmem:[#allocation0 + $0x59] sm:$0x8] %vm18_vm0, %v174_v31  }
  0xb1   :  { %169 = vst.msk [vmem:[#allocation0 + $0x43] ss:$-24 sm:$0x7] %vm18_vm0, %v166_v32  }
  0xb2   :  { %171 = vst.msk [vmem:[#allocation0 + $0x58] sm:$0x8] %vm18_vm0, %v166_v32  }
  0xb8   :  { %v203_v36 = vld [vmem:[#allocation0 + $0x10] sm:$0xff]  ;;  %v224_v37 = vld [vmem:[#allocation0 + $0x28] sm:$0xff]  ;;  %v245_v38 = vld [vmem:[#allocation0 + $0x40] sm:$0xff] }
  0xb9   :  { %v291_v40 = vpack.c.bf16 %v210_v33, %v203_v36  ;;  %v296_v41 = vpack.c.bf16 %v224_v37, %v217_v34  ;;  %v306_v42 = vpack.c.bf16 %v252_v35, %v245_v38  ;;  %v266_v43 = vld [vmem:[#allocation0 + $0x58] sm:$0xff] }
  0xba   :  { %v311_v44 = vpack.c.bf16 %v266_v43, %v259_v39 }
  0xbb   :  { %313 = vst [vmem:[%s435_s1 + $0x8] sm:$0xff] %v291_v40  }
  0xbc   :  { %314 = vst [vmem:[%s435_s1 + $0x10] sm:$0xff] %v296_v41  }
  0xbd   :  { %316 = vst [vmem:[%s435_s1 + $0x20] sm:$0xff] %v306_v42  }
  0xbe   :  { %317 = vst [vmem:[%s435_s1 + $0x28] sm:$0xff] %v311_v44  }

// kernel: multi_period_discriminator_forward.25
= control target key start
LH: loop header
LB: loop body
LE: loop exit
PB: predicated region body
PF: predicated region fallthrough
CT: control target
= control target key end

     0   :  { %s1953_s18 = smov 0   ;;  %s2738_s0 = inlined_call_operand.vmem [shape: bf16[64,128], index: 0, kind: input, shape index: {}]   ;;  %s2739_s1 = inlined_call_operand.vmem [shape: bf16[128,512], index: 1, kind: input, shape index: {}]   ;;  %s2740_s2 = inlined_call_operand.vmem [shape: f32[1,512], index: 2, kind: input, shape index: {}]   ;;  %s2741_s3 = inlined_call_operand.vmem [shape: bf16[512,256], index: 3, kind: input, shape index: {}]   ;;  %s2742_s4 = inlined_call_operand.vmem [shape: f32[1,256], index: 4, kind: input, shape index: {}]   ;;  %s2743_s5 = inlined_call_operand.vmem [shape: f32[64,256], index: 5, kind: output, shape index: {}]  }
   0x1 LB: > { %s1356_s19 = sadd.s32 4294967295, %s1921_s18   ;;  %p1360_p0 = scmp.ge.s32.totalorder %s1921_s18, 1  ;;  %s1921_s18 = sphi %s1953_s18, %s15_s18  }
   0x2   : > { %p188_p1 = scmp.lt.s32.totalorder %s1921_s18, 3 }
   0x4   : > { %p189_p2 = pnand %p1360_p0, %p188_p1 }
   0x5   : > { %s1361_s11 = sshll.u32 (!%p189_p2), %s1356_s19, 2 }
   0x6   : > { %192 = sbr.rel (%p189_p2) target bundleno = 432 (0x1b0), region = 40  ;;  %p218_p3 = scmp.lt.s32.totalorder (!%p189_p2), %s1361_s11, 7 }
   0xb   : > { %v1488_v0 = vld [vmem:[%s2739_s1 + $0xe0] sm:$0xf]  ;;  %v1793_v1 = vld [vmem:[%s2739_s1 + $0xec] sm:$0xf0]  ;;  %v1791_v2 = vld [vmem:[%s2739_s1 + $0xe4] sm:$0xf] }
   0xc   : > { %v1489_v3 = vor.u32 %v1793_v1, %v1488_v0  ;;  %v1490_v4 = vld [vmem:[%s2739_s1 + $0xf0] sm:$0xf0]  ;;  %v1496_v5 = vld [vmem:[%s2739_s1 + $0xe8] sm:$0xf]  ;;  %v1794_v6 = vld [vmem:[%s2739_s1 + $0xf4] sm:$0xf0] }
   0xd   : > { %v1493_v7 = vor.u32 %v1791_v2, %v1490_v4  ;;  %v1497_v8 = vor.u32 %v1794_v6, %v1496_v5  ;;  %v1792_v9 = vld [vmem:[%s2739_s1 + $0xec] sm:$0xf]  ;;  %v1498_v10 = vld [vmem:[%s2739_s1 + $0xf8] sm:$0xf0]  ;;  %v1472_v11 = vld [vmem:[%s2739_s1 + $0xc0] sm:$0xf] }
   0xe   : > { %448 = vmatpush.bf16.msra.mxu0 %v1489_v3  ;;  %v1501_v12 = vor.u32 %v1792_v9, %v1498_v10  ;;  %v1789_v13 = vld [vmem:[%s2739_s1 + $0xcc] sm:$0xf0]  ;;  %v1787_v14 = vld [vmem:[%s2739_s1 + $0xc4] sm:$0xf]  ;;  %v1474_v15 = vld [vmem:[%s2739_s1 + $0xd0] sm:$0xf0] }
   0xf   : > { %467 = vmatpush.bf16.msra.mxu1 %v1493_v7  ;;  %486 = vmatpush.bf16.msra.mxu2 %v1497_v8  ;;  %v1473_v16 = vor.u32 %v1789_v13, %v1472_v11  ;;  %v1477_v17 = vor.u32 %v1787_v14, %v1474_v15  ;;  %v1480_v18 = vld [vmem:[%s2739_s1 + $0xc8] sm:$0xf]  ;;  %v1790_v19 = vld [vmem:[%s2739_s1 + $0xd4] sm:$0xf0]  ;;  %v1788_v20 = vld [vmem:[%s2739_s1 + $0xcc] sm:$0xf] }
  0x10   : > { %505 = vmatpush.bf16.msra.mxu3 %v1501_v12  ;;  %v1481_v21 = vor.u32 %v1790_v19, %v1480_v18  ;;  %v1482_v22 = vld [vmem:[%s2739_s1 + $0xd8] sm:$0xf0]  ;;  %v1456_v23 = vld [vmem:[%s2739_s1 + $0xa0] sm:$0xf]  ;;  %v1785_v24 = vld [vmem:[%s2739_s1 + $0xac] sm:$0xf0] }
  0x11   : > { %v1485_v25 = vor.u32 %v1788_v20, %v1482_v22  ;;  %v1783_v26 = vld [vmem:[%s2739_s1 + $0xa4] sm:$0xf]  ;;  %v1458_v27 = vld [vmem:[%s2739_s1 + $0xb0] sm:$0xf0]  ;;  %v1464_v28 = vld [vmem:[%s2739_s1 + $0xa8] sm:$0xf]  ;;  %v1457_v29 = vor.u32 %v1785_v24, %v1456_v23 }
  0x12   : > { %449 = vmatpush.bf16.msra.mxu0 %v1473_v16  ;;  %v1786_v30 = vld [vmem:[%s2739_s1 + $0xb4] sm:$0xf0]  ;;  %v1784_v31 = vld [vmem:[%s2739_s1 + $0xac] sm:$0xf]  ;;  %v1466_v32 = vld [vmem:[%s2739_s1 + $0xb8] sm:$0xf0]  ;;  %v1461_v33 = vor.u32 %v1783_v26, %v1458_v27 }
  0x13   : > { %468 = vmatpush.bf16.msra.mxu1 %v1477_v17  ;;  %487 = vmatpush.bf16.msra.mxu2 %v1481_v21  ;;  %v1465_v34 = vor.u32 %v1786_v30, %v1464_v28  ;;  %v1440_v35 = vld [vmem:[%s2739_s1 + $0x80] sm:$0xf]  ;;  %v1781_v36 = vld [vmem:[%s2739_s1 + $0x8c] sm:$0xf0]  ;;  %v1779_v37 = vld [vmem:[%s2739_s1 + $0x84] sm:$0xf]  ;;  %v1469_v38 = vor.u32 %v1784_v31, %v1466_v32 }
  0x14   : > { %506 = vmatpush.bf16.msra.mxu3 %v1485_v25  ;;  %v1442_v39 = vld [vmem:[%s2739_s1 + $0x90] sm:$0xf0]  ;;  %v1448_v40 = vld [vmem:[%s2739_s1 + $0x88] sm:$0xf]  ;;  %v1782_v41 = vld [vmem:[%s2739_s1 + $0x94] sm:$0xf0]  ;;  %v1441_v44 = vor.u32 %v1781_v36, %v1440_v35 }
  0x15   : > { %v1780_v42 = vld [vmem:[%s2739_s1 + $0x8c] sm:$0xf]  ;;  %v1450_v43 = vld [vmem:[%s2739_s1 + $0x98] sm:$0xf0]  ;;  %v1445_v45 = vor.u32 %v1779_v37, %v1442_v39  ;;  %v1449_v46 = vor.u32 %v1782_v41, %v1448_v40  ;;  %v1424_v47 = vld [vmem:[%s2739_s1 + $0x60] sm:$0xf] }
  0x16   : > { %450 = vmatpush.bf16.msra.mxu0 %v1457_v29  ;;  %v1777_v48 = vld [vmem:[%s2739_s1 + $0x6c] sm:$0xf0]  ;;  %v1775_v49 = vld [vmem:[%s2739_s1 + $0x64] sm:$0xf]  ;;  %v1453_v50 = vor.u32 %v1780_v42, %v1450_v43  ;;  %v1426_v51 = vld [vmem:[%s2739_s1 + $0x70] sm:$0xf0] }
  0x17   : > { %469 = vmatpush.bf16.msra.mxu1 %v1461_v33  ;;  %488 = vmatpush.bf16.msra.mxu2 %v1465_v34  ;;  %v1432_v52 = vld [vmem:[%s2739_s1 + $0x68] sm:$0xf]  ;;  %v1778_v53 = vld [vmem:[%s2739_s1 + $0x74] sm:$0xf0]  ;;  %v1776_v54 = vld [vmem:[%s2739_s1 + $0x6c] sm:$0xf]  ;;  %v1425_v56 = vor.u32 %v1777_v48, %v1424_v47  ;;  %v1429_v57 = vor.u32 %v1775_v49, %v1426_v51 }
  0x18   : > { %507 = vmatpush.bf16.msra.mxu3 %v1469_v38  ;;  %v1434_v55 = vld [vmem:[%s2739_s1 + $0x78] sm:$0xf0]  ;;  %v1433_v58 = vor.u32 %v1778_v53, %v1432_v52  ;;  %v1408_v59 = vld [vmem:[%s2739_s1 + $0x40] sm:$0xf]  ;;  %v1773_v60 = vld [vmem:[%s2739_s1 + $0x4c] sm:$0xf0] }
  0x19   : > { %v1771_v61 = vld [vmem:[%s2739_s1 + $0x44] sm:$0xf]  ;;  %v1437_v62 = vor.u32 %v1776_v54, %v1434_v55  ;;  %v1410_v63 = vld [vmem:[%s2739_s1 + $0x50] sm:$0xf0]  ;;  %v1416_v0 = vld [vmem:[%s2739_s1 + $0x48] sm:$0xf]  ;;  %v1409_v4 = vor.u32 %v1773_v60, %v1408_v59 }
  0x1a   : > { %451 = vmatpush.bf16.msra.mxu0 %v1441_v44  ;;  %v1774_v1 = vld [vmem:[%s2739_s1 + $0x54] sm:$0xf0]  ;;  %v1772_v2 = vld [vmem:[%s2739_s1 + $0x4c] sm:$0xf]  ;;  %v1418_v3 = vld [vmem:[%s2739_s1 + $0x58] sm:$0xf0]  ;;  %v1413_v6 = vor.u32 %v1771_v61, %v1410_v63 }
  0x1b   : > { %470 = vmatpush.bf16.msra.mxu1 %v1445_v45  ;;  %489 = vmatpush.bf16.msra.mxu2 %v1449_v46  ;;  %v1392_v5 = vld [vmem:[%s2739_s1 + $0x20] sm:$0xf]  ;;  %v1417_v7 = vor.u32 %v1774_v1, %v1416_v0  ;;  %v1769_v8 = vld [vmem:[%s2739_s1 + $0x2c] sm:$0xf0]  ;;  %v1767_v9 = vld [vmem:[%s2739_s1 + $0x24] sm:$0xf]  ;;  %v1421_v11 = vor.u32 %v1772_v2, %v1418_v3 }
  0x1c   : > { %508 = vmatpush.bf16.msra.mxu3 %v1453_v50  ;;  %v1394_v10 = vld [vmem:[%s2739_s1 + $0x30] sm:$0xf0]  ;;  %v1400_v12 = vld [vmem:[%s2739_s1 + $0x28] sm:$0xf]  ;;  %v1770_v13 = vld [vmem:[%s2739_s1 + $0x34] sm:$0xf0]  ;;  %v1393_v16 = vor.u32 %v1769_v8, %v1392_v5 }
  0x1d   : > { %v1768_v14 = vld [vmem:[%s2739_s1 + $0x2c] sm:$0xf]  ;;  %v1402_v15 = vld [vmem:[%s2739_s1 + $0x38] sm:$0xf0]  ;;  %v1376_v17 = vld [vmem:[%s2739_s1] sm:$0xf]  ;;  %v1397_v18 = vor.u32 %v1767_v9, %v1394_v10  ;;  %v1401_v19 = vor.u32 %v1770_v13, %v1400_v12 }
  0x1e   : > { %452 = vmatpush.bf16.msra.mxu0 %v1425_v56  ;;  %v1765_v20 = vld [vmem:[%s2739_s1 + $0xc] sm:$0xf0]  ;;  %v1763_v21 = vld [vmem:[%s2739_s1 + $0x4] sm:$0xf]  ;;  %s2745_s11 = smov (!%p218_p3, %s1361_s11), 7  ;;  %v1405_v22 = vor.u32 %v1768_v14, %v1402_v15 }
  0x1f   : > { %471 = vmatpush.bf16.msra.mxu1 %v1429_v57  ;;  %490 = vmatpush.bf16.msra.mxu2 %v1433_v58  ;;  %v1378_v23 = vld [vmem:[%s2739_s1 + $0x10] sm:$0xf0]  ;;  %v1384_v24 = vld [vmem:[%s2739_s1 + $0x8] sm:$0xf]  ;;  %v1766_v25 = vld [vmem:[%s2739_s1 + $0x14] sm:$0xf0]  ;;  %v1377_v28 = vor.u32 %v1765_v20, %v1376_v17 }
  0x20   : > { %509 = vmatpush.bf16.msra.mxu3 %v1437_v62  ;;  %v1764_v26 = vld [vmem:[%s2739_s1 + $0xc] sm:$0xf]  ;;  %v1386_v27 = vld [vmem:[%s2739_s1 + $0x18] sm:$0xf0]  ;;  %s1362_s8 = sshll.u32 %s2745_s11, 2  ;;  %v1381_v29 = vor.u32 %v1763_v21, %v1378_v23  ;;  %v1385_v30 = vor.u32 %v1766_v25, %v1384_v24  ;;  %s1760_s21 = sshll.u32 %s2745_s11, 4 }
  0x21   : > { %s221_s12 = scalar_lea.vmem %s2738_s0, %s1362_s8  ;;  %v1389_v31 = vor.u32 %v1764_v26, %v1386_v27  ;;  %v1560_v34 = vld [vmem:[%s2741_s3 + $0x70] sm:$0xf]  ;;  %v1810_v35 = vld [vmem:[%s2741_s3 + $0x74] sm:$0xf0]  ;;  %v1552_v40 = vld [vmem:[%s2741_s3 + $0x60] sm:$0xf]  ;;  %s2719_s24 = scalar_lea.vmem %s2743_s5, %s1760_s21 }
  0x22   : > { %453 = vmatpush.bf16.msra.mxu0 %v1409_v4  ;;  %v1761_v32 = vld [vmem:[%s221_s12] sm:$0xff]  ;;  %v1762_v33 = vld [vmem:[%s221_s12 + $0x8] sm:$0xff]  ;;  %v1624_v36 = vld [vmem:[%s2741_s3 + $0xf0] sm:$0xf]  ;;  %v1561_v37 = vor.u32 %v1810_v35, %v1560_v34 }
  0x23   : > { %472 = vmatpush.bf16.msra.mxu1 %v1413_v6  ;;  %491 = vmatpush.bf16.msra.mxu2 %v1417_v7  ;;  %v1826_v38 = vld [vmem:[%s2741_s3 + $0xf4] sm:$0xf0]  ;;  %v1808_v41 = vld [vmem:[%s2741_s3 + $0x64] sm:$0xf0]  ;;  %v1616_v42 = vld [vmem:[%s2741_s3 + $0xe0] sm:$0xf] }
  0x24   : > { %510 = vmatpush.bf16.msra.mxu3 %v1421_v11  ;;  %v1625_v39 = vor.u32 %v1826_v38, %v1624_v36  ;;  %v1553_v43 = vor.u32 %v1808_v41, %v1552_v40  ;;  %v1824_v44 = vld [vmem:[%s2741_s3 + $0xe4] sm:$0xf0]  ;;  %v1688_v46 = vld [vmem:[%s2741_s3 + $0x170] sm:$0xf]  ;;  %v1842_v47 = vld [vmem:[%s2741_s3 + $0x174] sm:$0xf0] }
  0x25   : > { %v1617_v45 = vor.u32 %v1824_v44, %v1616_v42  ;;  %v1752_v48 = vld [vmem:[%s2741_s3 + $0x1f0] sm:$0xf]  ;;  %v1689_v49 = vor.u32 %v1842_v47, %v1688_v46  ;;  %v1858_v50 = vld [vmem:[%s2741_s3 + $0x1f4] sm:$0xf0]  ;;  %v1680_v58 = vld [vmem:[%s2741_s3 + $0x160] sm:$0xf] }
  0x26   : > { %454 = vmatpush.bf16.msra.mxu0 %v1393_v16  ;;  %v1753_v51 = vor.u32 %v1858_v50, %v1752_v48  ;;  %v1544_v52 = vld [vmem:[%s2741_s3 + $0x50] sm:$0xf]  ;;  %v1806_v53 = vld [vmem:[%s2741_s3 + $0x54] sm:$0xf0]  ;;  %v1840_v59 = vld [vmem:[%s2741_s3 + $0x164] sm:$0xf0] }
  0x27   : > { %473 = vmatpush.bf16.msra.mxu1 %v1397_v18  ;;  %492 = vmatpush.bf16.msra.mxu2 %v1401_v19  ;;  %v1608_v54 = vld [vmem:[%s2741_s3 + $0xd0] sm:$0xf]  ;;  %v1545_v55 = vor.u32 %v1806_v53, %v1544_v52  ;;  %v1822_v56 = vld [vmem:[%s2741_s3 + $0xd4] sm:$0xf0]  ;;  %v1744_v60 = vld [vmem:[%s2741_s3 + $0x1e0] sm:$0xf]  ;;  %v1681_v61 = vor.u32 %v1840_v59, %v1680_v58 }
  0x28   : > { %511 = vmatpush.bf16.msra.mxu3 %v1405_v22  ;;  %v1609_v57 = vor.u32 %v1822_v56, %v1608_v54  ;;  %v1856_v62 = vld [vmem:[%s2741_s3 + $0x1e4] sm:$0xf0]  ;;  %v1536_v0 = vld [vmem:[%s2741_s3 + $0x40] sm:$0xf]  ;;  %v1672_v6 = vld [vmem:[%s2741_s3 + $0x150] sm:$0xf] }
  0x29   : > { %v1745_v63 = vor.u32 %v1856_v62, %v1744_v60  ;;  %v1804_v1 = vld [vmem:[%s2741_s3 + $0x44] sm:$0xf0]  ;;  %v1600_v2 = vld [vmem:[%s2741_s3 + $0xc0] sm:$0xf]  ;;  %v1838_v7 = vld [vmem:[%s2741_s3 + $0x154] sm:$0xf0] }
  0x2a   : > { %455 = vmatpush.bf16.msra.mxu0 %v1377_v28  ;;  %v1537_v3 = vor.u32 %v1804_v1, %v1536_v0  ;;  %v1820_v4 = vld [vmem:[%s2741_s3 + $0xc4] sm:$0xf0]  ;;  %v1736_v8 = vld [vmem:[%s2741_s3 + $0x1d0] sm:$0xf]  ;;  %v1673_v9 = vor.u32 %v1838_v7, %v1672_v6  ;;  %v1854_v10 = vld [vmem:[%s2741_s3 + $0x1d4] sm:$0xf0] }
  0x2b   : > { %474 = vmatpush.bf16.msra.mxu1 %v1381_v29  ;;  %493 = vmatpush.bf16.msra.mxu2 %v1385_v30  ;;  %v1601_v5 = vor.u32 %v1820_v4, %v1600_v2  ;;  %v1737_v11 = vor.u32 %v1854_v10, %v1736_v8  ;;  %v1528_v12 = vld [vmem:[%s2741_s3 + $0x30] sm:$0xf]  ;;  %v1802_v13 = vld [vmem:[%s2741_s3 + $0x34] sm:$0xf0]  ;;  %v1664_v18 = vld [vmem:[%s2741_s3 + $0x140] sm:$0xf] }
  0x2c   : > { %512 = vmatpush.bf16.msra.mxu3 %v1389_v31  ;;  %v1592_v14 = vld [vmem:[%s2741_s3 + $0xb0] sm:$0xf]  ;;  %v1529_v15 = vor.u32 %v1802_v13, %v1528_v12  ;;  %v1818_v16 = vld [vmem:[%s2741_s3 + $0xb4] sm:$0xf0]  ;;  %v1836_v19 = vld [vmem:[%s2741_s3 + $0x144] sm:$0xf0] }
  0x2d   : > { %456 = vmatmul.bf16.vlgmr.msra.gmra.mxu0 %v1761_v32  ;;  %v1593_v17 = vor.u32 %v1818_v16, %v1592_v14  ;;  %v1728_v20 = vld [vmem:[%s2741_s3 + $0x1c0] sm:$0xf]  ;;  %v1665_v21 = vor.u32 %v1836_v19, %v1664_v18  ;;  %v1852_v22 = vld [vmem:[%s2741_s3 + $0x1c4] sm:$0xf0]  ;;  %v1656_v31 = vld [vmem:[%s2741_s3 + $0x130] sm:$0xf] }
  0x2e   : > { %475 = vmatmul.bf16.vlgmr.msra.gmra.mxu1 %v1761_v32  ;;  %494 = vmatmul.bf16.vlgmr.msra.gmra.mxu2 %v1761_v32  ;;  %v1729_v23 = vor.u32 %v1852_v22, %v1728_v20  ;;  %v1520_v24 = vld [vmem:[%s2741_s3 + $0x20] sm:$0xf]  ;;  %v1800_v25 = vld [vmem:[%s2741_s3 + $0x24] sm:$0xf0]  ;;  %v1850_v35 = vld [vmem:[%s2741_s3 + $0x1b4] sm:$0xf0] }
  0x2f   : > { %513 = vmatmul.bf16.vlgmr.msra.gmra.mxu3 %v1761_v32  ;;  %1066 = vmatpush.bf16.msrb.mxu0 %v1561_v37  ;;  %v1584_v26 = vld [vmem:[%s2741_s3 + $0xa0] sm:$0xf]  ;;  %v1521_v28 = vor.u32 %v1800_v25, %v1520_v24  ;;  %v1816_v29 = vld [vmem:[%s2741_s3 + $0xa4] sm:$0xf0]  ;;  %v1834_v32 = vld [vmem:[%s2741_s3 + $0x134] sm:$0xf0] }
  0x30   : > { %1085 = vmatpush.bf16.msrb.mxu1 %v1625_v39  ;;  %1104 = vmatpush.bf16.msrb.mxu2 %v1689_v49  ;;  %v266_v27 = vld [vmem:[%s2740_s2] sm:$0xf]  ;;  %v1585_v30 = vor.u32 %v1816_v29, %v1584_v26  ;;  %v1657_v34 = vor.u32 %v1834_v32, %v1656_v31  ;;  %v1512_v37 = vld [vmem:[%s2741_s3 + $0x10] sm:$0xf]  ;;  %v1798_v38 = vld [vmem:[%s2741_s3 + $0x14] sm:$0xf0] }
  0x31   : > { %1123 = vmatpush.bf16.msrb.mxu3 %v1753_v51  ;;  %v1576_v39 = vld [vmem:[%s2741_s3 + $0x90] sm:$0xf]  ;;  %v2305_v40 = vperm.slane %v266_v27, 0  ;;  %v2307_v41 = vperm.slane %v266_v27, 1  ;;  %v1513_v42 = vor.u32 %v1798_v38, %v1512_v37  ;;  %v1832_v46 = vld [vmem:[%s2741_s3 + $0x124] sm:$0xf0] }
  0x32   : > { %v1712_v47 = vld [vmem:[%s2741_s3 + $0x1a0] sm:$0xf]  ;;  %v1848_v49 = vld [vmem:[%s2741_s3 + $0x1a4] sm:$0xf0]  ;;  %v1830_v62 = vld [vmem:[%s2741_s3 + $0x114] sm:$0xf0] }
  0x33   : > { %1067 = vmatpush.bf16.msrb.mxu0 %v1553_v43  ;;  %v1814_v43 = vld [vmem:[%s2741_s3 + $0x94] sm:$0xf0]  ;;  %v1713_v51 = vor.u32 %v1848_v49, %v1712_v47  ;;  %v1504_v52 = vld [vmem:[%s2741_s3] sm:$0xf]  ;;  %v1796_v53 = vld [vmem:[%s2741_s3 + $0x4] sm:$0xf0] }
  0x34   : > { %1086 = vmatpush.bf16.msrb.mxu1 %v1617_v45  ;;  %1105 = vmatpush.bf16.msrb.mxu2 %v1681_v61  ;;  %v1577_v44 = vor.u32 %v1814_v43, %v1576_v39  ;;  %v1648_v45 = vld [vmem:[%s2741_s3 + $0x120] sm:$0xf]  ;;  %v1812_v58 = vld [vmem:[%s2741_s3 + $0x84] sm:$0xf0]  ;;  %v1640_v61 = vld [vmem:[%s2741_s3 + $0x110] sm:$0xf] }
  0x35   : > { %1124 = vmatpush.bf16.msrb.mxu3 %v1745_v63  ;;  %v1649_v48 = vor.u32 %v1832_v46, %v1648_v45  ;;  %v1568_v54 = vld [vmem:[%s2741_s3 + $0x80] sm:$0xf]  ;;  %v1704_v63 = vld [vmem:[%s2741_s3 + $0x190] sm:$0xf]  ;;  %v1641_v1 = vor.u32 %v1830_v62, %v1640_v61  ;;  %v1846_v2 = vld [vmem:[%s2741_s3 + $0x194] sm:$0xf0] }
  0x36   : > { %v1569_v60 = vor.u32 %v1812_v58, %v1568_v54  ;;  %v2358_v4 = vperm.slane %v266_v27, 2  ;;  %v2361_v7 = vperm.slane %v266_v27, 3  ;;  %v1562_v10 = vld [vmem:[%s2741_s3 + $0x78] sm:$0xf0]  ;;  %v1828_v22 = vld [vmem:[%s2741_s3 + $0x104] sm:$0xf0] }
  0x37   : > { %1068 = vmatpush.bf16.msrb.mxu0 %v1545_v55  ;;  %v1844_v29 = vld [vmem:[%s2741_s3 + $0x184] sm:$0xf0]  ;;  %v1618_v37 = vld [vmem:[%s2741_s3 + $0xe8] sm:$0xf0]  ;;  %v1690_v49 = vld [vmem:[%s2741_s3 + $0x178] sm:$0xf0] }
  0x38   : > { %1087 = vmatpush.bf16.msrb.mxu1 %v1609_v57  ;;  %1106 = vmatpush.bf16.msrb.mxu2 %v1673_v9  ;;  %v1505_v57 = vor.u32 %v1796_v53, %v1504_v52  ;;  %v1809_v9 = vld [vmem:[%s2741_s3 + $0x74] sm:$0xf]  ;;  %v1754_v54 = vld [vmem:[%s2741_s3 + $0x1f8] sm:$0xf0] }
  0x39   : > { %1125 = vmatpush.bf16.msrb.mxu3 %v1737_v11  ;;  %v1825_v11 = vld [vmem:[%s2741_s3 + $0xf4] sm:$0xf]  ;;  %v1565_v14 = vor.u32 %v1809_v9, %v1562_v10  ;;  %v1546_v61 = vld [vmem:[%s2741_s3 + $0x58] sm:$0xf0] }
  0x3a   : > { %v1857_v53 = vld [vmem:[%s2741_s3 + $0x1f4] sm:$0xf] }
  0x3b   : > { %1069 = vmatpush.bf16.msrb.mxu0 %v1537_v3  ;;  %v1821_v62 = vld [vmem:[%s2741_s3 + $0xd4] sm:$0xf] }
  0x3c   : > { %1088 = vmatpush.bf16.msrb.mxu1 %v1601_v5  ;;  %1107 = vmatpush.bf16.msrb.mxu2 %v1665_v21  ;;  %v1705_v5 = vor.u32 %v1846_v2, %v1704_v63  ;;  %v1632_v21 = vld [vmem:[%s2741_s3 + $0x100] sm:$0xf] }
  0x3d   : > { %461 = vmatmul.bf16.gmra.mxu0 %v1762_v33  ;;  %1126 = vmatpush.bf16.msrb.mxu3 %v1729_v23  ;;  %v1633_v27 = vor.u32 %v1828_v22, %v1632_v21 }
  0x3e   : > { %480 = vmatmul.bf16.gmra.mxu1 %v1762_v33  ;;  %499 = vmatmul.bf16.gmra.mxu2 %v1762_v33 }
  0x3f   : > { %518 = vmatmul.bf16.gmra.mxu3 %v1762_v33  ;;  %1070 = vmatpush.bf16.msrb.mxu0 %v1529_v15  ;;  %v1720_v33 = vld [vmem:[%s2741_s3 + $0x1b0] sm:$0xf]  ;;  %v1626_v15 = vld [vmem:[%s2741_s3 + $0xf8] sm:$0xf0] }
  0x40   : > { %1089 = vmatpush.bf16.msrb.mxu1 %v1593_v17  ;;  %v1721_v36 = vor.u32 %v1850_v35, %v1720_v33  ;;  %1108 = vmatpush.bf16.msrb.mxu2 %v1657_v34  ;;  %v1629_v20 = vor.u32 %v1825_v11, %v1626_v15  ;;  %v1554_v35 = vld [vmem:[%s2741_s3 + $0x68] sm:$0xf0] }
  0x42   : > { %1127 = vmatpush.bf16.msrb.mxu3 %v1721_v36  ;;  %v1823_v36 = vld [vmem:[%s2741_s3 + $0xe4] sm:$0xf] }
  0x43   : > { %1071 = vmatpush.bf16.msrb.mxu0 %v1521_v28  ;;  %v1696_v28 = vld [vmem:[%s2741_s3 + $0x180] sm:$0xf]  ;;  %v1621_v47 = vor.u32 %v1823_v36, %v1618_v37 }
  0x44   : > { %1090 = vmatpush.bf16.msrb.mxu1 %v1585_v30  ;;  %1109 = vmatpush.bf16.msrb.mxu2 %v1649_v48  ;;  %v1807_v30 = vld [vmem:[%s2741_s3 + $0x64] sm:$0xf]  ;;  %v1697_v34 = vor.u32 %v1844_v29, %v1696_v28  ;;  %v1841_v48 = vld [vmem:[%s2741_s3 + $0x174] sm:$0xf] }
  0x45   : > { %v1557_v43 = vor.u32 %v1807_v30, %v1554_v35  ;;  %v1693_v52 = vor.u32 %v1841_v48, %v1690_v49 }
  0x46   : > { %1128 = vmatpush.bf16.msrb.mxu3 %v1713_v51 }
  0x47   : > { %1072 = vmatpush.bf16.msrb.mxu0 %v1513_v42 }
  0x48   : > { %1091 = vmatpush.bf16.msrb.mxu1 %v1577_v44  ;;  %1110 = vmatpush.bf16.msrb.mxu2 %v1641_v1 }
  0x4a   : > { %1129 = vmatpush.bf16.msrb.mxu3 %v1705_v5 }
  0x4b   : > { %1073 = vmatpush.bf16.msrb.mxu0 %v1505_v57 }
  0x4c   : > { %1092 = vmatpush.bf16.msrb.mxu1 %v1569_v60  ;;  %1111 = vmatpush.bf16.msrb.mxu2 %v1633_v27  ;;  %v1757_v60 = vor.u32 %v1857_v53, %v1754_v54 }
  0x4e   : > { %1130 = vmatpush.bf16.msrb.mxu3 %v1697_v34 }
  0x4f   : > { %1142 = vmatpush.bf16.msra.mxu0 %v1565_v14 }
  0x50   : > { %1161 = vmatpush.bf16.msra.mxu1 %v1629_v20  ;;  %1180 = vmatpush.bf16.msra.mxu2 %v1693_v52 }
  0x52   : > { %1199 = vmatpush.bf16.msra.mxu3 %v1757_v60 }
  0x53   : > { %1143 = vmatpush.bf16.msra.mxu0 %v1557_v43 }
  0x54   : > { %1162 = vmatpush.bf16.msra.mxu1 %v1621_v47 }
  0xaa   : > { %v457_v50 = vpop.f32.mrf.mxu0 }
  0xab   : > { %v2334_v55 = vadd.f32 %v457_v50, %v2305_v40  ;;  %v476_v56 = vpop.f32.mrf.mxu1 }
  0xac   : > { %v2340_v59 = vadd.f32 %v476_v56, %v2307_v41  ;;  %v1805_v56 = vld [vmem:[%s2741_s3 + $0x54] sm:$0xf] }
  0xad   : > { %v524_v0 = vmul.f32 %v2334_v55, %v2334_v55  ;;  %v1549_v2 = vor.u32 %v1805_v56, %v1546_v61 }
  0xae   : > { %v525_v3 = vmul.f32 %v2340_v59, %v2340_v59 }
  0xaf   : > { %v540_v6 = vmul.f32 %v524_v0, %v2334_v55  ;;  %1144 = vmatpush.bf16.msra.mxu0 %v1549_v2 }
  0xb0   : > { %v541_v8 = vmul.f32 %v525_v3, %v2340_v59  ;;  %v1610_v3 = vld [vmem:[%s2741_s3 + $0xd8] sm:$0xf0] }
  0xb1   : > { %v556_v12 = vmul.f32 0.044715, %v540_v6  ;;  %v495_v13 = vpop.f32.mrf.mxu2  ;;  %v1613_v11 = vor.u32 %v1821_v62, %v1610_v3 }
  0xb2   : > { %v557_v16 = vmul.f32 0.044715, %v541_v8  ;;  %v2377_v17 = vadd.f32 %v495_v13, %v2358_v4  ;;  %v514_v18 = vpop.f32.mrf.mxu3  ;;  %v459_v19 = vpop.f32.mrf.mxu0 }
  0xb3   : > { %v572_v23 = vadd.f32 %v556_v12, %v2334_v55  ;;  %v2387_v24 = vadd.f32 %v514_v18, %v2361_v7  ;;  %v2390_v25 = vadd.f32 %v459_v19, %v2305_v40  ;;  %v478_v26 = vpop.f32.mrf.mxu1  ;;  %1163 = vmatpush.bf16.msra.mxu1 %v1613_v11 }
  0xb4   : > { %v573_v31 = vadd.f32 %v557_v16, %v2340_v59  ;;  %v526_v32 = vmul.f32 %v2377_v17, %v2377_v17  ;;  %v2405_v33 = vadd.f32 %v478_v26, %v2307_v41 }
  0xb5   : > { %v588_v38 = vmul.f32 0.7978846, %v572_v23  ;;  %v527_v39 = vmul.f32 %v2387_v24, %v2387_v24  ;;  %v528_v42 = vmul.f32 %v2390_v25, %v2390_v25 }
  0xb6   : > { %v589_v44 = vmul.f32 0.7978846, %v573_v31  ;;  %v542_v45 = vmul.f32 %v526_v32, %v2377_v17  ;;  %v529_v46 = vmul.f32 %v2405_v33, %v2405_v33 }
  0xb7   : > { %1867 = vtanh.f32 %v588_v38  ;;  %v543_v50 = vmul.f32 %v527_v39, %v2387_v24  ;;  %v544_v51 = vmul.f32 %v528_v42, %v2390_v25 }
  0xb8   : > { %1869 = vtanh.f32 %v589_v44  ;;  %v558_v57 = vmul.f32 0.044715, %v542_v45  ;;  %v545_v58 = vmul.f32 %v529_v46, %v2405_v33 }
  0xb9   : > { %v559_v63 = vmul.f32 0.044715, %v543_v50  ;;  %v560_v0 = vmul.f32 0.044715, %v544_v51  ;;  %v497_v1 = vpop.f32.mrf.mxu2 }
  0xba   : > { %v574_v5 = vadd.f32 %v558_v57, %v2377_v17  ;;  %v561_v6 = vmul.f32 0.044715, %v545_v58  ;;  %v2452_v8 = vadd.f32 %v497_v1, %v2358_v4  ;;  %v516_v9 = vpop.f32.mrf.mxu3  ;;  %v462_v10 = vpop.f32.mrf.mxu0 }
  0xbb   : > { %v575_v12 = vadd.f32 %v559_v63, %v2387_v24  ;;  %v576_v13 = vadd.f32 %v560_v0, %v2390_v25  ;;  %v2457_v14 = vadd.f32 %v516_v9, %v2361_v7  ;;  %v2460_v15 = vadd.f32 %v462_v10, %v2305_v40  ;;  %v481_v16 = vpop.f32.mrf.mxu1 }
  0xbc   : > { %v590_v18 = vmul.f32 0.7978846, %v574_v5  ;;  %v577_v19 = vadd.f32 %v561_v6, %v2405_v33  ;;  %v530_v20 = vmul.f32 %v2452_v8, %v2452_v8  ;;  %v2466_v21 = vadd.f32 %v481_v16, %v2307_v41 }
  0xbd   : > { %v1868_v22 = vpop.eup %1867  ;;  %v591_v23 = vmul.f32 0.7978846, %v575_v12  ;;  %v592_v26 = vmul.f32 0.7978846, %v576_v13  ;;  %v531_v27 = vmul.f32 %v2457_v14, %v2457_v14  ;;  %v532_v28 = vmul.f32 %v2460_v15, %v2460_v15 }
  0xbe   : > { %v1870_v29 = vpop.eup %1869  ;;  %1871 = vtanh.f32 %v590_v18  ;;  %v593_v30 = vmul.f32 0.7978846, %v577_v19  ;;  %v546_v31 = vmul.f32 %v530_v20, %v2452_v8  ;;  %v533_v32 = vmul.f32 %v2466_v21, %v2466_v21 }
  0xbf   : > { %1873 = vtanh.f32 %v591_v23  ;;  %v547_v34 = vmul.f32 %v531_v27, %v2457_v14  ;;  %v548_v35 = vmul.f32 %v532_v28, %v2460_v15  ;;  %v620_v36 = vadd.f32 1.0, %v1868_v22 }
  0xc0   : > { %1875 = vtanh.f32 %v592_v26  ;;  %v562_v37 = vmul.f32 0.044715, %v546_v31  ;;  %v549_v38 = vmul.f32 %v533_v32, %v2466_v21  ;;  %v621_v39 = vadd.f32 1.0, %v1870_v29  ;;  %v1839_v32 = vld [vmem:[%s2741_s3 + $0x164] sm:$0xf] }
  0xc1   : > { %1877 = vtanh.f32 %v593_v30  ;;  %v563_v42 = vmul.f32 0.044715, %v547_v34  ;;  %v564_v43 = vmul.f32 0.044715, %v548_v35  ;;  %v500_v44 = vpop.f32.mrf.mxu2  ;;  %v636_v45 = vmul.f32 0.5, %v620_v36 }
  0xc2   : > { %v578_v46 = vadd.f32 %v562_v37, %v2452_v8  ;;  %v565_v47 = vmul.f32 0.044715, %v549_v38  ;;  %v2480_v48 = vadd.f32 %v500_v44, %v2358_v4  ;;  %v519_v49 = vpop.f32.mrf.mxu3  ;;  %v464_v50 = vpop.f32.mrf.mxu0  ;;  %v637_v51 = vmul.f32 0.5, %v621_v39  ;;  %v1682_v34 = vld [vmem:[%s2741_s3 + $0x168] sm:$0xf0] }
  0xc3   : > { %v579_v52 = vadd.f32 %v563_v42, %v2457_v14  ;;  %v2484_v53 = vadd.f32 %v564_v43, %v2460_v15  ;;  %v2487_v54 = vadd.f32 %v519_v49, %v2361_v7  ;;  %v2490_v56 = vadd.f32 %v464_v50, %v2305_v40  ;;  %v483_v57 = vpop.f32.mrf.mxu1  ;;  %v1855_v38 = vld [vmem:[%s2741_s3 + $0x1e4] sm:$0xf]  ;;  %v1746_v39 = vld [vmem:[%s2741_s3 + $0x1e8] sm:$0xf0] }
  0xc4   : > { %v1872_v58 = vpop.eup %1871  ;;  %v594_v60 = vmul.f32 0.7978846, %v578_v46  ;;  %v2493_v61 = vadd.f32 %v565_v47, %v2466_v21  ;;  %v534_v62 = vmul.f32 %v2480_v48, %v2480_v48  ;;  %v2498_v63 = vadd.f32 %v483_v57, %v2307_v41  ;;  %v1803_v42 = vld [vmem:[%s2741_s3 + $0x44] sm:$0xf]  ;;  %v1538_v43 = vld [vmem:[%s2741_s3 + $0x48] sm:$0xf0] }
  0xc5   : > { %v1874_v0 = vpop.eup %1873  ;;  %v595_v1 = vmul.f32 0.7978846, %v579_v52  ;;  %v535_v2 = vmul.f32 %v2487_v54, %v2487_v54  ;;  %v536_v40 = vmul.f32 %v2490_v56, %v2490_v56  ;;  %v652_v3 = vmul.f32 %v636_v45, %v2334_v55  ;;  %v1819_v47 = vld [vmem:[%s2741_s3 + $0xc4] sm:$0xf]  ;;  %v1602_v49 = vld [vmem:[%s2741_s3 + $0xc8] sm:$0xf0] }
  0xc6   : > { %v1876_v5 = vpop.eup %1875  ;;  %1879 = vtanh.f32 %v594_v60  ;;  %v550_v6 = vmul.f32 %v534_v62, %v2480_v48  ;;  %v537_v9 = vmul.f32 %v2498_v63, %v2498_v63  ;;  %v653_v41 = vmul.f32 %v637_v51, %v2340_v59  ;;  %v1674_v60 = vld [vmem:[%s2741_s3 + $0x158] sm:$0xf0] }
  0xc7   : > { %v1878_v10 = vpop.eup %1877  ;;  %1881 = vtanh.f32 %v595_v1  ;;  %v551_v11 = vmul.f32 %v535_v2, %v2487_v54  ;;  %v552_v12 = vmul.f32 %v536_v40, %v2490_v56  ;;  %v624_v13 = vadd.f32 1.0, %v1876_v5  ;;  %v1853_v40 = vld [vmem:[%s2741_s3 + $0x1d4] sm:$0xf] }
  0xc8   : > { %v566_v16 = vmul.f32 0.044715, %v550_v6  ;;  %v553_v18 = vmul.f32 %v537_v9, %v2498_v63  ;;  %v625_v55 = vadd.f32 1.0, %v1878_v10  ;;  %v622_v19 = vadd.f32 1.0, %v1872_v58  ;;  %v1530_v10 = vld [vmem:[%s2741_s3 + $0x38] sm:$0xf0] }
  0xc9   : > { %v567_v20 = vmul.f32 0.044715, %v551_v11  ;;  %v568_v22 = vmul.f32 0.044715, %v552_v12  ;;  %v502_v23 = vpop.f32.mrf.mxu2  ;;  %v640_v26 = vmul.f32 0.5, %v624_v13  ;;  %v623_v27 = vadd.f32 1.0, %v1874_v0 }
  0xca   : > { %v2513_v28 = vadd.f32 %v566_v16, %v2480_v48  ;;  %v569_v59 = vmul.f32 0.044715, %v553_v18  ;;  %v2516_v29 = vadd.f32 %v502_v23, %v2358_v4  ;;  %v521_v30 = vpop.f32.mrf.mxu3  ;;  %v641_v31 = vmul.f32 0.5, %v625_v55  ;;  %v1817_v18 = vld [vmem:[%s2741_s3 + $0xb4] sm:$0xf] }
  0xcb   : > { %v2525_v35 = vadd.f32 %v567_v20, %v2487_v54  ;;  %v584_v36 = vadd.f32 %v568_v22, %v2490_v56  ;;  %v2529_v37 = vadd.f32 %v521_v30, %v2361_v7  ;;  %v656_v4 = vmul.f32 %v640_v26, %v2390_v25  ;;  %v1835_v55 = vld [vmem:[%s2741_s3 + $0x144] sm:$0xf]  ;;  %v1666_v26 = vld [vmem:[%s2741_s3 + $0x148] sm:$0xf0] }
  0xcc   : > { %v1880_v7 = vpop.eup %1879  ;;  %v585_v44 = vadd.f32 %v569_v59, %v2498_v63  ;;  %v538_v25 = vmul.f32 %v2516_v29, %v2516_v29  ;;  %v657_v45 = vmul.f32 %v641_v31, %v2405_v33  ;;  %v638_v46 = vmul.f32 0.5, %v622_v19  ;;  %v1837_v33 = vld [vmem:[%s2741_s3 + $0x154] sm:$0xf] }
  0xcd   : > { %v1882_v50 = vpop.eup %1881  ;;  %v539_v51 = vmul.f32 %v2529_v37, %v2529_v37  ;;  %v2556_v52 = vpack.c.bf16 %v656_v4, %v652_v3  ;;  %v626_v57 = vadd.f32 1.0, %v1880_v7  ;;  %v639_v58 = vmul.f32 0.5, %v623_v27  ;;  %v1738_v3 = vld [vmem:[%s2741_s3 + $0x1d8] sm:$0xf0]  ;;  %v1851_v27 = vld [vmem:[%s2741_s3 + $0x1c4] sm:$0xf] }
  0xce   : > { %v554_v62 = vmul.f32 %v538_v25, %v2516_v29  ;;  %v2565_v0 = vpack.c.bf16 %v657_v45, %v653_v41  ;;  %v654_v1 = vmul.f32 %v638_v46, %v2377_v17  ;;  %v627_v2 = vadd.f32 1.0, %v1882_v50  ;;  %v1801_v17 = vld [vmem:[%s2741_s3 + $0x34] sm:$0xf]  ;;  %v1658_v50 = vld [vmem:[%s2741_s3 + $0x138] sm:$0xf0] }
  0xcf   : > { %v555_v5 = vmul.f32 %v539_v51, %v2529_v37  ;;  %1074 = vmatmul.bf16.vlgmr.msrb.gmra.mxu0 %v2556_v52  ;;  %v642_v6 = vmul.f32 0.5, %v626_v57  ;;  %v655_v9 = vmul.f32 %v639_v58, %v2387_v24  ;;  %v1685_v41 = vor.u32 %v1839_v32, %v1682_v34  ;;  %v1594_v24 = vld [vmem:[%s2741_s3 + $0xb8] sm:$0xf0]  ;;  %v1730_v32 = vld [vmem:[%s2741_s3 + $0x1c8] sm:$0xf0] }
  0xd0   : > { %v570_v11 = vmul.f32 0.044715, %v554_v62  ;;  %1093 = vmatmul.bf16.vlgmr.msrb.gmra.mxu1 %v2565_v0  ;;  %v643_v12 = vmul.f32 0.5, %v627_v2  ;;  %v1749_v13 = vor.u32 %v1855_v38, %v1746_v39  ;;  %v1541_v16 = vor.u32 %v1803_v42, %v1538_v43  ;;  %v1799_v34 = vld [vmem:[%s2741_s3 + $0x24] sm:$0xf] }
  0xd1   : > { %v571_v19 = vmul.f32 0.044715, %v555_v5  ;;  %v658_v20 = vmul.f32 %v642_v6, %v2452_v8  ;;  %1181 = vmatpush.bf16.msra.mxu2 %v1685_v41  ;;  %v1605_v22 = vor.u32 %v1819_v47, %v1602_v49  ;;  %v1677_v23 = vor.u32 %v1837_v33, %v1674_v60  ;;  %v1833_v46 = vld [vmem:[%s2741_s3 + $0x134] sm:$0xf]  ;;  %v1578_v2 = vld [vmem:[%s2741_s3 + $0x98] sm:$0xf0] }
  0xd2   : > { %v586_v59 = vadd.f32 %v570_v11, %v2516_v29  ;;  %v659_v30 = vmul.f32 %v643_v12, %v2457_v14  ;;  %1200 = vmatpush.bf16.msra.mxu3 %v1749_v13  ;;  %1145 = vmatpush.bf16.msra.mxu0 %v1541_v16  ;;  %v1741_v31 = vor.u32 %v1853_v40, %v1738_v3  ;;  %v596_v8 = vmul.f32 0.7978846, %v2484_v53  ;;  %v1522_v53 = vld [vmem:[%s2741_s3 + $0x28] sm:$0xf0]  ;;  %v1849_v51 = vld [vmem:[%s2741_s3 + $0x1b4] sm:$0xf] }
  0xd3   : > { %v587_v4 = vadd.f32 %v571_v19, %v2529_v37  ;;  %v2610_v38 = vpack.c.bf16 %v658_v20, %v654_v1  ;;  %1164 = vmatpush.bf16.msra.mxu1 %v1605_v22  ;;  %v600_v39 = vmul.f32 0.7978846, %v584_v36  ;;  %v597_v14 = vmul.f32 0.7978846, %v2493_v61  ;;  %v1815_v36 = vld [vmem:[%s2741_s3 + $0xa4] sm:$0xf] }
  0xd4   : > { %v2616_v42 = vpack.c.bf16 %v659_v30, %v655_v9  ;;  %1883 = vtanh.f32 %v596_v8  ;;  %v601_v43 = vmul.f32 0.7978846, %v585_v44  ;;  %v1533_v7 = vor.u32 %v1801_v17, %v1530_v10  ;;  %v1586_v61 = vld [vmem:[%s2741_s3 + $0xa8] sm:$0xf0]  ;;  %v1797_v62 = vld [vmem:[%s2741_s3 + $0x14] sm:$0xf] }
  0xd5   : > { %1112 = vmatmul.bf16.vlgmr.msrb.gmra.mxu2 %v2610_v38  ;;  %1885 = vtanh.f32 %v600_v39  ;;  %v1597_v25 = vor.u32 %v1817_v18, %v1594_v24  ;;  %v1669_v45 = vor.u32 %v1835_v55, %v1666_v26  ;;  %v1733_v44 = vor.u32 %v1851_v27, %v1730_v32  ;;  %v1514_v1 = vld [vmem:[%s2741_s3 + $0x18] sm:$0xf0]  ;;  %v1831_v40 = vld [vmem:[%s2741_s3 + $0x124] sm:$0xf]  ;;  %v1650_v6 = vld [vmem:[%s2741_s3 + $0x128] sm:$0xf0] }
  0xd6   : > { %1131 = vmatmul.bf16.vlgmr.msrb.gmra.mxu3 %v2616_v42  ;;  %1182 = vmatpush.bf16.msra.mxu2 %v1677_v23  ;;  %1887 = vtanh.f32 %v597_v14  ;;  %v1525_v47 = vor.u32 %v1799_v34, %v1522_v53  ;;  %v598_v49 = vmul.f32 0.7978846, %v2513_v28  ;;  %v602_v57 = vmul.f32 0.7978846, %v586_v59  ;;  %v1722_v28 = vld [vmem:[%s2741_s3 + $0x1b8] sm:$0xf0] }
  0xd7   : > { %1201 = vmatpush.bf16.msra.mxu3 %v1741_v31  ;;  %1889 = vtanh.f32 %v601_v43  ;;  %1146 = vmatpush.bf16.msra.mxu0 %v1533_v7  ;;  %v599_v58 = vmul.f32 0.7978846, %v2525_v35  ;;  %v603_v33 = vmul.f32 0.7978846, %v587_v4  ;;  %v1589_v60 = vor.u32 %v1815_v36, %v1586_v61  ;;  %v1813_v35 = vld [vmem:[%s2741_s3 + $0x94] sm:$0xf] }
  0xd8   : > { %1165 = vmatpush.bf16.msra.mxu1 %v1597_v25  ;;  %1891 = vtanh.f32 %v598_v49  ;;  %v1661_v5 = vor.u32 %v1833_v46, %v1658_v50  ;;  %v1847_v9 = vld [vmem:[%s2741_s3 + $0x1a4] sm:$0xf]  ;;  %v1714_v41 = vld [vmem:[%s2741_s3 + $0x1a8] sm:$0xf0]  ;;  %v1725_v11 = vor.u32 %v1849_v51, %v1722_v28  ;;  %v1517_v12 = vor.u32 %v1797_v62, %v1514_v1  ;;  %v1829_v32 = vld [vmem:[%s2741_s3 + $0x114] sm:$0xf] }
  0xd9   : > { %1893 = vtanh.f32 %v602_v57  ;;  %v1795_v13 = vld [vmem:[%s2741_s3 + $0x4] sm:$0xf]  ;;  %v1506_v16 = vld [vmem:[%s2741_s3 + $0x8] sm:$0xf0]  ;;  %v1581_v55 = vor.u32 %v1813_v35, %v1578_v2  ;;  %v1653_v31 = vor.u32 %v1831_v40, %v1650_v6  ;;  %v1717_v8 = vor.u32 %v1847_v9, %v1714_v41  ;;  %v1642_v34 = vld [vmem:[%s2741_s3 + $0x118] sm:$0xf0] }
  0xda   : > { %v1884_v3 = vpop.eup %1883  ;;  %1183 = vmatpush.bf16.msra.mxu2 %v1669_v45  ;;  %1895 = vtanh.f32 %v599_v58  ;;  %v1811_v19 = vld [vmem:[%s2741_s3 + $0x84] sm:$0xf]  ;;  %v1570_v20 = vld [vmem:[%s2741_s3 + $0x88] sm:$0xf0]  ;;  %v1509_v53 = vor.u32 %v1795_v13, %v1506_v16  ;;  %v1845_v46 = vld [vmem:[%s2741_s3 + $0x194] sm:$0xf]  ;;  %v1645_v57 = vor.u32 %v1829_v32, %v1642_v34 }
  0xdb   : > { %v1886_v17 = vpop.eup %1885  ;;  %v628_v10 = vadd.f32 1.0, %v1884_v3  ;;  %1202 = vmatpush.bf16.msra.mxu3 %v1733_v44  ;;  %1147 = vmatpush.bf16.msra.mxu0 %v1525_v47  ;;  %1897 = vtanh.f32 %v603_v33  ;;  %v1573_v43 = vor.u32 %v1811_v19, %v1570_v20  ;;  %v1706_v44 = vld [vmem:[%s2741_s3 + $0x198] sm:$0xf0]  ;;  %v1634_v28 = vld [vmem:[%s2741_s3 + $0x108] sm:$0xf0] }
  0xdc   : > { %v1888_v18 = vpop.eup %1887  ;;  %v632_v24 = vadd.f32 1.0, %v1886_v17  ;;  %1166 = vmatpush.bf16.msra.mxu1 %v1589_v60  ;;  %v1827_v60 = vld [vmem:[%s2741_s3 + $0x104] sm:$0xf]  ;;  %v1698_v3 = vld [vmem:[%s2741_s3 + $0x188] sm:$0xf0] }
  0xdd   : > { %v1890_v22 = vpop.eup %1889  ;;  %v644_v23 = vmul.f32 0.5, %v628_v10  ;;  %v629_v26 = vadd.f32 1.0, %v1888_v18  ;;  %v1843_v40 = vld [vmem:[%s2741_s3 + $0x184] sm:$0xf] }
  0xde   : > { %v1892_v27 = vpop.eup %1891  ;;  %v648_v59 = vmul.f32 0.5, %v632_v24  ;;  %v633_v30 = vadd.f32 1.0, %v1890_v22  ;;  %1184 = vmatpush.bf16.msra.mxu2 %v1661_v5  ;;  %v1637_v5 = vor.u32 %v1827_v60, %v1634_v28 }
  0xdf   : > { %v1894_v4 = vpop.eup %1893  ;;  %v645_v39 = vmul.f32 0.5, %v629_v26  ;;  %v630_v14 = vadd.f32 1.0, %v1892_v27  ;;  %1203 = vmatpush.bf16.msra.mxu3 %v1725_v11  ;;  %1148 = vmatpush.bf16.msra.mxu0 %v1517_v12  ;;  %v660_v25 = vmul.f32 %v644_v23, %v2460_v15 }
  0xe0   : > { %v1896_v7 = vpop.eup %1895  ;;  %v664_v45 = vmul.f32 %v648_v59, %v2490_v56  ;;  %v649_v36 = vmul.f32 0.5, %v633_v30  ;;  %v634_v61 = vadd.f32 1.0, %v1894_v4  ;;  %1167 = vmatpush.bf16.msra.mxu1 %v1581_v55 }
  0xe1   : > { %v1898_v47 = vpop.eup %1897  ;;  %v661_v49 = vmul.f32 %v645_v39, %v2466_v21  ;;  %v646_v50 = vmul.f32 0.5, %v630_v14  ;;  %v631_v51 = vadd.f32 1.0, %v1896_v7  ;;  %v1709_v21 = vor.u32 %v1845_v46, %v1706_v44 }
  0xe2   : > { %v672_v15 = vpack.c.bf16 %v664_v45, %v660_v25  ;;  %v665_v56 = vmul.f32 %v649_v36, %v2498_v63  ;;  %v650_v58 = vmul.f32 0.5, %v634_v61  ;;  %v635_v33 = vadd.f32 1.0, %v1898_v47  ;;  %1185 = vmatpush.bf16.msra.mxu2 %v1653_v31 }
  0xe3   : > { %v647_v62 = vmul.f32 0.5, %v631_v51  ;;  %1204 = vmatpush.bf16.msra.mxu3 %v1717_v8  ;;  %1149 = vmatpush.bf16.msra.mxu0 %v1509_v53  ;;  %v662_v35 = vmul.f32 %v646_v50, %v2480_v48  ;;  %v1701_v48 = vor.u32 %v1843_v40, %v1698_v3 }
  0xe4   : > { %1079 = vmatmul.bf16.gmra.mxu0 %v672_v15  ;;  %v673_v1 = vpack.c.bf16 %v665_v56, %v661_v49  ;;  %v666_v63 = vmul.f32 %v650_v58, %v2516_v29  ;;  %v651_v2 = vmul.f32 0.5, %v635_v33  ;;  %1168 = vmatpush.bf16.msra.mxu1 %v1573_v43 }
  0xe5   : > { %v663_v9 = vmul.f32 %v647_v62, %v2487_v54  ;;  %v740_v54 = vld [vmem:[%s2742_s4] sm:$0x3] }
  0xe6   : > { %1098 = vmatmul.bf16.gmra.mxu1 %v673_v1  ;;  %v674_v6 = vpack.c.bf16 %v666_v63, %v662_v35  ;;  %v667_v41 = vmul.f32 %v651_v2, %v2529_v37  ;;  %1186 = vmatpush.bf16.msra.mxu2 %v1645_v57  ;;  %v742_v17 = vperm.slane %v740_v54, 0  ;;  %v2721_v33 = vperm.slane %v740_v54, 1 }
  0xe7   : > { %1205 = vmatpush.bf16.msra.mxu3 %v1709_v21 }
  0xe8   : > { %1117 = vmatmul.bf16.gmra.mxu2 %v674_v6  ;;  %v675_v29 = vpack.c.bf16 %v667_v41, %v663_v9 }
  0xea   : > { %1136 = vmatmul.bf16.gmra.mxu3 %v675_v29  ;;  %1187 = vmatpush.bf16.msra.mxu2 %v1637_v5 }
  0xeb   : > { %1206 = vmatpush.bf16.msra.mxu3 %v1701_v48 }
  0xf4   : > { %1150 = vmatmul.bf16.vlgmr.msra.gmra.mxu0 %v2556_v52 }
  0xf6   : > { %1169 = vmatmul.bf16.vlgmr.msra.gmra.mxu1 %v2565_v0 }
  0xf8   : > { %1188 = vmatmul.bf16.vlgmr.msra.gmra.mxu2 %v2610_v38 }
  0xfa   : > { %1207 = vmatmul.bf16.vlgmr.msra.gmra.mxu3 %v2616_v42 }
 0x104   : > { %1155 = vmatmul.bf16.gmra.mxu0 %v672_v15 }
 0x106   : > { %1174 = vmatmul.bf16.gmra.mxu1 %v673_v1 }
 0x108   : > { %1193 = vmatmul.bf16.gmra.mxu2 %v674_v6 }
 0x10a   : > { %1212 = vmatmul.bf16.gmra.mxu3 %v675_v29 }
 0x14c   : > { %v1075_v37 = vpop.f32.mrf.mxu0 }
 0x14d   : > { %v1094_v10 = vpop.f32.mrf.mxu1  ;;  %v1076_v11 = vadd.f32 %v1075_v37, %v742_v17 }
 0x14f   : > { %v1095_v12 = vadd.f32 %v1094_v10, %v1076_v11 }
 0x154   : > { %v1077_v52 = vpop.f32.mrf.mxu0 }
 0x155   : > { %v1096_v0 = vpop.f32.mrf.mxu1  ;;  %v1078_v18 = vadd.f32 %v1077_v52, %v742_v17 }
 0x157   : > { %v1097_v55 = vadd.f32 %v1096_v0, %v1078_v18 }
 0x158   : > { %v1113_v13 = vpop.f32.mrf.mxu2 }
 0x159   : > { %v1114_v16 = vadd.f32 %v1113_v13, %v1095_v12  ;;  %v1132_v38 = vpop.f32.mrf.mxu3 }
 0x15b   : > { %v1133_v42 = vadd.f32 %v1132_v38, %v1114_v16 }
 0x15d   : > { %v1218_v24 = vmul.f32 %v1133_v42, %v1133_v42 }
 0x15f   : > { %v1226_v19 = vmul.f32 %v1218_v24, %v1133_v42 }
 0x160   : > { %v1115_v20 = vpop.f32.mrf.mxu2 }
 0x161   : > { %v1234_v22 = vmul.f32 0.044715, %v1226_v19  ;;  %v1080_v23 = vpop.f32.mrf.mxu0  ;;  %v1116_v26 = vadd.f32 %v1115_v20, %v1097_v55  ;;  %v1134_v27 = vpop.f32.mrf.mxu3 }
 0x162   : > { %v1081_v34 = vadd.f32 %v1080_v23, %v742_v17 }
 0x163   : > { %v1242_v59 = vadd.f32 %v1234_v22, %v1133_v42  ;;  %v1099_v30 = vpop.f32.mrf.mxu1  ;;  %v1135_v31 = vadd.f32 %v1134_v27, %v1116_v26 }
 0x164   : > { %v1100_v53 = vadd.f32 %v1099_v30, %v1081_v34 }
 0x165   : > { %v1250_v8 = vmul.f32 0.7978846, %v1242_v59  ;;  %v1220_v32 = vmul.f32 %v1135_v31, %v1135_v31 }
 0x167   : > { %1899 = vtanh.f32 %v1250_v8  ;;  %v1228_v4 = vmul.f32 %v1220_v32, %v1135_v31 }
 0x169   : > { %v1236_v39 = vmul.f32 0.044715, %v1228_v4  ;;  %v1082_v14 = vpop.f32.mrf.mxu0 }
 0x16a   : > { %v1083_v47 = vadd.f32 %v1082_v14, %v742_v17 }
 0x16b   : > { %v1244_v43 = vadd.f32 %v1236_v39, %v1135_v31  ;;  %v1101_v7 = vpop.f32.mrf.mxu1  ;;  %v1118_v25 = vpop.f32.mrf.mxu2 }
 0x16c   : > { %v1119_v45 = vadd.f32 %v1118_v25, %v1100_v53  ;;  %v1102_v56 = vadd.f32 %v1101_v7, %v1083_v47 }
 0x16d   : > { %v1900_v36 = vpop.eup %1899  ;;  %v1252_v61 = vmul.f32 0.7978846, %v1244_v43  ;;  %v1137_v46 = vpop.f32.mrf.mxu3 }
 0x16e   : > { %v1266_v44 = vadd.f32 1.0, %v1900_v36  ;;  %v1138_v49 = vadd.f32 %v1137_v46, %v1119_v45 }
 0x16f   : > { %1901 = vtanh.f32 %v1252_v61 }
 0x170   : > { %v1274_v50 = vmul.f32 0.5, %v1266_v44  ;;  %v1222_v51 = vmul.f32 %v1138_v49, %v1138_v49 }
 0x171   : > { %v1151_v57 = vpop.f32.mrf.mxu0 }
 0x172   : > { %v1282_v15 = vmul.f32 %v1274_v50, %v1133_v42  ;;  %v1230_v58 = vmul.f32 %v1222_v51, %v1138_v49  ;;  %v1152_v40 = vadd.f32 %v1151_v57, %v2721_v33 }
 0x173   : > { %v1170_v60 = vpop.f32.mrf.mxu1  ;;  %v1120_v28 = vpop.f32.mrf.mxu2 }
 0x174   : > { %1290 = vst [vmem:[%s2719_s24] sm:$0xff] %v1282_v15  ;;  %v1238_v62 = vmul.f32 0.044715, %v1230_v58  ;;  %v1121_v21 = vadd.f32 %v1120_v28, %v1102_v56  ;;  %v1171_v29 = vadd.f32 %v1170_v60, %v1152_v40 }
 0x175   : > { %v1902_v1 = vpop.eup %1901  ;;  %v1139_v35 = vpop.f32.mrf.mxu3 }
 0x176   : > { %v1268_v63 = vadd.f32 1.0, %v1902_v1  ;;  %v1246_v2 = vadd.f32 %v1238_v62, %v1138_v49  ;;  %v1140_v3 = vadd.f32 %v1139_v35, %v1121_v21 }
 0x178   : > { %v1276_v5 = vmul.f32 0.5, %v1268_v63  ;;  %v1254_v6 = vmul.f32 0.7978846, %v1246_v2  ;;  %v1224_v9 = vmul.f32 %v1140_v3, %v1140_v3 }
 0x179   : > { %v1153_v41 = vpop.f32.mrf.mxu0 }
 0x17a   : > { %v1284_v48 = vmul.f32 %v1276_v5, %v1135_v31  ;;  %1903 = vtanh.f32 %v1254_v6  ;;  %v1232_v54 = vmul.f32 %v1224_v9, %v1140_v3  ;;  %v1154_v13 = vadd.f32 %v1153_v41, %v2721_v33 }
 0x17b   : > { %v1189_v37 = vpop.f32.mrf.mxu2  ;;  %v1172_v11 = vpop.f32.mrf.mxu1 }
 0x17c   : > { %1292 = vst [vmem:[%s2719_s24 + $0x10] sm:$0xff] %v1284_v48  ;;  %v1240_v17 = vmul.f32 0.044715, %v1232_v54  ;;  %v1190_v10 = vadd.f32 %v1189_v37, %v1171_v29  ;;  %v1173_v55 = vadd.f32 %v1172_v11, %v1154_v13 }
 0x17d   : > { %v1208_v12 = vpop.f32.mrf.mxu3 }
 0x17e   : > { %v1248_v52 = vadd.f32 %v1240_v17, %v1140_v3  ;;  %v1209_v0 = vadd.f32 %v1208_v12, %v1190_v10 }
 0x180   : > { %v1904_v16 = vpop.eup %1903  ;;  %v1256_v38 = vmul.f32 0.7978846, %v1248_v52  ;;  %v1219_v18 = vmul.f32 %v1209_v0, %v1209_v0 }
 0x181   : > { %v1270_v42 = vadd.f32 1.0, %v1904_v16  ;;  %v1156_v24 = vpop.f32.mrf.mxu0 }
 0x182   : > { %1905 = vtanh.f32 %v1256_v38  ;;  %v1227_v19 = vmul.f32 %v1219_v18, %v1209_v0  ;;  %v1157_v31 = vadd.f32 %v1156_v24, %v2721_v33 }
 0x183   : > { %v1278_v20 = vmul.f32 0.5, %v1270_v42  ;;  %v1191_v22 = vpop.f32.mrf.mxu2  ;;  %v1175_v32 = vpop.f32.mrf.mxu1 }
 0x184   : > { %v1235_v23 = vmul.f32 0.044715, %v1227_v19  ;;  %v1192_v26 = vadd.f32 %v1191_v22, %v1173_v55  ;;  %v1176_v53 = vadd.f32 %v1175_v32, %v1157_v31 }
 0x185   : > { %v1286_v27 = vmul.f32 %v1278_v20, %v1138_v49  ;;  %v1210_v59 = vpop.f32.mrf.mxu3 }
 0x186   : > { %v1243_v30 = vadd.f32 %v1235_v23, %v1209_v0  ;;  %v1211_v8 = vadd.f32 %v1210_v59, %v1192_v26 }
 0x187   : > { %1294 = vst [vmem:[%s2719_s24 + $0x20] sm:$0xff] %v1286_v27 }
 0x188   : > { %v1906_v34 = vpop.eup %1905  ;;  %v1251_v4 = vmul.f32 0.7978846, %v1243_v30  ;;  %v1221_v39 = vmul.f32 %v1211_v8, %v1211_v8 }
 0x189   : > { %v1272_v14 = vadd.f32 1.0, %v1906_v34  ;;  %v1158_v25 = vpop.f32.mrf.mxu0 }
 0x18a   : > { %1907 = vtanh.f32 %v1251_v4  ;;  %v1229_v43 = vmul.f32 %v1221_v39, %v1211_v8  ;;  %v1159_v49 = vadd.f32 %v1158_v25, %v2721_v33 }
 0x18b   : > { %v1280_v7 = vmul.f32 0.5, %v1272_v14  ;;  %v1194_v45 = vpop.f32.mrf.mxu2  ;;  %v1177_v58 = vpop.f32.mrf.mxu1 }
 0x18c   : > { %v1237_v36 = vmul.f32 0.044715, %v1229_v43  ;;  %v1195_v61 = vadd.f32 %v1194_v45, %v1176_v53  ;;  %v1178_v60 = vadd.f32 %v1177_v58, %v1159_v49 }
 0x18d   : > { %v1288_v46 = vmul.f32 %v1280_v7, %v1140_v3  ;;  %v1213_v44 = vpop.f32.mrf.mxu3 }
 0x18e   : > { %v1245_v47 = vadd.f32 %v1237_v36, %v1211_v8  ;;  %v1214_v50 = vadd.f32 %v1213_v44, %v1195_v61 }
 0x18f   : > { %1296 = vst [vmem:[%s2719_s24 + $0x30] sm:$0xff] %v1288_v46 }
 0x190   : > { %v1908_v51 = vpop.eup %1907  ;;  %v1253_v57 = vmul.f32 0.7978846, %v1245_v47  ;;  %v1223_v15 = vmul.f32 %v1214_v50, %v1214_v50 }
 0x191   : > { %v1267_v56 = vadd.f32 1.0, %v1908_v51 }
 0x192   : > { %1909 = vtanh.f32 %v1253_v57  ;;  %v1231_v28 = vmul.f32 %v1223_v15, %v1214_v50 }
 0x193   : > { %v1275_v62 = vmul.f32 0.5, %v1267_v56  ;;  %v1196_v21 = vpop.f32.mrf.mxu2 }
 0x194   : > { %v1239_v1 = vmul.f32 0.044715, %v1231_v28  ;;  %v1197_v35 = vadd.f32 %v1196_v21, %v1178_v60 }
 0x195   : > { %v1283_v63 = vmul.f32 %v1275_v62, %v1209_v0  ;;  %v1215_v2 = vpop.f32.mrf.mxu3 }
 0x196   : > { %v1247_v40 = vadd.f32 %v1239_v1, %v1214_v50  ;;  %v1216_v33 = vadd.f32 %v1215_v2, %v1197_v35 }
 0x197   : > { %1291 = vst [vmem:[%s2719_s24 + $0x8] sm:$0xff] %v1283_v63 }
 0x198   : > { %v1910_v3 = vpop.eup %1909  ;;  %v1255_v5 = vmul.f32 0.7978846, %v1247_v40  ;;  %v1225_v6 = vmul.f32 %v1216_v33, %v1216_v33 }
 0x199   : > { %v1269_v9 = vadd.f32 1.0, %v1910_v3 }
 0x19a   : > { %1911 = vtanh.f32 %v1255_v5  ;;  %v1233_v41 = vmul.f32 %v1225_v6, %v1216_v33 }
 0x19b   : > { %v1277_v48 = vmul.f32 0.5, %v1269_v9 }
 0x19c   : > { %v1241_v29 = vmul.f32 0.044715, %v1233_v41 }
 0x19d   : > { %v1285_v54 = vmul.f32 %v1277_v48, %v1211_v8 }
 0x19e   : > { %v1249_v37 = vadd.f32 %v1241_v29, %v1216_v33 }
 0x19f   : > { %1293 = vst [vmem:[%s2719_s24 + $0x18] sm:$0xff] %v1285_v54 }
 0x1a0   : > { %v1912_v17 = vpop.eup %1911  ;;  %v1257_v10 = vmul.f32 0.7978846, %v1249_v37 }
 0x1a1   : > { %v1271_v11 = vadd.f32 1.0, %v1912_v17 }
 0x1a2   : > { %1913 = vtanh.f32 %v1257_v10 }
 0x1a3   : > { %v1279_v12 = vmul.f32 0.5, %v1271_v11 }
 0x1a5   : > { %v1287_v52 = vmul.f32 %v1279_v12, %v1214_v50 }
 0x1a7   : > { %1295 = vst [vmem:[%s2719_s24 + $0x28] sm:$0xff] %v1287_v52 }
 0x1a8   : > { %v1914_v13 = vpop.eup %1913 }
 0x1a9   : > { %v1273_v0 = vadd.f32 1.0, %v1914_v13 }
 0x1ab   : > { %v1281_v16 = vmul.f32 0.5, %v1273_v0 }
 0x1ad   : > { %v1289_v38 = vmul.f32 %v1281_v16, %v1216_v33 }
 0x1af   : > { %1297 = vst [vmem:[%s2719_s24 + $0x38] sm:$0xff] %v1289_v38 }
 0x1b0 PF: > { %s15_s18 = sadd.s32 1, %s1921_s18  }
 0x1b1   : > { %p12_p4 = scmp.ge.s32.totalorder %s15_s18, 4  }
 0x1b3   :  { %14 = sbr.rel (!%p12_p4) target bundleno = 1 (0x1), region = 70 }

// kernel: squeeze.89
= control target key start
LH: loop header
LB: loop body
LE: loop exit
PB: predicated region body
PF: predicated region fallthrough
CT: control target
= control target key end

     0   :  { %s189_s8 = smov 121   ;;  %s190_s9 = smov 93   ;;  %vm18_vm0 = vcmask 56320   ;;  %s242_s0 = inlined_call_operand.vmem [shape: bf16[4,70], index: 0, kind: input, shape index: {}]   ;;  %s243_s1 = inlined_call_operand.vmem [shape: bf16[4,10,7], index: 1, kind: output, shape index: {}]  }
   0x1   :  { %v13_v0 = vld [vmem:[%s242_s0] sm:$0x3]  ;;  %s188_s0 = smov 107   ;;  %s191_s10 = smov 100  }
   0x2   :  { %v14_v1 = vunpack.c.l.bf16 %v13_v0  ;;  %s192_s11 = smov 114   ;;  %s193_s12 = smov 86  }
   0x3   :  { %s194_s13 = smov 72   ;;  %s195_s14 = smov 79  }
   0x4   :  { %16 = vst [vmem:[#allocation1] sm:$0xf] %v14_v1  ;;  %s196_s15 = smov 65  }
   0xb   :  { %v37_v2 = vld [vmem:[#allocation1] sm:$0xf]  }
   0xc   :  { %v21_v3 = vld [vmem:[#allocation1] sm:$0xf]   ;;  %38 = vrot.lane.b32.xlu1 %v37_v2, %s188_s0 }
   0xd   :  { %22 = vrot.lane.b32.xlu0 %v21_v3, %s189_s8  ;;  %v53_v4 = vld [vmem:[#allocation1] sm:$0xf]  }
   0xe   :  { %54 = vrot.lane.b32.xlu2 %v53_v4, %s190_s9  ;;  %v45_v5 = vld [vmem:[#allocation1] sm:$0xf]  }
   0xf   :  { %v29_v6 = vld [vmem:[#allocation1] sm:$0xf]  }
  0x10   :  { %v61_v7 = vld [vmem:[#allocation1] sm:$0xf]  }
  0x11   :  { %v77_v8 = vld [vmem:[#allocation1] sm:$0xf]  }
  0x12   :  { %v69_v9 = vld [vmem:[#allocation1] sm:$0xf]  }
  0x13   :  { %v85_v10 = vld [vmem:[#allocation1] sm:$0xf]  }
  0x14   :  { %46 = vrot.lane.b32.xlu1 %v45_v5, %s191_s10  ;;  %v17_v12 = vld [vmem:[#allocation1] sm:$0xf]  }
  0x15   :  { %30 = vrot.lane.b32.xlu0 %v29_v6, %s192_s11  ;;  %19 = vst.msk [vmem:[#allocation0] ss:$16 sm:$0x3] %vm18_vm0, %v17_v12  }
  0x16   :  { %62 = vrot.lane.b32.xlu2 %v61_v7, %s193_s12  ;;  %20 = vst.msk [vmem:[#allocation0] ss:$16 sm:$0xc] %vm18_vm0, %v17_v12  }
  0x1c   :  { %78 = vrot.lane.b32.xlu1 %v77_v8, %s194_s13 }
  0x1d   :  { %70 = vrot.lane.b32.xlu0 %v69_v9, %s195_s14 }
  0x1e   :  { %86 = vrot.lane.b32.xlu2 %v85_v10, %s196_s15 }
  0x68   :  { %v55_v11 = vpop.permute.xlu2 %54  }
  0x69   :  { %58 = vst.msk [vmem:[#allocation0 + $0x5] ss:$16 sm:$0x3] %vm18_vm0, %v55_v11  }
  0x6a   :  { %60 = vst.msk [vmem:[#allocation0 + $0x5] ss:$16 sm:$0xc] %vm18_vm0, %v55_v11  }
  0x70   :  { %v63_v13 = vpop.permute.xlu2 %62  }
  0x71   :  { %66 = vst.msk [vmem:[#allocation0 + $0x6] ss:$16 sm:$0x3] %vm18_vm0, %v63_v13  }
  0x72   :  { %68 = vst.msk [vmem:[#allocation0 + $0x6] ss:$16 sm:$0xc] %vm18_vm0, %v63_v13  }
  0x78   :  { %v87_v14 = vpop.permute.xlu2 %86  }
  0x79   :  { %90 = vst.msk [vmem:[#allocation0 + $0x9] ss:$16 sm:$0x3] %vm18_vm0, %v87_v14  }
  0x7a   :  { %92 = vst.msk [vmem:[#allocation0 + $0x9] ss:$16 sm:$0xc] %vm18_vm0, %v87_v14  }
  0x7e   :  { %v39_v15 = vpop.permute.xlu1 %38  }
  0x7f   :  { %v23_v16 = vpop.permute.xlu0 %22   ;;  %42 = vst.msk [vmem:[#allocation0 + $0x3] ss:$16 sm:$0x3] %vm18_vm0, %v39_v15  }
  0x80   :  { %44 = vst.msk [vmem:[#allocation0 + $0x3] ss:$16 sm:$0xc] %vm18_vm0, %v39_v15  }
  0x81   :  { %26 = vst.msk [vmem:[#allocation0 + $0x1] ss:$16 sm:$0x3] %vm18_vm0, %v23_v16  }
  0x82   :  { %28 = vst.msk [vmem:[#allocation0 + $0x1] ss:$16 sm:$0xc] %vm18_vm0, %v23_v16  }
  0x86   :  { %v47_v17 = vpop.permute.xlu1 %46  }
  0x87   :  { %v31_v18 = vpop.permute.xlu0 %30   ;;  %50 = vst.msk [vmem:[#allocation0 + $0x4] ss:$16 sm:$0x3] %vm18_vm0, %v47_v17  }
  0x88   :  { %52 = vst.msk [vmem:[#allocation0 + $0x4] ss:$16 sm:$0xc] %vm18_vm0, %v47_v17  }
  0x89   :  { %34 = vst.msk [vmem:[#allocation0 + $0x2] ss:$16 sm:$0x3] %vm18_vm0, %v31_v18  }
  0x8a   :  { %36 = vst.msk [vmem:[#allocation0 + $0x2] ss:$16 sm:$0xc] %vm18_vm0, %v31_v18  }
  0x8e   :  { %v79_v19 = vpop.permute.xlu1 %78  }
  0x8f   :  { %v71_v20 = vpop.permute.xlu0 %70   ;;  %82 = vst.msk [vmem:[#allocation0 + $0x8] ss:$16 sm:$0x3] %vm18_vm0, %v79_v19  }
  0x90   :  { %84 = vst.msk [vmem:[#allocation0 + $0x8] ss:$16 sm:$0xc] %vm18_vm0, %v79_v19  }
  0x91   :  { %74 = vst.msk [vmem:[#allocation0 + $0x7] ss:$16 sm:$0x3] %vm18_vm0, %v71_v20  }
  0x92   :  { %76 = vst.msk [vmem:[#allocation0 + $0x7] ss:$16 sm:$0xc] %vm18_vm0, %v71_v20  }
  0x96   :  { %v101_v21 = vld [vmem:[#allocation0 + $0x8] sm:$0xff]  ;;  %v115_v22 = vld [vmem:[#allocation0 + $0x18] sm:$0xff] }
  0x97   :  { %v129_v23 = vld [vmem:[#allocation0 + $0x28] sm:$0xff]  ;;  %v143_v24 = vld [vmem:[#allocation0 + $0x38] sm:$0xff] }
  0x98   :  { %v95_v25 = vld [vmem:[#allocation0] sm:$0xff]  ;;  %v108_v26 = vld [vmem:[#allocation0 + $0x10] sm:$0xff] }
  0x99   :  { %v159_v27 = vpack.c.bf16 %v101_v21, %v95_v25  ;;  %v164_v28 = vpack.c.bf16 %v115_v22, %v108_v26  ;;  %v122_v29 = vld [vmem:[#allocation0 + $0x20] sm:$0xff]  ;;  %v136_v30 = vld [vmem:[#allocation0 + $0x30] sm:$0xff] }
  0x9a   :  { %v169_v31 = vpack.c.bf16 %v129_v23, %v122_v29  ;;  %v174_v32 = vpack.c.bf16 %v143_v24, %v136_v30 }
  0x9b   :  { %160 = vst [vmem:[%s243_s1] sm:$0xff] %v159_v27  }
  0x9c   :  { %176 = vst [vmem:[%s243_s1 + $0x8] sm:$0xff] %v164_v28  }
  0x9d   :  { %177 = vst [vmem:[%s243_s1 + $0x10] sm:$0xff] %v169_v31  }
  0x9e   :  { %178 = vst [vmem:[%s243_s1 + $0x18] sm:$0xff] %v174_v32  }

// kernel: multi_period_discriminator_forward.18
= control target key start
LH: loop header
LB: loop body
LE: loop exit
PB: predicated region body
PF: predicated region fallthrough
CT: control target
= control target key end

     0   :  { %s417_s12 = smov 0   ;;  %s450_s0 = inlined_call_operand.vmem [shape: bf16[128,6], index: 0, kind: input, shape index: {}]   ;;  %s451_s1 = inlined_call_operand.vmem [shape: bf16[6,128], index: 1, kind: input, shape index: {}]   ;;  %s452_s2 = inlined_call_operand.vmem [shape: f32[1,128], index: 2, kind: input, shape index: {}]   ;;  %s453_s3 = inlined_call_operand.vmem [shape: f32[128,128], index: 3, kind: output, shape index: {}]  }
   0x1 LB: > { %s342_s13 = sadd.s32 4294967295, %s395_s12   ;;  %p346_p0 = scmp.ge.s32.totalorder %s395_s12, 1  ;;  %s395_s12 = sphi %s417_s12, %s13_s12  }
   0x2   : > { %p138_p1 = scmp.lt.s32.totalorder %s395_s12, 3 }
   0x4   : > { %p139_p2 = pnand %p346_p0, %p138_p1 }
   0x5   : > { %s347_s16 = sshll.u32 (!%p139_p2), %s342_s13, 3 }
   0x6   : > { %142 = sbr.rel (%p139_p2) target bundleno = 164 (0xa4), region = 32  ;;  %p163_p3 = scmp.lt.s32.totalorder (!%p139_p2), %s347_s16, 15 }
   0xb   : > { %v183_v0 = vld [vmem:[%s451_s1] sm:$0x7]  ;;  %vm221_vm0 = vcmask 1042432   ;;  %s455_s16 = smov (!%p163_p3, %s347_s16), 15  ;;  %vm208_vm1 = vcmask 48128  }
   0xc   : > { %v223_v1 = vsel %vm221_vm0, %v183_v0, 0  ;;  %s348_s17 = sshll.u32 %s455_s16, 2  ;;  %v388_v6 = vld [vmem:[%s452_s2] ss:$0 sm:$0xff]  ;;  %s350_s23 = sshll.u32 %s455_s16, 3 }
   0xd   : > { %232 = vmatpush.bf16.msra.mxu0 %v223_v1  ;;  %377 = vmatpush.bf16.msra.mxu1 %v223_v1  ;;  %s166_s20 = scalar_lea.vmem %s450_s0, %s348_s17  ;;  %s437_s26 = scalar_lea.vmem %s453_s3, %s350_s23 }
   0xe   : > { %378 = vmatpush.bf16.msra.mxu2 %v223_v1  ;;  %379 = vmatpush.bf16.msra.mxu3 %v223_v1  ;;  %v373_v2 = vld [vmem:[%s166_s20] sm:$0xff]  ;;  %v374_v3 = vld [vmem:[%s166_s20 + $0x8] sm:$0xff]  ;;  %v375_v4 = vld [vmem:[%s166_s20 + $0x10] sm:$0xff] }
   0xf   : > { %v376_v5 = vld [vmem:[%s166_s20 + $0x18] sm:$0xff] }
  0x10   : > { %367 = vmatmul.msk.bf16.vlgmr.msra.gmra.mxu0 %vm208_vm1, %v373_v2  ;;  %368 = vmatmul.msk.bf16.vlgmr.msra.gmra.mxu1 %vm208_vm1, %v374_v3 }
  0x11   : > { %369 = vmatmul.msk.bf16.vlgmr.msra.gmra.mxu2 %vm208_vm1, %v375_v4  ;;  %370 = vmatmul.msk.bf16.vlgmr.msra.gmra.mxu3 %vm208_vm1, %v376_v5 }
  0x8d   : > { %v234_v7 = vpop.f32.mrf.mxu0  ;;  %v239_v8 = vpop.f32.mrf.mxu1 }
  0x8e   : > { %v235_v9 = vadd.f32 %v388_v6, %v234_v7  ;;  %v240_v10 = vadd.f32 %v388_v6, %v239_v8 }
  0x90   : > { %vm254_vm2 = vcmp.ge.f32.partialorder %v235_v9, 0.0  ;;  %v262_v11 = vmul.f32 0.1, %v235_v9  ;;  %vm256_vm3 = vcmp.ge.f32.partialorder %v240_v10, 0.0  ;;  %v264_v12 = vmul.f32 0.1, %v240_v10 }
  0x92   : > { %v270_v13 = vsel %vm254_vm2, %v235_v9, %v262_v11  ;;  %v272_v14 = vsel %vm256_vm3, %v240_v10, %v264_v12 }
  0x93   : > { %278 = vst [vmem:[%s437_s26] sm:$0xff] %v270_v13 }
  0x94   : > { %280 = vst [vmem:[%s437_s26 + $0x10] sm:$0xff] %v272_v14  ;;  %v244_v15 = vpop.f32.mrf.mxu2  ;;  %v249_v16 = vpop.f32.mrf.mxu3 }
  0x95   : > { %v245_v17 = vadd.f32 %v388_v6, %v244_v15  ;;  %v250_v18 = vadd.f32 %v388_v6, %v249_v16  ;;  %v236_v19 = vpop.f32.mrf.mxu0  ;;  %v241_v20 = vpop.f32.mrf.mxu1 }
  0x96   : > { %v237_v21 = vadd.f32 %v388_v6, %v236_v19  ;;  %v242_v22 = vadd.f32 %v388_v6, %v241_v20 }
  0x97   : > { %vm258_vm4 = vcmp.ge.f32.partialorder %v245_v17, 0.0  ;;  %v266_v23 = vmul.f32 0.1, %v245_v17  ;;  %vm260_vm5 = vcmp.ge.f32.partialorder %v250_v18, 0.0  ;;  %v268_v24 = vmul.f32 0.1, %v250_v18 }
  0x98   : > { %vm255_vm6 = vcmp.ge.f32.partialorder %v237_v21, 0.0  ;;  %v263_v25 = vmul.f32 0.1, %v237_v21  ;;  %vm257_vm7 = vcmp.ge.f32.partialorder %v242_v22, 0.0  ;;  %v265_v26 = vmul.f32 0.1, %v242_v22 }
  0x99   : > { %v274_v27 = vsel %vm258_vm4, %v245_v17, %v266_v23  ;;  %v276_v28 = vsel %vm260_vm5, %v250_v18, %v268_v24 }
  0x9a   : > { %282 = vst [vmem:[%s437_s26 + $0x20] sm:$0xff] %v274_v27  ;;  %v271_v29 = vsel %vm255_vm6, %v237_v21, %v263_v25  ;;  %v273_v30 = vsel %vm257_vm7, %v242_v22, %v265_v26 }
  0x9b   : > { %284 = vst [vmem:[%s437_s26 + $0x30] sm:$0xff] %v276_v28 }
  0x9c   : > { %279 = vst [vmem:[%s437_s26 + $0x8] sm:$0xff] %v271_v29  ;;  %v246_v31 = vpop.f32.mrf.mxu2  ;;  %v251_v32 = vpop.f32.mrf.mxu3 }
  0x9d   : > { %281 = vst [vmem:[%s437_s26 + $0x18] sm:$0xff] %v273_v30  ;;  %v247_v33 = vadd.f32 %v388_v6, %v246_v31  ;;  %v252_v34 = vadd.f32 %v388_v6, %v251_v32 }
  0x9f   : > { %vm259_vm8 = vcmp.ge.f32.partialorder %v247_v33, 0.0  ;;  %v267_v35 = vmul.f32 0.1, %v247_v33  ;;  %vm261_vm9 = vcmp.ge.f32.partialorder %v252_v34, 0.0  ;;  %v269_v36 = vmul.f32 0.1, %v252_v34 }
  0xa1   : > { %v275_v37 = vsel %vm259_vm8, %v247_v33, %v267_v35  ;;  %v277_v38 = vsel %vm261_vm9, %v252_v34, %v269_v36 }
  0xa2   : > { %283 = vst [vmem:[%s437_s26 + $0x28] sm:$0xff] %v275_v37 }
  0xa3   : > { %285 = vst [vmem:[%s437_s26 + $0x38] sm:$0xff] %v277_v38 }
  0xa4 PF: > { %s13_s12 = sadd.s32 1, %s395_s12  }
  0xa5   : > { %p10_p4 = scmp.ge.s32.totalorder %s13_s12, 4  }
  0xa7   :  { %12 = sbr.rel (!%p10_p4) target bundleno = 1 (0x1), region = 62 }

// kernel: squeeze.98
= control target key start
LH: loop header
LB: loop body
LE: loop exit
PB: predicated region body
PF: predicated region fallthrough
CT: control target
= control target key end

     0   :  { %s87_s8 = smov 117   ;;  %s88_s9 = smov 73   ;;  %vm7_vm0 = vcmask 89088   ;;  %s110_s0 = inlined_call_operand.vmem [shape: f32[4,66], index: 0, kind: input, shape index: {}]   ;;  %s111_s1 = inlined_call_operand.vmem [shape: bf16[4,6,11], index: 1, kind: output, shape index: {}]  }
   0x1   :  { %v4_v0 = vld [vmem:[%s110_s0] sm:$0xf]  ;;  %s86_s0 = smov 95   ;;  %s89_s10 = smov 84  }
   0x2   :  { %5 = vst [vmem:[#allocation1] sm:$0xf] %v4_v0  ;;  %s90_s11 = smov 106  }
   0x9   :  { %v21_v1 = vld [vmem:[#allocation1] sm:$0xf]  }
   0xa   :  { %v9_v2 = vld [vmem:[#allocation1] sm:$0xf]   ;;  %22 = vrot.lane.b32.xlu1 %v21_v1, %s86_s0 }
   0xb   :  { %10 = vrot.lane.b32.xlu0 %v9_v2, %s87_s8  ;;  %v33_v3 = vld [vmem:[#allocation1] sm:$0xf]  }
   0xc   :  { %34 = vrot.lane.b32.xlu2 %v33_v3, %s88_s9  ;;  %v27_v4 = vld [vmem:[#allocation1] sm:$0xf]  }
   0xd   :  { %v15_v5 = vld [vmem:[#allocation1] sm:$0xf]  }
   0xe   :  { %v6_v6 = vld [vmem:[#allocation1] sm:$0xf]  }
   0xf   :  { %8 = vst.msk [vmem:[#allocation0] ss:$8 sm:$0xf] %vm7_vm0, %v6_v6  }
  0x12   :  { %28 = vrot.lane.b32.xlu1 %v27_v4, %s89_s10 }
  0x13   :  { %16 = vrot.lane.b32.xlu0 %v15_v5, %s90_s11 }
  0x66   :  { %v35_v7 = vpop.permute.xlu2 %34  }
  0x67   :  { %38 = vst.msk [vmem:[#allocation0 + $0x5] ss:$8 sm:$0xf] %vm7_vm0, %v35_v7  }
  0x7c   :  { %v23_v8 = vpop.permute.xlu1 %22  }
  0x7d   :  { %v11_v9 = vpop.permute.xlu0 %10   ;;  %26 = vst.msk [vmem:[#allocation0 + $0x3] ss:$8 sm:$0xf] %vm7_vm0, %v23_v8  }
  0x7e   :  { %14 = vst.msk [vmem:[#allocation0 + $0x1] ss:$8 sm:$0xf] %vm7_vm0, %v11_v9  }
  0x84   :  { %v29_v10 = vpop.permute.xlu1 %28  }
  0x85   :  { %v17_v11 = vpop.permute.xlu0 %16   ;;  %32 = vst.msk [vmem:[#allocation0 + $0x4] ss:$8 sm:$0xf] %vm7_vm0, %v29_v10  }
  0x86   :  { %20 = vst.msk [vmem:[#allocation0 + $0x2] ss:$8 sm:$0xf] %vm7_vm0, %v17_v11  }
  0x8d   :  { %v41_v12 = vld [vmem:[#allocation0] sm:$0xff]  ;;  %v47_v13 = vld [vmem:[#allocation0 + $0x8] sm:$0xff]  ;;  %v54_v14 = vld [vmem:[#allocation0 + $0x10] sm:$0xff] }
  0x8e   :  { %v73_v15 = vpack.c.bf16 %v47_v13, %v41_v12  ;;  %v61_v16 = vld [vmem:[#allocation0 + $0x18] sm:$0xff] }
  0x8f   :  { %v78_v17 = vpack.c.bf16 %v61_v16, %v54_v14 }
  0x90   :  { %74 = vst [vmem:[%s111_s1] sm:$0xff] %v73_v15  }
  0x91   :  { %80 = vst [vmem:[%s111_s1 + $0x8] sm:$0xff] %v78_v17  }

// kernel: multi_period_discriminator_forward.32
= control target key start
LH: loop header
LB: loop body
LE: loop exit
PB: predicated region body
PF: predicated region fallthrough
CT: control target
= control target key end

     0   :  { %s579_s12 = smov 0   ;;  %s654_s0 = inlined_call_operand.vmem [shape: bf16[48,256], index: 0, kind: input, shape index: {}]   ;;  %s655_s1 = inlined_call_operand.vmem [shape: bf16[256,3], index: 1, kind: input, shape index: {}]   ;;  %s656_s2 = inlined_call_operand.vmem [shape: f32[1,3], index: 2, kind: input, shape index: {}]   ;;  %s657_s3 = inlined_call_operand.vmem [shape: f32[48,3], index: 3, kind: output, shape index: {}]  }
   0x1 LB: > { %s425_s13 = sadd.s32 4294967295, %s557_s12   ;;  %p429_p0 = scmp.ge.s32.totalorder %s557_s12, 1  ;;  %s557_s12 = sphi %s579_s12, %s13_s12  }
   0x2   : > { %p139_p1 = scmp.lt.s32.totalorder %s557_s12, 3 }
   0x4   : > { %p140_p2 = pnand %p429_p0, %p139_p1 }
   0x5   : > { %s164_s22 = smul.u32 (!%p140_p2), 3, %s425_s13 }
   0x6   : > { %143 = sbr.rel (%p140_p2) target bundleno = 184 (0xb8), region = 32 }
   0x7   : > { %p165_p3 = scmp.lt.s32.totalorder (!%p140_p2), %s164_s22, 5 }
   0xb   : > { %v517_v0 = vld [vmem:[%s655_s1 + $0x38] sm:$0xff]  ;;  %v516_v2 = vld [vmem:[%s655_s1 + $0x30] sm:$0xff]  ;;  %v515_v4 = vld [vmem:[%s655_s1 + $0x28] sm:$0xff]  ;;  %s659_s22 = smov (!%p165_p3, %s164_s22), 5  ;;  %vm365_vm0 = vcmask 23552  }
   0xc   : > { %v525_v1 = vld [vmem:[%s655_s1 + $0x78] sm:$0xff]  ;;  %329 = vmatpush.bf16.msra.mxu0 %v517_v0  ;;  %526 = vmatpush.bf16.msra.mxu2 %v517_v0  ;;  %v524_v3 = vld [vmem:[%s655_s1 + $0x70] sm:$0xff]  ;;  %v523_v5 = vld [vmem:[%s655_s1 + $0x68] sm:$0xff]  ;;  %s507_s8 = sshll.u32 %s659_s22, 3 }
   0xd   : > { %347 = vmatpush.bf16.msra.mxu1 %v525_v1  ;;  %534 = vmatpush.bf16.msra.mxu3 %v525_v1  ;;  %v514_v6 = vld [vmem:[%s655_s1 + $0x20] sm:$0xff]  ;;  %v513_v8 = vld [vmem:[%s655_s1 + $0x18] sm:$0xff]  ;;  %v512_v10 = vld [vmem:[%s655_s1 + $0x10] sm:$0xff]  ;;  %s169_s16 = scalar_lea.vmem %s654_s0, %s507_s8  ;;  %s175_s30 = scalar_lea.vmem %s657_s3, %s507_s8 }
   0xe   : > { %v522_v7 = vld [vmem:[%s655_s1 + $0x60] sm:$0xff]  ;;  %v521_v9 = vld [vmem:[%s655_s1 + $0x58] sm:$0xff]  ;;  %v520_v11 = vld [vmem:[%s655_s1 + $0x50] sm:$0xff] }
   0xf   : > { %v511_v12 = vld [vmem:[%s655_s1 + $0x8] sm:$0xff]  ;;  %v179_v13 = vld [vmem:[%s169_s16 + $0x10] sm:$0xff]  ;;  %v510_v16 = vld [vmem:[%s655_s1] sm:$0xff] }
  0x10   : > { %330 = vmatpush.bf16.msra.mxu0 %v516_v2  ;;  %527 = vmatpush.bf16.msra.mxu2 %v516_v2  ;;  %v519_v14 = vld [vmem:[%s655_s1 + $0x48] sm:$0xff]  ;;  %v223_v15 = vunpack.c.l.b16 %v179_v13  ;;  %v435_v17 = vld [vmem:[%s169_s16] sm:$0xf]  ;;  %v224_v19 = vunpack.c.h.b16 %v179_v13  ;;  %v508_v21 = vld [vmem:[%s169_s16 + $0x4] sm:$0xf] }
  0x11   : > { %348 = vmatpush.bf16.msra.mxu1 %v524_v3  ;;  %535 = vmatpush.bf16.msra.mxu3 %v524_v3  ;;  %v509_v18 = vld [vmem:[%s169_s16 + $0x4] sm:$0xf0]  ;;  %v518_v20 = vld [vmem:[%s655_s1 + $0x40] sm:$0xff]  ;;  %v437_v22 = vld [vmem:[%s169_s16 + $0x8] sm:$0xf0] }
  0x12   : > { %v436_v23 = vor.u32 %v509_v18, %v435_v17  ;;  %v227_v24 = vpack.c.b16 %v223_v15, %v223_v15  ;;  %v440_v25 = vor.u32 %v508_v21, %v437_v22  ;;  %v228_v26 = vpack.c.b16 %v224_v19, %v224_v19  ;;  %v550_v27 = vld [vmem:[%s656_s2] ss:$0 sm:$0xff] }
  0x14   : > { %331 = vmatpush.bf16.msra.mxu0 %v515_v4  ;;  %528 = vmatpush.bf16.msra.mxu2 %v515_v4 }
  0x15   : > { %349 = vmatpush.bf16.msra.mxu1 %v523_v5  ;;  %536 = vmatpush.bf16.msra.mxu3 %v523_v5 }
  0x18   : > { %332 = vmatpush.bf16.msra.mxu0 %v514_v6  ;;  %529 = vmatpush.bf16.msra.mxu2 %v514_v6 }
  0x19   : > { %350 = vmatpush.bf16.msra.mxu1 %v522_v7  ;;  %537 = vmatpush.bf16.msra.mxu3 %v522_v7 }
  0x1c   : > { %333 = vmatpush.bf16.msra.mxu0 %v513_v8  ;;  %530 = vmatpush.bf16.msra.mxu2 %v513_v8 }
  0x1d   : > { %351 = vmatpush.bf16.msra.mxu1 %v521_v9  ;;  %538 = vmatpush.bf16.msra.mxu3 %v521_v9 }
  0x20   : > { %334 = vmatpush.bf16.msra.mxu0 %v512_v10  ;;  %531 = vmatpush.bf16.msra.mxu2 %v512_v10 }
  0x21   : > { %352 = vmatpush.bf16.msra.mxu1 %v520_v11  ;;  %539 = vmatpush.bf16.msra.mxu3 %v520_v11 }
  0x24   : > { %335 = vmatpush.bf16.msra.mxu0 %v511_v12  ;;  %532 = vmatpush.bf16.msra.mxu2 %v511_v12 }
  0x25   : > { %353 = vmatpush.bf16.msra.mxu1 %v519_v14  ;;  %540 = vmatpush.bf16.msra.mxu3 %v519_v14 }
  0x28   : > { %336 = vmatpush.bf16.msra.mxu0 %v510_v16  ;;  %533 = vmatpush.bf16.msra.mxu2 %v510_v16 }
  0x29   : > { %354 = vmatpush.bf16.msra.mxu1 %v518_v20  ;;  %541 = vmatpush.bf16.msra.mxu3 %v518_v20 }
  0x2b   : > { %337 = vmatmul.bf16.vlgmr.msra.gmra.mxu0 %v436_v23  ;;  %342 = vmatmul.bf16.vlgmr.msra.gmra.mxu2 %v227_v24 }
  0x2c   : > { %355 = vmatmul.bf16.vlgmr.msra.gmra.mxu1 %v440_v25  ;;  %360 = vmatmul.bf16.vlgmr.msra.gmra.mxu3 %v228_v26 }
  0xa8   : > { %v338_v28 = vpop.f32.mrf.mxu0 }
  0xa9   : > { %v339_v29 = vadd.f32 %v550_v27, %v338_v28  ;;  %v356_v30 = vpop.f32.mrf.mxu1 }
  0xab   : > { %v357_v31 = vadd.f32 %v356_v30, %v339_v29 }
  0xad   : > { %366 = vst.msk [vmem:[%s175_s30] sm:$0xff] %vm365_vm0, %v357_v31 }
  0xae   : > { %v343_v32 = vpop.f32.mrf.mxu2 }
  0xaf   : > { %v344_v33 = vadd.f32 %v550_v27, %v343_v32  ;;  %v361_v34 = vpop.f32.mrf.mxu3 }
  0xb0   : > { %v340_v35 = vpop.f32.mrf.mxu0 }
  0xb1   : > { %v362_v36 = vadd.f32 %v361_v34, %v344_v33  ;;  %v341_v37 = vadd.f32 %v550_v27, %v340_v35  ;;  %v358_v38 = vpop.f32.mrf.mxu1 }
  0xb3   : > { %368 = vst.msk [vmem:[%s175_s30 + $0x10] sm:$0xff] %vm365_vm0, %v362_v36  ;;  %v359_v39 = vadd.f32 %v358_v38, %v341_v37 }
  0xb5   : > { %367 = vst.msk [vmem:[%s175_s30 + $0x8] sm:$0xff] %vm365_vm0, %v359_v39 }
  0xb6   : > { %v345_v40 = vpop.f32.mrf.mxu2 }
  0xb7   : > { %v363_v41 = vpop.f32.mrf.mxu3 }
  0xb8 PF: > { %s13_s12 = sadd.s32 1, %s557_s12  }
  0xb9   : > { %p10_p4 = scmp.ge.s32.totalorder %s13_s12, 4  }
  0xbb   :  { %12 = sbr.rel (!%p10_p4) target bundleno = 1 (0x1), region = 62 }

// kernel: squeeze.106
= control target key start
LH: loop header
LB: loop body
LE: loop exit
PB: predicated region body
PF: predicated region fallthrough
CT: control target
= control target key end

     0   :  { %s73_s8 = smov 77   ;;  %s74_s9 = smov 94   ;;  %vm18_vm0 = vcmask 138240   ;;  %s100_s0 = inlined_call_operand.vmem [shape: bf16[4,68], index: 0, kind: input, shape index: {}]   ;;  %s101_s1 = inlined_call_operand.vmem [shape: bf16[4,4,17], index: 1, kind: output, shape index: {}]  }
   0x1   :  { %v13_v0 = vld [vmem:[%s100_s0] sm:$0x3]  ;;  %s72_s0 = smov 111  }
   0x2   :  { %v14_v1 = vunpack.c.l.bf16 %v13_v0 }
   0x4   :  { %16 = vst [vmem:[#allocation1] sm:$0xf] %v14_v1 }
   0xb   :  { %v20_v2 = vld [vmem:[#allocation1] sm:$0xf]  }
   0xc   :  { %v32_v3 = vld [vmem:[#allocation1] sm:$0xf]   ;;  %21 = vrot.lane.b32.xlu0 %v20_v2, %s72_s0 }
   0xd   :  { %33 = vrot.lane.b32.xlu1 %v32_v3, %s73_s8  ;;  %v26_v4 = vld [vmem:[#allocation1] sm:$0xf]  }
   0xe   :  { %v17_v5 = vld [vmem:[#allocation1] sm:$0xf]  }
   0xf   :  { %19 = vst.msk [vmem:[#allocation0] ss:$8 sm:$0xf] %vm18_vm0, %v17_v5  }
  0x14   :  { %27 = vrot.lane.b32.xlu0 %v26_v4, %s74_s9 }
  0x7e   :  { %v22_v6 = vpop.permute.xlu0 %21  }
  0x7f   :  { %v34_v7 = vpop.permute.xlu1 %33   ;;  %25 = vst.msk [vmem:[#allocation0 + $0x1] ss:$8 sm:$0xf] %vm18_vm0, %v22_v6  }
  0x80   :  { %37 = vst.msk [vmem:[#allocation0 + $0x3] ss:$8 sm:$0xf] %vm18_vm0, %v34_v7  }
  0x86   :  { %v28_v8 = vpop.permute.xlu0 %27  }
  0x87   :  { %31 = vst.msk [vmem:[#allocation0 + $0x2] ss:$8 sm:$0xf] %vm18_vm0, %v28_v8  }
  0x8e   :  { %v40_v9 = vld [vmem:[#allocation0] sm:$0xf]  ;;  %v46_v10 = vld [vmem:[#allocation0 + $0x8] sm:$0xf]  ;;  %v53_v11 = vld [vmem:[#allocation0 + $0x10] sm:$0xf] }
  0x8f   :  { %v41_v12 = vpack.c.bf16 0.0, %v40_v9  ;;  %v47_v13 = vpack.c.bf16 0.0, %v46_v10  ;;  %v54_v14 = vpack.c.bf16 0.0, %v53_v11  ;;  %v60_v15 = vld [vmem:[#allocation0 + $0x18] sm:$0xf] }
  0x90   :  { %v61_v16 = vpack.c.bf16 0.0, %v60_v15 }
  0x91   :  { %44 = vst [vmem:[%s101_s1] sm:$0x3] %v41_v12 }
  0x92   :  { %66 = vst [vmem:[%s101_s1 + $0x2] sm:$0x3] %v47_v13 }
  0x93   :  { %67 = vst [vmem:[%s101_s1 + $0x4] sm:$0x3] %v54_v14 }
  0x94   :  { %68 = vst [vmem:[%s101_s1 + $0x6] sm:$0x3] %v61_v16 }

// kernel: multi_period_discriminator_forward.31
= control target key start
LH: loop header
LB: loop body
LE: loop exit
PB: predicated region body
PF: predicated region fallthrough
CT: control target
= control target key end

     0   :  { %s1863_s18 = smov 0   ;;  %s2588_s0 = inlined_call_operand.vmem [shape: bf16[48,128], index: 0, kind: input, shape index: {}]   ;;  %s2589_s1 = inlined_call_operand.vmem [shape: bf16[128,512], index: 1, kind: input, shape index: {}]   ;;  %s2590_s2 = inlined_call_operand.vmem [shape: f32[1,512], index: 2, kind: input, shape index: {}]   ;;  %s2591_s3 = inlined_call_operand.vmem [shape: bf16[512,256], index: 3, kind: input, shape index: {}]   ;;  %s2592_s4 = inlined_call_operand.vmem [shape: f32[1,256], index: 4, kind: input, shape index: {}]   ;;  %s2593_s5 = inlined_call_operand.vmem [shape: f32[48,256], index: 5, kind: output, shape index: {}]  }
   0x1 LB: > { %s1285_s19 = sadd.s32 4294967295, %s1831_s18   ;;  %p1289_p0 = scmp.ge.s32.totalorder %s1831_s18, 1  ;;  %s1831_s18 = sphi %s1863_s18, %s15_s18  }
   0x2   : > { %p188_p1 = scmp.lt.s32.totalorder %s1831_s18, 3 }
   0x4   : > { %p189_p2 = pnand %p1289_p0, %p188_p1 }
   0x5   : > { %s217_s11 = smul.u32 (!%p189_p2), 3, %s1285_s19 }
   0x6   : > { %192 = sbr.rel (%p189_p2) target bundleno = 421 (0x1a5), region = 40 }
   0x7   : > { %p218_p3 = scmp.lt.s32.totalorder (!%p189_p2), %s217_s11, 5 }
   0xb   : > { %v1411_v0 = vld [vmem:[%s2589_s1 + $0xe0] sm:$0xf]  ;;  %v1715_v1 = vld [vmem:[%s2589_s1 + $0xec] sm:$0xf0]  ;;  %v1713_v2 = vld [vmem:[%s2589_s1 + $0xe4] sm:$0xf] }
   0xc   : > { %v1412_v3 = vor.u32 %v1715_v1, %v1411_v0  ;;  %v1413_v4 = vld [vmem:[%s2589_s1 + $0xf0] sm:$0xf0]  ;;  %v1419_v5 = vld [vmem:[%s2589_s1 + $0xe8] sm:$0xf]  ;;  %v1716_v6 = vld [vmem:[%s2589_s1 + $0xf4] sm:$0xf0] }
   0xd   : > { %v1416_v7 = vor.u32 %v1713_v2, %v1413_v4  ;;  %v1420_v8 = vor.u32 %v1716_v6, %v1419_v5  ;;  %v1714_v9 = vld [vmem:[%s2589_s1 + $0xec] sm:$0xf]  ;;  %v1421_v10 = vld [vmem:[%s2589_s1 + $0xf8] sm:$0xf0]  ;;  %v1395_v11 = vld [vmem:[%s2589_s1 + $0xc0] sm:$0xf] }
   0xe   : > { %445 = vmatpush.bf16.msra.mxu0 %v1412_v3  ;;  %v1424_v12 = vor.u32 %v1714_v9, %v1421_v10  ;;  %v1711_v13 = vld [vmem:[%s2589_s1 + $0xcc] sm:$0xf0]  ;;  %v1709_v14 = vld [vmem:[%s2589_s1 + $0xc4] sm:$0xf]  ;;  %v1397_v15 = vld [vmem:[%s2589_s1 + $0xd0] sm:$0xf0] }
   0xf   : > { %463 = vmatpush.bf16.msra.mxu1 %v1416_v7  ;;  %481 = vmatpush.bf16.msra.mxu2 %v1420_v8  ;;  %v1396_v16 = vor.u32 %v1711_v13, %v1395_v11  ;;  %v1400_v17 = vor.u32 %v1709_v14, %v1397_v15  ;;  %v1403_v18 = vld [vmem:[%s2589_s1 + $0xc8] sm:$0xf]  ;;  %v1712_v19 = vld [vmem:[%s2589_s1 + $0xd4] sm:$0xf0]  ;;  %v1710_v20 = vld [vmem:[%s2589_s1 + $0xcc] sm:$0xf] }
  0x10   : > { %499 = vmatpush.bf16.msra.mxu3 %v1424_v12  ;;  %v1404_v21 = vor.u32 %v1712_v19, %v1403_v18  ;;  %v1405_v22 = vld [vmem:[%s2589_s1 + $0xd8] sm:$0xf0]  ;;  %v1379_v23 = vld [vmem:[%s2589_s1 + $0xa0] sm:$0xf]  ;;  %v1707_v24 = vld [vmem:[%s2589_s1 + $0xac] sm:$0xf0] }
  0x11   : > { %v1408_v25 = vor.u32 %v1710_v20, %v1405_v22  ;;  %v1705_v26 = vld [vmem:[%s2589_s1 + $0xa4] sm:$0xf]  ;;  %v1381_v27 = vld [vmem:[%s2589_s1 + $0xb0] sm:$0xf0]  ;;  %v1387_v28 = vld [vmem:[%s2589_s1 + $0xa8] sm:$0xf]  ;;  %v1380_v29 = vor.u32 %v1707_v24, %v1379_v23 }
  0x12   : > { %446 = vmatpush.bf16.msra.mxu0 %v1396_v16  ;;  %v1708_v30 = vld [vmem:[%s2589_s1 + $0xb4] sm:$0xf0]  ;;  %v1706_v31 = vld [vmem:[%s2589_s1 + $0xac] sm:$0xf]  ;;  %v1389_v32 = vld [vmem:[%s2589_s1 + $0xb8] sm:$0xf0]  ;;  %v1384_v33 = vor.u32 %v1705_v26, %v1381_v27 }
  0x13   : > { %464 = vmatpush.bf16.msra.mxu1 %v1400_v17  ;;  %482 = vmatpush.bf16.msra.mxu2 %v1404_v21  ;;  %v1388_v34 = vor.u32 %v1708_v30, %v1387_v28  ;;  %v1363_v35 = vld [vmem:[%s2589_s1 + $0x80] sm:$0xf]  ;;  %v1703_v36 = vld [vmem:[%s2589_s1 + $0x8c] sm:$0xf0]  ;;  %v1701_v37 = vld [vmem:[%s2589_s1 + $0x84] sm:$0xf]  ;;  %v1392_v38 = vor.u32 %v1706_v31, %v1389_v32 }
  0x14   : > { %500 = vmatpush.bf16.msra.mxu3 %v1408_v25  ;;  %v1365_v39 = vld [vmem:[%s2589_s1 + $0x90] sm:$0xf0]  ;;  %v1371_v40 = vld [vmem:[%s2589_s1 + $0x88] sm:$0xf]  ;;  %v1704_v41 = vld [vmem:[%s2589_s1 + $0x94] sm:$0xf0]  ;;  %v1364_v44 = vor.u32 %v1703_v36, %v1363_v35 }
  0x15   : > { %v1702_v42 = vld [vmem:[%s2589_s1 + $0x8c] sm:$0xf]  ;;  %v1373_v43 = vld [vmem:[%s2589_s1 + $0x98] sm:$0xf0]  ;;  %v1368_v45 = vor.u32 %v1701_v37, %v1365_v39  ;;  %v1372_v46 = vor.u32 %v1704_v41, %v1371_v40  ;;  %v1347_v47 = vld [vmem:[%s2589_s1 + $0x60] sm:$0xf] }
  0x16   : > { %447 = vmatpush.bf16.msra.mxu0 %v1380_v29  ;;  %v1699_v48 = vld [vmem:[%s2589_s1 + $0x6c] sm:$0xf0]  ;;  %v1697_v49 = vld [vmem:[%s2589_s1 + $0x64] sm:$0xf]  ;;  %v1376_v50 = vor.u32 %v1702_v42, %v1373_v43  ;;  %v1349_v51 = vld [vmem:[%s2589_s1 + $0x70] sm:$0xf0] }
  0x17   : > { %465 = vmatpush.bf16.msra.mxu1 %v1384_v33  ;;  %483 = vmatpush.bf16.msra.mxu2 %v1388_v34  ;;  %v1355_v52 = vld [vmem:[%s2589_s1 + $0x68] sm:$0xf]  ;;  %v1700_v53 = vld [vmem:[%s2589_s1 + $0x74] sm:$0xf0]  ;;  %v1698_v54 = vld [vmem:[%s2589_s1 + $0x6c] sm:$0xf]  ;;  %v1348_v56 = vor.u32 %v1699_v48, %v1347_v47  ;;  %v1352_v57 = vor.u32 %v1697_v49, %v1349_v51 }
  0x18   : > { %501 = vmatpush.bf16.msra.mxu3 %v1392_v38  ;;  %v1357_v55 = vld [vmem:[%s2589_s1 + $0x78] sm:$0xf0]  ;;  %v1356_v58 = vor.u32 %v1700_v53, %v1355_v52  ;;  %v1331_v59 = vld [vmem:[%s2589_s1 + $0x40] sm:$0xf]  ;;  %v1695_v60 = vld [vmem:[%s2589_s1 + $0x4c] sm:$0xf0] }
  0x19   : > { %v1693_v61 = vld [vmem:[%s2589_s1 + $0x44] sm:$0xf]  ;;  %v1360_v62 = vor.u32 %v1698_v54, %v1357_v55  ;;  %v1333_v63 = vld [vmem:[%s2589_s1 + $0x50] sm:$0xf0]  ;;  %v1339_v0 = vld [vmem:[%s2589_s1 + $0x48] sm:$0xf]  ;;  %v1332_v4 = vor.u32 %v1695_v60, %v1331_v59 }
  0x1a   : > { %448 = vmatpush.bf16.msra.mxu0 %v1364_v44  ;;  %v1696_v1 = vld [vmem:[%s2589_s1 + $0x54] sm:$0xf0]  ;;  %v1694_v2 = vld [vmem:[%s2589_s1 + $0x4c] sm:$0xf]  ;;  %v1341_v3 = vld [vmem:[%s2589_s1 + $0x58] sm:$0xf0]  ;;  %v1336_v6 = vor.u32 %v1693_v61, %v1333_v63 }
  0x1b   : > { %466 = vmatpush.bf16.msra.mxu1 %v1368_v45  ;;  %484 = vmatpush.bf16.msra.mxu2 %v1372_v46  ;;  %v1315_v5 = vld [vmem:[%s2589_s1 + $0x20] sm:$0xf]  ;;  %v1340_v7 = vor.u32 %v1696_v1, %v1339_v0  ;;  %v1691_v8 = vld [vmem:[%s2589_s1 + $0x2c] sm:$0xf0]  ;;  %v1689_v9 = vld [vmem:[%s2589_s1 + $0x24] sm:$0xf]  ;;  %v1344_v11 = vor.u32 %v1694_v2, %v1341_v3 }
  0x1c   : > { %502 = vmatpush.bf16.msra.mxu3 %v1376_v50  ;;  %v1317_v10 = vld [vmem:[%s2589_s1 + $0x30] sm:$0xf0]  ;;  %v1323_v12 = vld [vmem:[%s2589_s1 + $0x28] sm:$0xf]  ;;  %v1692_v13 = vld [vmem:[%s2589_s1 + $0x34] sm:$0xf0]  ;;  %v1316_v16 = vor.u32 %v1691_v8, %v1315_v5 }
  0x1d   : > { %v1690_v14 = vld [vmem:[%s2589_s1 + $0x2c] sm:$0xf]  ;;  %v1325_v15 = vld [vmem:[%s2589_s1 + $0x38] sm:$0xf0]  ;;  %v1299_v17 = vld [vmem:[%s2589_s1] sm:$0xf]  ;;  %v1320_v18 = vor.u32 %v1689_v9, %v1317_v10  ;;  %v1324_v19 = vor.u32 %v1692_v13, %v1323_v12 }
  0x1e   : > { %449 = vmatpush.bf16.msra.mxu0 %v1348_v56  ;;  %v1687_v20 = vld [vmem:[%s2589_s1 + $0xc] sm:$0xf0]  ;;  %v1685_v21 = vld [vmem:[%s2589_s1 + $0x4] sm:$0xf]  ;;  %v1301_v22 = vld [vmem:[%s2589_s1 + $0x10] sm:$0xf0]  ;;  %v1328_v23 = vor.u32 %v1690_v14, %v1325_v15 }
  0x1f   : > { %467 = vmatpush.bf16.msra.mxu1 %v1352_v57  ;;  %485 = vmatpush.bf16.msra.mxu2 %v1356_v58  ;;  %v1307_v24 = vld [vmem:[%s2589_s1 + $0x8] sm:$0xf]  ;;  %v1688_v25 = vld [vmem:[%s2589_s1 + $0x14] sm:$0xf0]  ;;  %s2595_s11 = smov (!%p218_p3, %s217_s11), 5  ;;  %v1300_v28 = vor.u32 %v1687_v20, %v1299_v17  ;;  %v1304_v29 = vor.u32 %v1685_v21, %v1301_v22 }
  0x20   : > { %503 = vmatpush.bf16.msra.mxu3 %v1360_v62  ;;  %v1686_v26 = vld [vmem:[%s2589_s1 + $0xc] sm:$0xf]  ;;  %v1309_v27 = vld [vmem:[%s2589_s1 + $0x18] sm:$0xf0]  ;;  %s1290_s8 = sshll.u32 %s2595_s11, 2  ;;  %v1308_v30 = vor.u32 %v1688_v25, %v1307_v24  ;;  %s1683_s21 = sshll.u32 %s2595_s11, 4 }
  0x21   : > { %s221_s12 = scalar_lea.vmem %s2588_s0, %s1290_s8  ;;  %v1312_v31 = vor.u32 %v1686_v26, %v1309_v27  ;;  %v1483_v36 = vld [vmem:[%s2591_s3 + $0x70] sm:$0xf]  ;;  %v1732_v37 = vld [vmem:[%s2591_s3 + $0x74] sm:$0xf0]  ;;  %v1475_v42 = vld [vmem:[%s2591_s3 + $0x60] sm:$0xf]  ;;  %s2577_s24 = scalar_lea.vmem %s2593_s5, %s1683_s21 }
  0x22   : > { %450 = vmatpush.bf16.msra.mxu0 %v1332_v4  ;;  %v1684_v32 = vld [vmem:[%s221_s12] sm:$0xff]  ;;  %v232_v33 = vld [vmem:[%s221_s12 + $0x8] sm:$0xf]  ;;  %v1547_v38 = vld [vmem:[%s2591_s3 + $0xf0] sm:$0xf]  ;;  %v1484_v39 = vor.u32 %v1732_v37, %v1483_v36 }
  0x23   : > { %468 = vmatpush.bf16.msra.mxu1 %v1336_v6  ;;  %486 = vmatpush.bf16.msra.mxu2 %v1340_v7  ;;  %v280_v34 = vunpack.c.l.b16 %v232_v33  ;;  %v1748_v40 = vld [vmem:[%s2591_s3 + $0xf4] sm:$0xf0]  ;;  %v1730_v43 = vld [vmem:[%s2591_s3 + $0x64] sm:$0xf0]  ;;  %v1539_v44 = vld [vmem:[%s2591_s3 + $0xe0] sm:$0xf] }
  0x24   : > { %504 = vmatpush.bf16.msra.mxu3 %v1344_v11  ;;  %v1548_v41 = vor.u32 %v1748_v40, %v1547_v38  ;;  %v1476_v45 = vor.u32 %v1730_v43, %v1475_v42  ;;  %v1746_v46 = vld [vmem:[%s2591_s3 + $0xe4] sm:$0xf0]  ;;  %v1611_v48 = vld [vmem:[%s2591_s3 + $0x170] sm:$0xf]  ;;  %v1764_v49 = vld [vmem:[%s2591_s3 + $0x174] sm:$0xf0] }
  0x25   : > { %v282_v35 = vpack.c.b16 %v280_v34, %v280_v34  ;;  %v1540_v47 = vor.u32 %v1746_v46, %v1539_v44  ;;  %v1675_v50 = vld [vmem:[%s2591_s3 + $0x1f0] sm:$0xf]  ;;  %v1612_v51 = vor.u32 %v1764_v49, %v1611_v48  ;;  %v1780_v52 = vld [vmem:[%s2591_s3 + $0x1f4] sm:$0xf0]  ;;  %v1603_v60 = vld [vmem:[%s2591_s3 + $0x160] sm:$0xf] }
  0x26   : > { %451 = vmatpush.bf16.msra.mxu0 %v1316_v16  ;;  %v1676_v53 = vor.u32 %v1780_v52, %v1675_v50  ;;  %v1467_v54 = vld [vmem:[%s2591_s3 + $0x50] sm:$0xf]  ;;  %v1728_v55 = vld [vmem:[%s2591_s3 + $0x54] sm:$0xf0]  ;;  %v1762_v61 = vld [vmem:[%s2591_s3 + $0x164] sm:$0xf0] }
  0x27   : > { %469 = vmatpush.bf16.msra.mxu1 %v1320_v18  ;;  %487 = vmatpush.bf16.msra.mxu2 %v1324_v19  ;;  %v1531_v56 = vld [vmem:[%s2591_s3 + $0xd0] sm:$0xf]  ;;  %v1468_v57 = vor.u32 %v1728_v55, %v1467_v54  ;;  %v1744_v58 = vld [vmem:[%s2591_s3 + $0xd4] sm:$0xf0]  ;;  %v1667_v62 = vld [vmem:[%s2591_s3 + $0x1e0] sm:$0xf]  ;;  %v1604_v63 = vor.u32 %v1762_v61, %v1603_v60 }
  0x28   : > { %505 = vmatpush.bf16.msra.mxu3 %v1328_v23  ;;  %v1532_v59 = vor.u32 %v1744_v58, %v1531_v56  ;;  %v1778_v0 = vld [vmem:[%s2591_s3 + $0x1e4] sm:$0xf0]  ;;  %v1459_v2 = vld [vmem:[%s2591_s3 + $0x40] sm:$0xf]  ;;  %v1595_v8 = vld [vmem:[%s2591_s3 + $0x150] sm:$0xf] }
  0x29   : > { %v1668_v1 = vor.u32 %v1778_v0, %v1667_v62  ;;  %v1726_v3 = vld [vmem:[%s2591_s3 + $0x44] sm:$0xf0]  ;;  %v1523_v4 = vld [vmem:[%s2591_s3 + $0xc0] sm:$0xf]  ;;  %v1760_v9 = vld [vmem:[%s2591_s3 + $0x154] sm:$0xf0] }
  0x2a   : > { %452 = vmatpush.bf16.msra.mxu0 %v1300_v28  ;;  %v1460_v5 = vor.u32 %v1726_v3, %v1459_v2  ;;  %v1742_v6 = vld [vmem:[%s2591_s3 + $0xc4] sm:$0xf0]  ;;  %v1659_v10 = vld [vmem:[%s2591_s3 + $0x1d0] sm:$0xf]  ;;  %v1596_v11 = vor.u32 %v1760_v9, %v1595_v8  ;;  %v1776_v12 = vld [vmem:[%s2591_s3 + $0x1d4] sm:$0xf0] }
  0x2b   : > { %470 = vmatpush.bf16.msra.mxu1 %v1304_v29  ;;  %488 = vmatpush.bf16.msra.mxu2 %v1308_v30  ;;  %v1524_v7 = vor.u32 %v1742_v6, %v1523_v4  ;;  %v1660_v13 = vor.u32 %v1776_v12, %v1659_v10  ;;  %v1451_v14 = vld [vmem:[%s2591_s3 + $0x30] sm:$0xf]  ;;  %v1724_v15 = vld [vmem:[%s2591_s3 + $0x34] sm:$0xf0]  ;;  %v1587_v20 = vld [vmem:[%s2591_s3 + $0x140] sm:$0xf] }
  0x2c   : > { %506 = vmatpush.bf16.msra.mxu3 %v1312_v31  ;;  %v1515_v16 = vld [vmem:[%s2591_s3 + $0xb0] sm:$0xf]  ;;  %v1452_v17 = vor.u32 %v1724_v15, %v1451_v14  ;;  %v1740_v18 = vld [vmem:[%s2591_s3 + $0xb4] sm:$0xf0]  ;;  %v1758_v21 = vld [vmem:[%s2591_s3 + $0x144] sm:$0xf0] }
  0x2d   : > { %453 = vmatmul.bf16.vlgmr.msra.gmra.mxu0 %v1684_v32  ;;  %v1516_v19 = vor.u32 %v1740_v18, %v1515_v16  ;;  %v1651_v22 = vld [vmem:[%s2591_s3 + $0x1c0] sm:$0xf]  ;;  %v1588_v23 = vor.u32 %v1758_v21, %v1587_v20  ;;  %v1774_v24 = vld [vmem:[%s2591_s3 + $0x1c4] sm:$0xf0]  ;;  %v1579_v33 = vld [vmem:[%s2591_s3 + $0x130] sm:$0xf] }
  0x2e   : > { %471 = vmatmul.bf16.vlgmr.msra.gmra.mxu1 %v1684_v32  ;;  %489 = vmatmul.bf16.vlgmr.msra.gmra.mxu2 %v1684_v32  ;;  %v1652_v25 = vor.u32 %v1774_v24, %v1651_v22  ;;  %v1443_v26 = vld [vmem:[%s2591_s3 + $0x20] sm:$0xf]  ;;  %v1722_v27 = vld [vmem:[%s2591_s3 + $0x24] sm:$0xf0]  ;;  %v1756_v34 = vld [vmem:[%s2591_s3 + $0x134] sm:$0xf0] }
  0x2f   : > { %507 = vmatmul.bf16.vlgmr.msra.gmra.mxu3 %v1684_v32  ;;  %1023 = vmatpush.bf16.msrb.mxu0 %v1484_v39  ;;  %v1507_v28 = vld [vmem:[%s2591_s3 + $0xa0] sm:$0xf]  ;;  %v1444_v30 = vor.u32 %v1722_v27, %v1443_v26  ;;  %v1738_v31 = vld [vmem:[%s2591_s3 + $0xa4] sm:$0xf0]  ;;  %v1580_v36 = vor.u32 %v1756_v34, %v1579_v33  ;;  %v1772_v37 = vld [vmem:[%s2591_s3 + $0x1b4] sm:$0xf0] }
  0x30   : > { %1041 = vmatpush.bf16.msrb.mxu1 %v1548_v41  ;;  %1059 = vmatpush.bf16.msrb.mxu2 %v1612_v51  ;;  %v265_v29 = vld [vmem:[%s2590_s2] sm:$0xf]  ;;  %v1508_v32 = vor.u32 %v1738_v31, %v1507_v28  ;;  %v1435_v39 = vld [vmem:[%s2591_s3 + $0x10] sm:$0xf]  ;;  %v1720_v40 = vld [vmem:[%s2591_s3 + $0x14] sm:$0xf0] }
  0x31   : > { %1077 = vmatpush.bf16.msrb.mxu3 %v1676_v53  ;;  %v1499_v41 = vld [vmem:[%s2591_s3 + $0x90] sm:$0xf]  ;;  %v2215_v42 = vperm.slane %v265_v29, 0  ;;  %v2217_v43 = vperm.slane %v265_v29, 1  ;;  %v1436_v44 = vor.u32 %v1720_v40, %v1435_v39  ;;  %v1754_v48 = vld [vmem:[%s2591_s3 + $0x124] sm:$0xf0] }
  0x32   : > { %v1635_v49 = vld [vmem:[%s2591_s3 + $0x1a0] sm:$0xf]  ;;  %v1770_v51 = vld [vmem:[%s2591_s3 + $0x1a4] sm:$0xf0]  ;;  %v1563_v61 = vld [vmem:[%s2591_s3 + $0x110] sm:$0xf] }
  0x33   : > { %1024 = vmatpush.bf16.msrb.mxu0 %v1476_v45  ;;  %v1736_v45 = vld [vmem:[%s2591_s3 + $0x94] sm:$0xf0]  ;;  %v1636_v53 = vor.u32 %v1770_v51, %v1635_v49  ;;  %v1427_v54 = vld [vmem:[%s2591_s3] sm:$0xf]  ;;  %v1718_v55 = vld [vmem:[%s2591_s3 + $0x4] sm:$0xf0] }
  0x34   : > { %1042 = vmatpush.bf16.msrb.mxu1 %v1540_v47  ;;  %1060 = vmatpush.bf16.msrb.mxu2 %v1604_v63  ;;  %v1500_v46 = vor.u32 %v1736_v45, %v1499_v41  ;;  %v1571_v47 = vld [vmem:[%s2591_s3 + $0x120] sm:$0xf]  ;;  %v1734_v60 = vld [vmem:[%s2591_s3 + $0x84] sm:$0xf0]  ;;  %v1752_v62 = vld [vmem:[%s2591_s3 + $0x114] sm:$0xf0] }
  0x35   : > { %1078 = vmatpush.bf16.msrb.mxu3 %v1668_v1  ;;  %v1572_v50 = vor.u32 %v1754_v48, %v1571_v47  ;;  %v1491_v56 = vld [vmem:[%s2591_s3 + $0x80] sm:$0xf]  ;;  %v1564_v1 = vor.u32 %v1752_v62, %v1563_v61  ;;  %v1627_v2 = vld [vmem:[%s2591_s3 + $0x190] sm:$0xf]  ;;  %v1768_v3 = vld [vmem:[%s2591_s3 + $0x194] sm:$0xf0] }
  0x36   : > { %v1492_v0 = vor.u32 %v1734_v60, %v1491_v56  ;;  %v1628_v6 = vor.u32 %v1768_v3, %v1627_v2  ;;  %v1731_v8 = vld [vmem:[%s2591_s3 + $0x74] sm:$0xf]  ;;  %v1485_v9 = vld [vmem:[%s2591_s3 + $0x78] sm:$0xf0]  ;;  %v2280_v12 = vperm.slane %v265_v29, 3 }
  0x37   : > { %1025 = vmatpush.bf16.msrb.mxu0 %v1468_v57  ;;  %v1747_v10 = vld [vmem:[%s2591_s3 + $0xf4] sm:$0xf]  ;;  %v1549_v14 = vld [vmem:[%s2591_s3 + $0xf8] sm:$0xf0]  ;;  %v1750_v18 = vld [vmem:[%s2591_s3 + $0x104] sm:$0xf0] }
  0x38   : > { %1043 = vmatpush.bf16.msrb.mxu1 %v1532_v59  ;;  %1061 = vmatpush.bf16.msrb.mxu2 %v1596_v11  ;;  %v1428_v59 = vor.u32 %v1718_v55, %v1427_v54  ;;  %v1552_v16 = vor.u32 %v1747_v10, %v1549_v14  ;;  %v1729_v24 = vld [vmem:[%s2591_s3 + $0x64] sm:$0xf]  ;;  %v1613_v45 = vld [vmem:[%s2591_s3 + $0x178] sm:$0xf0]  ;;  %v1727_v56 = vld [vmem:[%s2591_s3 + $0x54] sm:$0xf] }
  0x39   : > { %1079 = vmatpush.bf16.msrb.mxu3 %v1660_v13  ;;  %v1488_v13 = vor.u32 %v1731_v8, %v1485_v9  ;;  %v1745_v31 = vld [vmem:[%s2591_s3 + $0xe4] sm:$0xf]  ;;  %v1677_v51 = vld [vmem:[%s2591_s3 + $0x1f8] sm:$0xf0]  ;;  %v1743_v62 = vld [vmem:[%s2591_s3 + $0xd4] sm:$0xf] }
  0x3b   : > { %1026 = vmatpush.bf16.msrb.mxu0 %v1460_v5  ;;  %v2266_v5 = vperm.slane %v265_v29, 2 }
  0x3c   : > { %1044 = vmatpush.bf16.msrb.mxu1 %v1524_v7  ;;  %1062 = vmatpush.bf16.msrb.mxu2 %v1588_v23  ;;  %v1766_v23 = vld [vmem:[%s2591_s3 + $0x184] sm:$0xf0] }
  0x3d   : > { %458 = vmatmul.bf16.gmra.mxu0 %v282_v35  ;;  %1080 = vmatpush.bf16.msrb.mxu3 %v1652_v25 }
  0x3e   : > { %476 = vmatmul.bf16.gmra.mxu1 %v282_v35  ;;  %494 = vmatmul.bf16.gmra.mxu2 %v282_v35 }
  0x3f   : > { %512 = vmatmul.bf16.gmra.mxu3 %v282_v35  ;;  %1027 = vmatpush.bf16.msrb.mxu0 %v1452_v17  ;;  %v1643_v35 = vld [vmem:[%s2591_s3 + $0x1b0] sm:$0xf]  ;;  %v1555_v17 = vld [vmem:[%s2591_s3 + $0x100] sm:$0xf] }
  0x40   : > { %1045 = vmatpush.bf16.msrb.mxu1 %v1516_v19  ;;  %v1644_v38 = vor.u32 %v1772_v37, %v1643_v35  ;;  %1063 = vmatpush.bf16.msrb.mxu2 %v1580_v36  ;;  %v1619_v19 = vld [vmem:[%s2591_s3 + $0x180] sm:$0xf]  ;;  %v1556_v22 = vor.u32 %v1750_v18, %v1555_v17  ;;  %v1541_v37 = vld [vmem:[%s2591_s3 + $0xe8] sm:$0xf0] }
  0x41   : > { %v1620_v29 = vor.u32 %v1766_v23, %v1619_v19  ;;  %v1544_v41 = vor.u32 %v1745_v31, %v1541_v37 }
  0x42   : > { %1081 = vmatpush.bf16.msrb.mxu3 %v1644_v38 }
  0x43   : > { %1028 = vmatpush.bf16.msrb.mxu0 %v1444_v30  ;;  %v1477_v30 = vld [vmem:[%s2591_s3 + $0x68] sm:$0xf0] }
  0x44   : > { %1046 = vmatpush.bf16.msrb.mxu1 %v1508_v32  ;;  %1064 = vmatpush.bf16.msrb.mxu2 %v1572_v50  ;;  %v1480_v36 = vor.u32 %v1729_v24, %v1477_v30 }
  0x46   : > { %1082 = vmatpush.bf16.msrb.mxu3 %v1636_v53 }
  0x47   : > { %1029 = vmatpush.bf16.msrb.mxu0 %v1436_v44  ;;  %v1763_v44 = vld [vmem:[%s2591_s3 + $0x174] sm:$0xf] }
  0x48   : > { %1047 = vmatpush.bf16.msrb.mxu1 %v1500_v46  ;;  %1065 = vmatpush.bf16.msrb.mxu2 %v1564_v1  ;;  %v1779_v46 = vld [vmem:[%s2591_s3 + $0x1f4] sm:$0xf]  ;;  %v1616_v50 = vor.u32 %v1763_v44, %v1613_v45  ;;  %v1761_v1 = vld [vmem:[%s2591_s3 + $0x164] sm:$0xf] }
  0x49   : > { %v1680_v55 = vor.u32 %v1779_v46, %v1677_v51  ;;  %v1725_v45 = vld [vmem:[%s2591_s3 + $0x44] sm:$0xf]  ;;  %v1461_v46 = vld [vmem:[%s2591_s3 + $0x48] sm:$0xf0] }
  0x4a   : > { %1083 = vmatpush.bf16.msrb.mxu3 %v1628_v6  ;;  %v1605_v6 = vld [vmem:[%s2591_s3 + $0x168] sm:$0xf0] }
  0x4b   : > { %1030 = vmatpush.bf16.msrb.mxu0 %v1428_v59 }
  0x4c   : > { %1048 = vmatpush.bf16.msrb.mxu1 %v1492_v0  ;;  %1066 = vmatpush.bf16.msrb.mxu2 %v1556_v22  ;;  %v1533_v0 = vld [vmem:[%s2591_s3 + $0xd8] sm:$0xf0] }
  0x4e   : > { %1084 = vmatpush.bf16.msrb.mxu3 %v1620_v29 }
  0x4f   : > { %1095 = vmatpush.bf16.msra.mxu0 %v1488_v13  ;;  %v1669_v13 = vld [vmem:[%s2591_s3 + $0x1e8] sm:$0xf0] }
  0x50   : > { %1113 = vmatpush.bf16.msra.mxu1 %v1552_v16  ;;  %1131 = vmatpush.bf16.msra.mxu2 %v1616_v50  ;;  %v1741_v50 = vld [vmem:[%s2591_s3 + $0xc4] sm:$0xf] }
  0x52   : > { %1149 = vmatpush.bf16.msra.mxu3 %v1680_v55 }
  0x53   : > { %1096 = vmatpush.bf16.msra.mxu0 %v1480_v36 }
  0x54   : > { %1114 = vmatpush.bf16.msra.mxu1 %v1544_v41 }
  0xaa   : > { %v454_v52 = vpop.f32.mrf.mxu0 }
  0xab   : > { %v2244_v57 = vadd.f32 %v454_v52, %v2215_v42  ;;  %v472_v58 = vpop.f32.mrf.mxu1 }
  0xac   : > { %v2256_v63 = vadd.f32 %v472_v58, %v2217_v43  ;;  %v1469_v58 = vld [vmem:[%s2591_s3 + $0x58] sm:$0xf0] }
  0xad   : > { %v517_v4 = vmul.f32 %v2244_v57, %v2244_v57  ;;  %v1472_v61 = vor.u32 %v1727_v56, %v1469_v58 }
  0xae   : > { %v518_v7 = vmul.f32 %v2256_v63, %v2256_v63 }
  0xaf   : > { %v529_v11 = vmul.f32 %v517_v4, %v2244_v57  ;;  %v1536_v4 = vor.u32 %v1743_v62, %v1533_v0  ;;  %1097 = vmatpush.bf16.msra.mxu0 %v1472_v61  ;;  %v1597_v62 = vld [vmem:[%s2591_s3 + $0x158] sm:$0xf0] }
  0xb0   : > { %v530_v15 = vmul.f32 %v518_v7, %v2256_v63  ;;  %v1777_v7 = vld [vmem:[%s2591_s3 + $0x1e4] sm:$0xf] }
  0xb1   : > { %v541_v20 = vmul.f32 0.044715, %v529_v11  ;;  %v490_v21 = vpop.f32.mrf.mxu2  ;;  %v1608_v11 = vor.u32 %v1761_v1, %v1605_v6  ;;  %1115 = vmatpush.bf16.msra.mxu1 %v1536_v4  ;;  %v1672_v19 = vor.u32 %v1777_v7, %v1669_v13  ;;  %v1464_v4 = vor.u32 %v1725_v45, %v1461_v46  ;;  %v1661_v6 = vld [vmem:[%s2591_s3 + $0x1d8] sm:$0xf0]  ;;  %v1445_v45 = vld [vmem:[%s2591_s3 + $0x28] sm:$0xf0] }
  0xb2   : > { %v542_v25 = vmul.f32 0.044715, %v530_v15  ;;  %v2302_v26 = vadd.f32 %v490_v21, %v2266_v5  ;;  %v508_v27 = vpop.f32.mrf.mxu3  ;;  %v456_v28 = vpop.f32.mrf.mxu0  ;;  %v1737_v46 = vld [vmem:[%s2591_s3 + $0xa4] sm:$0xf] }
  0xb3   : > { %v553_v32 = vadd.f32 %v541_v20, %v2244_v57  ;;  %v2312_v33 = vadd.f32 %v508_v27, %v2280_v12  ;;  %v2315_v34 = vadd.f32 %v456_v28, %v2215_v42  ;;  %v474_v35 = vpop.f32.mrf.mxu1  ;;  %1132 = vmatpush.bf16.msra.mxu2 %v1608_v11  ;;  %1150 = vmatpush.bf16.msra.mxu3 %v1672_v19  ;;  %v1453_v19 = vld [vmem:[%s2591_s3 + $0x38] sm:$0xf0] }
  0xb4   : > { %v554_v38 = vadd.f32 %v542_v25, %v2256_v63  ;;  %v519_v39 = vmul.f32 %v2302_v26, %v2302_v26  ;;  %v2324_v40 = vadd.f32 %v474_v35, %v2217_v43  ;;  %1098 = vmatpush.bf16.msra.mxu0 %v1464_v4 }
  0xb5   : > { %v565_v47 = vmul.f32 0.7978846, %v553_v32  ;;  %v520_v48 = vmul.f32 %v2312_v33, %v2312_v33  ;;  %v521_v49 = vmul.f32 %v2315_v34, %v2315_v34 }
  0xb6   : > { %v566_v52 = vmul.f32 0.7978846, %v554_v38  ;;  %v531_v53 = vmul.f32 %v519_v39, %v2302_v26  ;;  %v522_v54 = vmul.f32 %v2324_v40, %v2324_v40 }
  0xb7   : > { %1789 = vtanh.f32 %v565_v47  ;;  %v532_v59 = vmul.f32 %v520_v48, %v2312_v33  ;;  %v533_v60 = vmul.f32 %v521_v49, %v2315_v34 }
  0xb8   : > { %1791 = vtanh.f32 %v566_v52  ;;  %v543_v2 = vmul.f32 0.044715, %v531_v53  ;;  %v534_v3 = vmul.f32 %v522_v54, %v2324_v40  ;;  %v1525_v53 = vld [vmem:[%s2591_s3 + $0xc8] sm:$0xf0]  ;;  %v1759_v54 = vld [vmem:[%s2591_s3 + $0x154] sm:$0xf] }
  0xb9   : > { %v544_v8 = vmul.f32 0.044715, %v532_v59  ;;  %v545_v9 = vmul.f32 0.044715, %v533_v60  ;;  %v492_v10 = vpop.f32.mrf.mxu2  ;;  %v1528_v11 = vor.u32 %v1741_v50, %v1525_v53 }
  0xba   : > { %v555_v14 = vadd.f32 %v543_v2, %v2302_v26  ;;  %v546_v15 = vmul.f32 0.044715, %v534_v3  ;;  %v2374_v16 = vadd.f32 %v492_v10, %v2266_v5  ;;  %v510_v17 = vpop.f32.mrf.mxu3  ;;  %v459_v18 = vpop.f32.mrf.mxu0 }
  0xbb   : > { %v556_v20 = vadd.f32 %v544_v8, %v2312_v33  ;;  %v557_v21 = vadd.f32 %v545_v9, %v2315_v34  ;;  %v2379_v22 = vadd.f32 %v510_v17, %v2280_v12  ;;  %v2382_v23 = vadd.f32 %v459_v18, %v2215_v42  ;;  %v477_v24 = vpop.f32.mrf.mxu1  ;;  %v1723_v18 = vld [vmem:[%s2591_s3 + $0x34] sm:$0xf]  ;;  %1116 = vmatpush.bf16.msra.mxu1 %v1528_v11 }
  0xbc   : > { %v567_v25 = vmul.f32 0.7978846, %v555_v14  ;;  %v558_v27 = vadd.f32 %v546_v15, %v2324_v40  ;;  %v523_v28 = vmul.f32 %v2374_v16, %v2374_v16  ;;  %v2388_v29 = vadd.f32 %v477_v24, %v2217_v43 }
  0xbd   : > { %v1790_v30 = vpop.eup %1789  ;;  %v568_v31 = vmul.f32 0.7978846, %v556_v20  ;;  %v569_v32 = vmul.f32 0.7978846, %v557_v21  ;;  %v524_v35 = vmul.f32 %v2379_v22, %v2379_v22  ;;  %v525_v42 = vmul.f32 %v2382_v23, %v2382_v23 }
  0xbe   : > { %v1792_v36 = vpop.eup %1791  ;;  %1793 = vtanh.f32 %v567_v25  ;;  %v570_v37 = vmul.f32 0.7978846, %v558_v27  ;;  %v535_v38 = vmul.f32 %v523_v28, %v2374_v16  ;;  %v526_v39 = vmul.f32 %v2388_v29, %v2388_v29  ;;  %v1739_v27 = vld [vmem:[%s2591_s3 + $0xb4] sm:$0xf]  ;;  %v1517_v28 = vld [vmem:[%s2591_s3 + $0xb8] sm:$0xf0] }
  0xbf   : > { %1795 = vtanh.f32 %v568_v31  ;;  %v536_v43 = vmul.f32 %v524_v35, %v2379_v22  ;;  %v537_v41 = vmul.f32 %v525_v42, %v2382_v23  ;;  %v589_v44 = vadd.f32 1.0, %v1790_v30  ;;  %v1757_v30 = vld [vmem:[%s2591_s3 + $0x144] sm:$0xf]  ;;  %v1589_v31 = vld [vmem:[%s2591_s3 + $0x148] sm:$0xf0] }
  0xc0   : > { %1797 = vtanh.f32 %v569_v32  ;;  %v547_v47 = vmul.f32 0.044715, %v535_v38  ;;  %v538_v48 = vmul.f32 %v526_v39, %v2388_v29  ;;  %v590_v49 = vadd.f32 1.0, %v1792_v36  ;;  %v1653_v38 = vld [vmem:[%s2591_s3 + $0x1c8] sm:$0xf0] }
  0xc1   : > { %1799 = vtanh.f32 %v570_v37  ;;  %v548_v51 = vmul.f32 0.044715, %v536_v43  ;;  %v495_v52 = vpop.f32.mrf.mxu2  ;;  %v549_v56 = vmul.f32 0.044715, %v537_v41  ;;  %v601_v61 = vmul.f32 0.5, %v589_v44 }
  0xc2   : > { %v559_v55 = vadd.f32 %v547_v47, %v2374_v16  ;;  %v2417_v58 = vadd.f32 %v495_v52, %v2266_v5  ;;  %v513_v59 = vpop.f32.mrf.mxu3  ;;  %v461_v60 = vpop.f32.mrf.mxu0  ;;  %v550_v1 = vmul.f32 0.044715, %v538_v48  ;;  %v1775_v5 = vld [vmem:[%s2591_s3 + $0x1d4] sm:$0xf]  ;;  %v602_v10 = vmul.f32 0.5, %v590_v49 }
  0xc3   : > { %v560_v0 = vadd.f32 %v548_v51, %v2379_v22  ;;  %v2424_v2 = vadd.f32 %v513_v59, %v2280_v12  ;;  %v479_v3 = vpop.f32.mrf.mxu1  ;;  %v1600_v17 = vor.u32 %v1759_v54, %v1597_v62  ;;  %v1664_v25 = vor.u32 %v1775_v5, %v1661_v6  ;;  %v1773_v37 = vld [vmem:[%s2591_s3 + $0x1c4] sm:$0xf]  ;;  %v1755_v59 = vld [vmem:[%s2591_s3 + $0x134] sm:$0xf] }
  0xc4   : > { %v1794_v7 = vpop.eup %1793  ;;  %v571_v8 = vmul.f32 0.7978846, %v559_v55  ;;  %v527_v9 = vmul.f32 %v2417_v58, %v2417_v58  ;;  %v613_v36 = vmul.f32 %v601_v61, %v2244_v57  ;;  %v1721_v39 = vld [vmem:[%s2591_s3 + $0x24] sm:$0xf]  ;;  %v614_v41 = vmul.f32 %v602_v10, %v2256_v63  ;;  %v1509_v63 = vld [vmem:[%s2591_s3 + $0xa8] sm:$0xf0] }
  0xc5   : > { %v1796_v13 = vpop.eup %1795  ;;  %v572_v12 = vmul.f32 0.7978846, %v560_v0  ;;  %v528_v14 = vmul.f32 %v2424_v2, %v2424_v2  ;;  %v591_v15 = vadd.f32 1.0, %v1794_v7  ;;  %1133 = vmatpush.bf16.msra.mxu2 %v1600_v17  ;;  %1151 = vmatpush.bf16.msra.mxu3 %v1664_v25  ;;  %v561_v57 = vadd.f32 %v549_v56, %v2382_v23  ;;  %v1771_v3 = vld [vmem:[%s2591_s3 + $0x1b4] sm:$0xf] }
  0xc6   : > { %v1798_v20 = vpop.eup %1797  ;;  %1801 = vtanh.f32 %v571_v8  ;;  %v539_v21 = vmul.f32 %v527_v9, %v2417_v58  ;;  %v592_v24 = vadd.f32 1.0, %v1796_v13  ;;  %v562_v51 = vadd.f32 %v550_v1, %v2388_v29  ;;  %v1581_v1 = vld [vmem:[%s2591_s3 + $0x138] sm:$0xf0]  ;;  %v1719_v8 = vld [vmem:[%s2591_s3 + $0x14] sm:$0xf] }
  0xc7   : > { %v1800_v32 = vpop.eup %1799  ;;  %1803 = vtanh.f32 %v572_v12  ;;  %v540_v35 = vmul.f32 %v528_v14, %v2424_v2  ;;  %v593_v42 = vadd.f32 1.0, %v1798_v20  ;;  %v603_v44 = vmul.f32 0.5, %v591_v15  ;;  %v1437_v9 = vld [vmem:[%s2591_s3 + $0x18] sm:$0xf0]  ;;  %v1735_v12 = vld [vmem:[%s2591_s3 + $0x94] sm:$0xf] }
  0xc8   : > { %v594_v43 = vadd.f32 1.0, %v1800_v32  ;;  %v551_v47 = vmul.f32 0.044715, %v539_v21  ;;  %v604_v50 = vmul.f32 0.5, %v592_v24  ;;  %v573_v55 = vmul.f32 0.7978846, %v561_v57 }
  0xc9   : > { %v497_v48 = vpop.f32.mrf.mxu2  ;;  %v605_v49 = vmul.f32 0.5, %v593_v42  ;;  %v552_v52 = vmul.f32 0.044715, %v540_v35  ;;  %v1456_v56 = vor.u32 %v1723_v18, %v1453_v19  ;;  %v574_v61 = vmul.f32 0.7978846, %v562_v51 }
  0xca   : > { %v515_v53 = vpop.f32.mrf.mxu3  ;;  %v606_v54 = vmul.f32 0.5, %v594_v43  ;;  %v1520_v62 = vor.u32 %v1739_v27, %v1517_v28  ;;  %v1592_v0 = vor.u32 %v1757_v30, %v1589_v31  ;;  %1805 = vtanh.f32 %v573_v55  ;;  %v1501_v14 = vld [vmem:[%s2591_s3 + $0x98] sm:$0xf0]  ;;  %v1753_v20 = vld [vmem:[%s2591_s3 + $0x124] sm:$0xf] }
  0xcb   : > { %v617_v60 = vmul.f32 %v605_v49, %v2315_v34  ;;  %1099 = vmatpush.bf16.msra.mxu0 %v1456_v56  ;;  %v1656_v6 = vor.u32 %v1773_v37, %v1653_v38  ;;  %v1448_v7 = vor.u32 %v1721_v39, %v1445_v45  ;;  %v1645_v34 = vld [vmem:[%s2591_s3 + $0x1b8] sm:$0xf0]  ;;  %1807 = vtanh.f32 %v574_v61  ;;  %v1573_v21 = vld [vmem:[%s2591_s3 + $0x128] sm:$0xf0]  ;;  %v1769_v28 = vld [vmem:[%s2591_s3 + $0x1a4] sm:$0xf] }
  0xcc   : > { %v1802_v4 = vpop.eup %1801  ;;  %v618_v5 = vmul.f32 %v606_v54, %v2324_v40  ;;  %1117 = vmatpush.bf16.msra.mxu1 %v1520_v62  ;;  %1134 = vmatpush.bf16.msra.mxu2 %v1592_v0  ;;  %v1512_v13 = vor.u32 %v1737_v46, %v1509_v63  ;;  %v563_v18 = vadd.f32 %v551_v47, %v2417_v58  ;;  %v1637_v30 = vld [vmem:[%s2591_s3 + $0x1a8] sm:$0xf0]  ;;  %v1717_v39 = vld [vmem:[%s2591_s3 + $0x4] sm:$0xf]  ;;  %v1629_v53 = vld [vmem:[%s2591_s3 + $0x198] sm:$0xf0] }
  0xcd   : > { %v1804_v10 = vpop.eup %1803  ;;  %v2498_v11 = vpack.c.bf16 %v617_v60, %v613_v36  ;;  %v595_v40 = vadd.f32 1.0, %v1802_v4  ;;  %1152 = vmatpush.bf16.msra.mxu3 %v1656_v6  ;;  %v564_v19 = vadd.f32 %v552_v52, %v2424_v2  ;;  %v1584_v25 = vor.u32 %v1755_v59, %v1581_v1  ;;  %v1429_v43 = vld [vmem:[%s2591_s3 + $0x8] sm:$0xf0]  ;;  %v1767_v52 = vld [vmem:[%s2591_s3 + $0x194] sm:$0xf] }
  0xce   : > { %v2506_v15 = vpack.c.bf16 %v618_v5, %v614_v41  ;;  %v596_v17 = vadd.f32 1.0, %v1804_v10  ;;  %v1648_v27 = vor.u32 %v1771_v3, %v1645_v34  ;;  %v575_v32 = vmul.f32 0.7978846, %v563_v18  ;;  %v1749_v61 = vld [vmem:[%s2591_s3 + $0x104] sm:$0xf] }
  0xcf   : > { %1031 = vmatmul.bf16.vlgmr.msrb.gmra.mxu0 %v2498_v11  ;;  %v607_v24 = vmul.f32 0.5, %v595_v40  ;;  %v576_v35 = vmul.f32 0.7978846, %v564_v19  ;;  %v1440_v42 = vor.u32 %v1719_v8, %v1437_v9  ;;  %v615_v36 = vmul.f32 %v603_v44, %v2302_v26  ;;  %v1493_v44 = vld [vmem:[%s2591_s3 + $0x88] sm:$0xf0] }
  0xd0   : > { %1049 = vmatmul.bf16.vlgmr.msrb.gmra.mxu1 %v2506_v15  ;;  %v608_v31 = vmul.f32 0.5, %v596_v17  ;;  %1100 = vmatpush.bf16.msra.mxu0 %v1448_v7  ;;  %v1504_v38 = vor.u32 %v1735_v12, %v1501_v14  ;;  %v1806_v41 = vpop.eup %1805  ;;  %v616_v57 = vmul.f32 %v604_v50, %v2312_v33  ;;  %1809 = vtanh.f32 %v575_v32  ;;  %v1751_v33 = vld [vmem:[%s2591_s3 + $0x114] sm:$0xf]  ;;  %v1557_v62 = vld [vmem:[%s2591_s3 + $0x108] sm:$0xf0] }
  0xd1   : > { %v619_v37 = vmul.f32 %v607_v24, %v2374_v16  ;;  %1118 = vmatpush.bf16.msra.mxu1 %v1512_v13  ;;  %1135 = vmatpush.bf16.msra.mxu2 %v1584_v25  ;;  %v1576_v26 = vor.u32 %v1753_v20, %v1573_v21  ;;  %v1733_v16 = vld [vmem:[%s2591_s3 + $0x84] sm:$0xf]  ;;  %v1808_v46 = vpop.eup %1807  ;;  %v597_v48 = vadd.f32 1.0, %v1806_v41  ;;  %1811 = vtanh.f32 %v576_v35  ;;  %v1621_v3 = vld [vmem:[%s2591_s3 + $0x188] sm:$0xf0] }
  0xd2   : > { %v620_v45 = vmul.f32 %v608_v31, %v2379_v22  ;;  %1153 = vmatpush.bf16.msra.mxu3 %v1648_v27  ;;  %v1640_v49 = vor.u32 %v1769_v28, %v1637_v30  ;;  %v1565_v22 = vld [vmem:[%s2591_s3 + $0x118] sm:$0xf0]  ;;  %v598_v51 = vadd.f32 1.0, %v1808_v46  ;;  %v1432_v63 = vor.u32 %v1717_v39, %v1429_v43  ;;  %v1765_v1 = vld [vmem:[%s2591_s3 + $0x184] sm:$0xf] }
  0xd3   : > { %v627_v47 = vpack.c.bf16 %v619_v37, %v615_v36  ;;  %v609_v54 = vmul.f32 0.5, %v597_v48  ;;  %v1496_v55 = vor.u32 %v1733_v16, %v1493_v44  ;;  %v1568_v59 = vor.u32 %v1751_v33, %v1565_v22 }
  0xd4   : > { %v628_v50 = vpack.c.bf16 %v620_v45, %v616_v57  ;;  %1101 = vmatpush.bf16.msra.mxu0 %v1440_v42  ;;  %v610_v56 = vmul.f32 0.5, %v598_v51  ;;  %v1632_v60 = vor.u32 %v1767_v52, %v1629_v53  ;;  %v1560_v8 = vor.u32 %v1749_v61, %v1557_v62 }
  0xd5   : > { %1067 = vmatmul.bf16.vlgmr.msrb.gmra.mxu2 %v627_v47  ;;  %1119 = vmatpush.bf16.msra.mxu1 %v1504_v38  ;;  %v621_v5 = vmul.f32 %v609_v54, %v2382_v23  ;;  %v1624_v10 = vor.u32 %v1765_v1, %v1621_v3 }
  0xd6   : > { %1085 = vmatmul.bf16.vlgmr.msrb.gmra.mxu3 %v628_v50  ;;  %1136 = vmatpush.bf16.msra.mxu2 %v1576_v26  ;;  %v1810_v0 = vpop.eup %1809  ;;  %v622_v7 = vmul.f32 %v610_v56, %v2388_v29  ;;  %v697_v29 = vld [vmem:[%s2592_s4] sm:$0x3] }
  0xd7   : > { %1154 = vmatpush.bf16.msra.mxu3 %v1640_v49  ;;  %v1812_v4 = vpop.eup %1811  ;;  %v599_v6 = vadd.f32 1.0, %v1810_v0  ;;  %v629_v13 = vpack.c.bf16 %v621_v5, %v621_v5  ;;  %v699_v19 = vperm.slane %v697_v29, 0  ;;  %v700_v61 = vperm.slane %v697_v29, 1 }
  0xd8   : > { %1102 = vmatpush.bf16.msra.mxu0 %v1432_v63  ;;  %v600_v34 = vadd.f32 1.0, %v1812_v4  ;;  %v630_v12 = vpack.c.bf16 %v622_v7, %v622_v7 }
  0xd9   : > { %1120 = vmatpush.bf16.msra.mxu1 %v1496_v55  ;;  %v611_v9 = vmul.f32 0.5, %v599_v6 }
  0xda   : > { %1137 = vmatpush.bf16.msra.mxu2 %v1568_v59  ;;  %v612_v40 = vmul.f32 0.5, %v600_v34 }
  0xdb   : > { %1155 = vmatpush.bf16.msra.mxu3 %v1632_v60  ;;  %v623_v14 = vmul.f32 %v611_v9, %v2417_v58 }
  0xdc   : > { %v624_v23 = vmul.f32 %v612_v40, %v2424_v2 }
  0xdd   : > { %v631_v17 = vpack.c.bf16 %v623_v14, %v623_v14 }
  0xde   : > { %1138 = vmatpush.bf16.msra.mxu2 %v1560_v8  ;;  %v632_v18 = vpack.c.bf16 %v624_v23, %v624_v23 }
  0xdf   : > { %1036 = vmatmul.bf16.gmra.mxu0 %v629_v13  ;;  %1156 = vmatpush.bf16.msra.mxu3 %v1624_v10 }
  0xe0   : > { %1054 = vmatmul.bf16.gmra.mxu1 %v630_v12 }
  0xe5   : > { %1072 = vmatmul.bf16.gmra.mxu2 %v631_v17 }
  0xe6   : > { %1090 = vmatmul.bf16.gmra.mxu3 %v632_v18 }
  0xef   : > { %1103 = vmatmul.bf16.vlgmr.msra.gmra.mxu0 %v2498_v11 }
  0xf0   : > { %1121 = vmatmul.bf16.vlgmr.msra.gmra.mxu1 %v2506_v15 }
  0xf5   : > { %1139 = vmatmul.bf16.vlgmr.msra.gmra.mxu2 %v627_v47 }
  0xf6   : > { %1157 = vmatmul.bf16.vlgmr.msra.gmra.mxu3 %v628_v50 }
  0xff   : > { %1108 = vmatmul.bf16.gmra.mxu0 %v629_v13 }
 0x100   : > { %1126 = vmatmul.bf16.gmra.mxu1 %v630_v12 }
 0x105   : > { %1144 = vmatmul.bf16.gmra.mxu2 %v631_v17 }
 0x106   : > { %1162 = vmatmul.bf16.gmra.mxu3 %v632_v18 }
 0x14c   : > { %v1032_v58 = vpop.f32.mrf.mxu0 }
 0x14d   : > { %v1050_v2 = vpop.f32.mrf.mxu1  ;;  %v1033_v20 = vadd.f32 %v1032_v58, %v699_v19 }
 0x14f   : > { %v1051_v25 = vadd.f32 %v1050_v2, %v1033_v20 }
 0x154   : > { %v1034_v21 = vpop.f32.mrf.mxu0 }
 0x155   : > { %v1052_v24 = vpop.f32.mrf.mxu1  ;;  %v1035_v28 = vadd.f32 %v1034_v21, %v699_v19 }
 0x157   : > { %v1053_v42 = vadd.f32 %v1052_v24, %v1035_v28 }
 0x158   : > { %v1068_v11 = vpop.f32.mrf.mxu2 }
 0x159   : > { %v1069_v27 = vadd.f32 %v1068_v11, %v1051_v25  ;;  %v1086_v15 = vpop.f32.mrf.mxu3 }
 0x15b   : > { %v1087_v30 = vadd.f32 %v1086_v15, %v1069_v27 }
 0x15c   : > { %v1037_v31 = vpop.f32.mrf.mxu0 }
 0x15d   : > { %v1167_v32 = vmul.f32 %v1087_v30, %v1087_v30  ;;  %v1055_v35 = vpop.f32.mrf.mxu1  ;;  %v1038_v57 = vadd.f32 %v1037_v31, %v699_v19 }
 0x15f   : > { %v1173_v36 = vmul.f32 %v1167_v32, %v1087_v30  ;;  %v1056_v47 = vadd.f32 %v1055_v35, %v1038_v57 }
 0x160   : > { %v1070_v37 = vpop.f32.mrf.mxu2 }
 0x161   : > { %v1179_v38 = vmul.f32 0.044715, %v1173_v36  ;;  %v1071_v39 = vadd.f32 %v1070_v37, %v1053_v42  ;;  %v1088_v43 = vpop.f32.mrf.mxu3 }
 0x163   : > { %v1185_v41 = vadd.f32 %v1179_v38, %v1087_v30  ;;  %v1089_v45 = vadd.f32 %v1088_v43, %v1071_v39 }
 0x164   : > { %v1039_v26 = vpop.f32.mrf.mxu0 }
 0x165   : > { %v1191_v16 = vmul.f32 0.7978846, %v1185_v41  ;;  %v1169_v44 = vmul.f32 %v1089_v45, %v1089_v45  ;;  %v1057_v46 = vpop.f32.mrf.mxu1 }
 0x167   : > { %1813 = vtanh.f32 %v1191_v16  ;;  %v1175_v48 = vmul.f32 %v1169_v44, %v1089_v45 }
 0x168   : > { %v1073_v49 = vpop.f32.mrf.mxu2 }
 0x169   : > { %v1181_v33 = vmul.f32 0.044715, %v1175_v48  ;;  %v1074_v22 = vadd.f32 %v1073_v49, %v1056_v47  ;;  %v1091_v50 = vpop.f32.mrf.mxu3 }
 0x16b   : > { %v1187_v51 = vadd.f32 %v1181_v33, %v1089_v45  ;;  %v1092_v63 = vadd.f32 %v1091_v50, %v1074_v22 }
 0x16c   : > { %v1104_v52 = vpop.f32.mrf.mxu0 }
 0x16d   : > { %v1814_v53 = vpop.eup %1813  ;;  %v1193_v54 = vmul.f32 0.7978846, %v1187_v51  ;;  %v1171_v55 = vmul.f32 %v1092_v63, %v1092_v63  ;;  %v1122_v56 = vpop.f32.mrf.mxu1  ;;  %v1105_v6 = vadd.f32 %v1104_v52, %v700_v61 }
 0x16e   : > { %v1203_v59 = vadd.f32 1.0, %v1814_v53 }
 0x16f   : > { %1815 = vtanh.f32 %v1193_v54  ;;  %v1177_v60 = vmul.f32 %v1171_v55, %v1092_v63  ;;  %v1123_v40 = vadd.f32 %v1122_v56, %v1105_v6 }
 0x170   : > { %v1209_v62 = vmul.f32 0.5, %v1203_v59  ;;  %v1075_v0 = vpop.f32.mrf.mxu2 }
 0x171   : > { %v1183_v1 = vmul.f32 0.044715, %v1177_v60  ;;  %v1093_v3 = vpop.f32.mrf.mxu3 }
 0x172   : > { %v1215_v4 = vmul.f32 %v1209_v62, %v1087_v30 }
 0x173   : > { %v1189_v5 = vadd.f32 %v1183_v1, %v1092_v63 }
 0x174   : > { %1221 = vst [vmem:[%s2577_s24] sm:$0xff] %v1215_v4  ;;  %v1106_v7 = vpop.f32.mrf.mxu0 }
 0x175   : > { %v1816_v34 = vpop.eup %1815  ;;  %v1195_v8 = vmul.f32 0.7978846, %v1189_v5  ;;  %v1124_v9 = vpop.f32.mrf.mxu1  ;;  %v1107_v18 = vadd.f32 %v1106_v7, %v700_v61 }
 0x176   : > { %v1205_v10 = vadd.f32 1.0, %v1816_v34 }
 0x177   : > { %1817 = vtanh.f32 %v1195_v8  ;;  %v1125_v24 = vadd.f32 %v1124_v9, %v1107_v18 }
 0x178   : > { %v1211_v13 = vmul.f32 0.5, %v1205_v10  ;;  %v1140_v12 = vpop.f32.mrf.mxu2 }
 0x179   : > { %v1141_v14 = vadd.f32 %v1140_v12, %v1123_v40  ;;  %v1158_v23 = vpop.f32.mrf.mxu3 }
 0x17a   : > { %v1217_v17 = vmul.f32 %v1211_v13, %v1089_v45 }
 0x17b   : > { %v1159_v29 = vadd.f32 %v1158_v23, %v1141_v14 }
 0x17c   : > { %1223 = vst [vmem:[%s2577_s24 + $0x10] sm:$0xff] %v1217_v17  ;;  %v1109_v58 = vpop.f32.mrf.mxu0 }
 0x17d   : > { %v1818_v2 = vpop.eup %1817  ;;  %v1168_v19 = vmul.f32 %v1159_v29, %v1159_v29  ;;  %v1127_v20 = vpop.f32.mrf.mxu1  ;;  %v1110_v35 = vadd.f32 %v1109_v58, %v700_v61 }
 0x17e   : > { %v1207_v21 = vadd.f32 1.0, %v1818_v2 }
 0x17f   : > { %v1174_v25 = vmul.f32 %v1168_v19, %v1159_v29  ;;  %v1128_v43 = vadd.f32 %v1127_v20, %v1110_v35 }
 0x180   : > { %v1213_v11 = vmul.f32 0.5, %v1207_v21  ;;  %v1142_v27 = vpop.f32.mrf.mxu2 }
 0x181   : > { %v1180_v15 = vmul.f32 0.044715, %v1174_v25  ;;  %v1143_v28 = vadd.f32 %v1142_v27, %v1125_v24  ;;  %v1160_v30 = vpop.f32.mrf.mxu3 }
 0x182   : > { %v1219_v31 = vmul.f32 %v1213_v11, %v1092_v63 }
 0x183   : > { %v1186_v32 = vadd.f32 %v1180_v15, %v1159_v29  ;;  %v1161_v42 = vadd.f32 %v1160_v30, %v1143_v28 }
 0x184   : > { %1225 = vst [vmem:[%s2577_s24 + $0x20] sm:$0xff] %v1219_v31  ;;  %v1111_v36 = vpop.f32.mrf.mxu0 }
 0x185   : > { %v1192_v37 = vmul.f32 0.7978846, %v1186_v32  ;;  %v1170_v38 = vmul.f32 %v1161_v42, %v1161_v42  ;;  %v1129_v39 = vpop.f32.mrf.mxu1 }
 0x187   : > { %1819 = vtanh.f32 %v1192_v37  ;;  %v1176_v41 = vmul.f32 %v1170_v38, %v1161_v42 }
 0x188   : > { %v1145_v57 = vpop.f32.mrf.mxu2 }
 0x189   : > { %v1182_v45 = vmul.f32 0.044715, %v1176_v41  ;;  %v1146_v26 = vadd.f32 %v1145_v57, %v1128_v43  ;;  %v1163_v16 = vpop.f32.mrf.mxu3 }
 0x18b   : > { %v1188_v44 = vadd.f32 %v1182_v45, %v1161_v42  ;;  %v1164_v46 = vadd.f32 %v1163_v16, %v1146_v26 }
 0x18d   : > { %v1820_v47 = vpop.eup %1819  ;;  %v1194_v48 = vmul.f32 0.7978846, %v1188_v44  ;;  %v1172_v49 = vmul.f32 %v1164_v46, %v1164_v46 }
 0x18e   : > { %v1204_v33 = vadd.f32 1.0, %v1820_v47 }
 0x18f   : > { %1821 = vtanh.f32 %v1194_v48  ;;  %v1178_v22 = vmul.f32 %v1172_v49, %v1164_v46 }
 0x190   : > { %v1210_v50 = vmul.f32 0.5, %v1204_v33  ;;  %v1147_v51 = vpop.f32.mrf.mxu2 }
 0x191   : > { %v1184_v63 = vmul.f32 0.044715, %v1178_v22  ;;  %v1165_v52 = vpop.f32.mrf.mxu3 }
 0x192   : > { %v1216_v53 = vmul.f32 %v1210_v50, %v1159_v29 }
 0x193   : > { %v1190_v54 = vadd.f32 %v1184_v63, %v1164_v46 }
 0x194   : > { %1222 = vst [vmem:[%s2577_s24 + $0x8] sm:$0xff] %v1216_v53 }
 0x195   : > { %v1822_v55 = vpop.eup %1821  ;;  %v1196_v56 = vmul.f32 0.7978846, %v1190_v54 }
 0x196   : > { %v1206_v59 = vadd.f32 1.0, %v1822_v55 }
 0x197   : > { %1823 = vtanh.f32 %v1196_v56 }
 0x198   : > { %v1212_v60 = vmul.f32 0.5, %v1206_v59 }
 0x19a   : > { %v1218_v61 = vmul.f32 %v1212_v60, %v1161_v42 }
 0x19c   : > { %1224 = vst [vmem:[%s2577_s24 + $0x18] sm:$0xff] %v1218_v61 }
 0x19d   : > { %v1824_v62 = vpop.eup %1823 }
 0x19e   : > { %v1208_v0 = vadd.f32 1.0, %v1824_v62 }
 0x1a0   : > { %v1214_v1 = vmul.f32 0.5, %v1208_v0 }
 0x1a2   : > { %v1220_v3 = vmul.f32 %v1214_v1, %v1164_v46 }
 0x1a4   : > { %1226 = vst [vmem:[%s2577_s24 + $0x28] sm:$0xff] %v1220_v3 }
 0x1a5 PF: > { %s15_s18 = sadd.s32 1, %s1831_s18  }
 0x1a6   : > { %p12_p4 = scmp.ge.s32.totalorder %s15_s18, 4  }
 0x1a8   :  { %14 = sbr.rel (!%p12_p4) target bundleno = 1 (0x1), region = 70 }

// kernel: multi_period_discriminator_forward.35
= control target key start
LH: loop header
LB: loop body
LE: loop exit
PB: predicated region body
PF: predicated region fallthrough
CT: control target
= control target key end

     0   :  { %s613_s12 = smov 0   ;;  %s693_s0 = inlined_call_operand.vmem [shape: bf16[80,256], index: 0, kind: input, shape index: {}]   ;;  %s694_s1 = inlined_call_operand.vmem [shape: bf16[256,3], index: 1, kind: input, shape index: {}]   ;;  %s695_s2 = inlined_call_operand.vmem [shape: f32[1,3], index: 2, kind: input, shape index: {}]   ;;  %s696_s3 = inlined_call_operand.vmem [shape: f32[80,3], index: 3, kind: output, shape index: {}]  }
   0x1 LB: > { %s449_s13 = sadd.s32 4294967295, %s591_s12   ;;  %p453_p0 = scmp.ge.s32.totalorder %s591_s12, 1  ;;  %s591_s12 = sphi %s613_s12, %s13_s12  }
   0x2   : > { %p139_p1 = scmp.lt.s32.totalorder %s591_s12, 3 }
   0x4   : > { %p140_p2 = pnand %p453_p0, %p139_p1 }
   0x5   : > { %s164_s26 = smul.u32 (!%p140_p2), 5, %s449_s13 }
   0x6   : > { %143 = sbr.rel (%p140_p2) target bundleno = 200 (0xc8), region = 32 }
   0x7   : > { %p165_p3 = scmp.lt.s32.totalorder (!%p140_p2), %s164_s26, 9 }
   0xb   : > { %v551_v0 = vld [vmem:[%s694_s1 + $0x38] sm:$0xff]  ;;  %v550_v2 = vld [vmem:[%s694_s1 + $0x30] sm:$0xff]  ;;  %v549_v4 = vld [vmem:[%s694_s1 + $0x28] sm:$0xff]  ;;  %s698_s26 = smov (!%p165_p3, %s164_s26), 9  ;;  %vm387_vm0 = vcmask 23552  }
   0xc   : > { %v559_v1 = vld [vmem:[%s694_s1 + $0x78] sm:$0xff]  ;;  %560 = vmatpush.bf16.msra.mxu2 %v551_v0  ;;  %v558_v3 = vld [vmem:[%s694_s1 + $0x70] sm:$0xff]  ;;  %341 = vmatpush.bf16.msra.mxu0 %v551_v0  ;;  %v557_v5 = vld [vmem:[%s694_s1 + $0x68] sm:$0xff]  ;;  %s539_s13 = sshll.u32 %s698_s26, 3 }
   0xd   : > { %568 = vmatpush.bf16.msra.mxu3 %v559_v1  ;;  %364 = vmatpush.bf16.msra.mxu1 %v559_v1  ;;  %v548_v6 = vld [vmem:[%s694_s1 + $0x20] sm:$0xff]  ;;  %v547_v8 = vld [vmem:[%s694_s1 + $0x18] sm:$0xff]  ;;  %v546_v10 = vld [vmem:[%s694_s1 + $0x10] sm:$0xff]  ;;  %s169_s20 = scalar_lea.vmem %s693_s0, %s539_s13  ;;  %s175_s30 = scalar_lea.vmem %s696_s3, %s539_s13 }
   0xe   : > { %v556_v7 = vld [vmem:[%s694_s1 + $0x60] sm:$0xff]  ;;  %v555_v9 = vld [vmem:[%s694_s1 + $0x58] sm:$0xff]  ;;  %v554_v11 = vld [vmem:[%s694_s1 + $0x50] sm:$0xff] }
   0xf   : > { %v545_v12 = vld [vmem:[%s694_s1 + $0x8] sm:$0xff]  ;;  %v544_v14 = vld [vmem:[%s694_s1] sm:$0xff]  ;;  %v467_v16 = vld [vmem:[%s169_s20 + $0x10] sm:$0xf] }
  0x10   : > { %561 = vmatpush.bf16.msra.mxu2 %v550_v2  ;;  %342 = vmatpush.bf16.msra.mxu0 %v550_v2  ;;  %v553_v13 = vld [vmem:[%s694_s1 + $0x48] sm:$0xff]  ;;  %v552_v15 = vld [vmem:[%s694_s1 + $0x40] sm:$0xff]  ;;  %v543_v17 = vld [vmem:[%s169_s20 + $0x14] sm:$0xf0] }
  0x11   : > { %569 = vmatpush.bf16.msra.mxu3 %v558_v3  ;;  %365 = vmatpush.bf16.msra.mxu1 %v558_v3  ;;  %v542_v18 = vld [vmem:[%s169_s20 + $0x14] sm:$0xf]  ;;  %v469_v19 = vld [vmem:[%s169_s20 + $0x18] sm:$0xf0]  ;;  %v459_v20 = vld [vmem:[%s169_s20] sm:$0xf]  ;;  %v468_v24 = vor.u32 %v543_v17, %v467_v16 }
  0x12   : > { %v541_v21 = vld [vmem:[%s169_s20 + $0x4] sm:$0xf0]  ;;  %v540_v22 = vld [vmem:[%s169_s20 + $0x4] sm:$0xf]  ;;  %v461_v23 = vld [vmem:[%s169_s20 + $0x8] sm:$0xf0]  ;;  %v472_v25 = vor.u32 %v542_v18, %v469_v19 }
  0x13   : > { %v460_v26 = vor.u32 %v541_v21, %v459_v20  ;;  %v464_v27 = vor.u32 %v540_v22, %v461_v23  ;;  %v181_v28 = vld [vmem:[%s169_s20 + $0x20] sm:$0xff] }
  0x14   : > { %562 = vmatpush.bf16.msra.mxu2 %v549_v4  ;;  %343 = vmatpush.bf16.msra.mxu0 %v549_v4  ;;  %v231_v29 = vunpack.c.l.b16 %v181_v28  ;;  %v232_v30 = vunpack.c.h.b16 %v181_v28  ;;  %v584_v33 = vld [vmem:[%s695_s2] ss:$0 sm:$0xff] }
  0x15   : > { %570 = vmatpush.bf16.msra.mxu3 %v557_v5  ;;  %366 = vmatpush.bf16.msra.mxu1 %v557_v5 }
  0x16   : > { %v237_v31 = vpack.c.b16 %v231_v29, %v231_v29  ;;  %v238_v32 = vpack.c.b16 %v232_v30, %v232_v30 }
  0x18   : > { %563 = vmatpush.bf16.msra.mxu2 %v548_v6  ;;  %344 = vmatpush.bf16.msra.mxu0 %v548_v6 }
  0x19   : > { %571 = vmatpush.bf16.msra.mxu3 %v556_v7  ;;  %367 = vmatpush.bf16.msra.mxu1 %v556_v7 }
  0x1c   : > { %564 = vmatpush.bf16.msra.mxu2 %v547_v8  ;;  %345 = vmatpush.bf16.msra.mxu0 %v547_v8 }
  0x1d   : > { %572 = vmatpush.bf16.msra.mxu3 %v555_v9  ;;  %368 = vmatpush.bf16.msra.mxu1 %v555_v9 }
  0x20   : > { %565 = vmatpush.bf16.msra.mxu2 %v546_v10  ;;  %346 = vmatpush.bf16.msra.mxu0 %v546_v10 }
  0x21   : > { %573 = vmatpush.bf16.msra.mxu3 %v554_v11  ;;  %369 = vmatpush.bf16.msra.mxu1 %v554_v11 }
  0x24   : > { %566 = vmatpush.bf16.msra.mxu2 %v545_v12  ;;  %347 = vmatpush.bf16.msra.mxu0 %v545_v12 }
  0x25   : > { %574 = vmatpush.bf16.msra.mxu3 %v553_v13  ;;  %370 = vmatpush.bf16.msra.mxu1 %v553_v13 }
  0x28   : > { %567 = vmatpush.bf16.msra.mxu2 %v544_v14  ;;  %348 = vmatpush.bf16.msra.mxu0 %v544_v14 }
  0x29   : > { %575 = vmatpush.bf16.msra.mxu3 %v552_v15  ;;  %371 = vmatpush.bf16.msra.mxu1 %v552_v15 }
  0x2b   : > { %354 = vmatmul.bf16.vlgmr.msra.gmra.mxu2 %v468_v24  ;;  %349 = vmatmul.bf16.vlgmr.msra.gmra.mxu0 %v460_v26 }
  0x2c   : > { %377 = vmatmul.bf16.vlgmr.msra.gmra.mxu3 %v472_v25  ;;  %372 = vmatmul.bf16.vlgmr.msra.gmra.mxu1 %v464_v27 }
  0x3b   : > { %359 = vmatmul.bf16.gmra.mxu2 %v237_v31 }
  0x3c   : > { %382 = vmatmul.bf16.gmra.mxu3 %v238_v32 }
  0xa8   : > { %v350_v34 = vpop.f32.mrf.mxu0 }
  0xa9   : > { %v373_v35 = vpop.f32.mrf.mxu1  ;;  %v351_v36 = vadd.f32 %v584_v33, %v350_v34 }
  0xab   : > { %v374_v37 = vadd.f32 %v373_v35, %v351_v36 }
  0xad   : > { %388 = vst.msk [vmem:[%s175_s30] sm:$0xff] %vm387_vm0, %v374_v37 }
  0xae   : > { %v355_v38 = vpop.f32.mrf.mxu2 }
  0xaf   : > { %v378_v39 = vpop.f32.mrf.mxu3  ;;  %v356_v40 = vadd.f32 %v584_v33, %v355_v38 }
  0xb0   : > { %v352_v42 = vpop.f32.mrf.mxu0 }
  0xb1   : > { %v379_v41 = vadd.f32 %v378_v39, %v356_v40  ;;  %v375_v43 = vpop.f32.mrf.mxu1  ;;  %v353_v44 = vadd.f32 %v584_v33, %v352_v42 }
  0xb3   : > { %390 = vst.msk [vmem:[%s175_s30 + $0x10] sm:$0xff] %vm387_vm0, %v379_v41  ;;  %v376_v45 = vadd.f32 %v375_v43, %v353_v44 }
  0xb5   : > { %389 = vst.msk [vmem:[%s175_s30 + $0x8] sm:$0xff] %vm387_vm0, %v376_v45 }
  0xb6   : > { %v357_v46 = vpop.f32.mrf.mxu2 }
  0xb7   : > { %v380_v47 = vpop.f32.mrf.mxu3  ;;  %v358_v48 = vadd.f32 %v584_v33, %v357_v46 }
  0xb9   : > { %v381_v49 = vadd.f32 %v380_v47, %v358_v48 }
  0xbb   : > { %391 = vst.msk [vmem:[%s175_s30 + $0x18] sm:$0xff] %vm387_vm0, %v381_v49 }
  0xbe   : > { %v360_v50 = vpop.f32.mrf.mxu2 }
  0xbf   : > { %v383_v51 = vpop.f32.mrf.mxu3  ;;  %v361_v52 = vadd.f32 %v584_v33, %v360_v50 }
  0xc1   : > { %v384_v53 = vadd.f32 %v383_v51, %v361_v52 }
  0xc3   : > { %392 = vst.msk [vmem:[%s175_s30 + $0x20] sm:$0xff] %vm387_vm0, %v384_v53 }
  0xc6   : > { %v362_v54 = vpop.f32.mrf.mxu2 }
  0xc7   : > { %v385_v55 = vpop.f32.mrf.mxu3 }
  0xc8 PF: > { %s13_s12 = sadd.s32 1, %s591_s12  }
  0xc9   : > { %p10_p4 = scmp.ge.s32.totalorder %s13_s12, 4  }
  0xcb   :  { %12 = sbr.rel (!%p10_p4) target bundleno = 1 (0x1), region = 62 }

// kernel: multi_period_discriminator_forward.34
= control target key start
LH: loop header
LB: loop body
LE: loop exit
PB: predicated region body
PF: predicated region fallthrough
CT: control target
= control target key end

     0   :  { %s2076_s18 = smov 0   ;;  %s3042_s0 = inlined_call_operand.vmem [shape: bf16[80,128], index: 0, kind: input, shape index: {}]   ;;  %s3043_s1 = inlined_call_operand.vmem [shape: bf16[128,512], index: 1, kind: input, shape index: {}]   ;;  %s3044_s2 = inlined_call_operand.vmem [shape: f32[1,512], index: 2, kind: input, shape index: {}]   ;;  %s3045_s3 = inlined_call_operand.vmem [shape: bf16[512,256], index: 3, kind: input, shape index: {}]   ;;  %s3046_s4 = inlined_call_operand.vmem [shape: f32[1,256], index: 4, kind: input, shape index: {}]   ;;  %s3047_s5 = inlined_call_operand.vmem [shape: f32[80,256], index: 5, kind: output, shape index: {}]  }
   0x1 LB: > { %s1469_s19 = sadd.s32 4294967295, %s2044_s18   ;;  %p1473_p0 = scmp.ge.s32.totalorder %s2044_s18, 1  ;;  %s2044_s18 = sphi %s2076_s18, %s15_s18  }
   0x2   : > { %p188_p1 = scmp.lt.s32.totalorder %s2044_s18, 3 }
   0x4   : > { %p189_p2 = pnand %p1473_p0, %p188_p1 }
   0x5   : > { %s217_s11 = smul.u32 (!%p189_p2), 5, %s1469_s19 }
   0x6   : > { %192 = sbr.rel (%p189_p2) target bundleno = 461 (0x1cd), region = 40 }
   0x7   : > { %p218_p3 = scmp.lt.s32.totalorder (!%p189_p2), %s217_s11, 9 }
   0xb   : > { %v1599_v0 = vld [vmem:[%s3043_s1 + $0xe0] sm:$0xf]  ;;  %v1904_v1 = vld [vmem:[%s3043_s1 + $0xec] sm:$0xf0]  ;;  %v1902_v2 = vld [vmem:[%s3043_s1 + $0xe4] sm:$0xf] }
   0xc   : > { %v1600_v3 = vor.u32 %v1904_v1, %v1599_v0  ;;  %v1601_v4 = vld [vmem:[%s3043_s1 + $0xf0] sm:$0xf0]  ;;  %v1607_v5 = vld [vmem:[%s3043_s1 + $0xe8] sm:$0xf]  ;;  %v1905_v6 = vld [vmem:[%s3043_s1 + $0xf4] sm:$0xf0] }
   0xd   : > { %v1604_v7 = vor.u32 %v1902_v2, %v1601_v4  ;;  %v1608_v8 = vor.u32 %v1905_v6, %v1607_v5  ;;  %v1903_v9 = vld [vmem:[%s3043_s1 + $0xec] sm:$0xf]  ;;  %v1609_v10 = vld [vmem:[%s3043_s1 + $0xf8] sm:$0xf0]  ;;  %v1583_v11 = vld [vmem:[%s3043_s1 + $0xc0] sm:$0xf] }
   0xe   : > { %453 = vmatpush.bf16.msra.mxu0 %v1600_v3  ;;  %v1612_v12 = vor.u32 %v1903_v9, %v1609_v10  ;;  %v1900_v13 = vld [vmem:[%s3043_s1 + $0xcc] sm:$0xf0]  ;;  %v1898_v14 = vld [vmem:[%s3043_s1 + $0xc4] sm:$0xf]  ;;  %v1585_v15 = vld [vmem:[%s3043_s1 + $0xd0] sm:$0xf0] }
   0xf   : > { %476 = vmatpush.bf16.msra.mxu1 %v1604_v7  ;;  %499 = vmatpush.bf16.msra.mxu2 %v1608_v8  ;;  %v1584_v16 = vor.u32 %v1900_v13, %v1583_v11  ;;  %v1588_v17 = vor.u32 %v1898_v14, %v1585_v15  ;;  %v1591_v18 = vld [vmem:[%s3043_s1 + $0xc8] sm:$0xf]  ;;  %v1901_v19 = vld [vmem:[%s3043_s1 + $0xd4] sm:$0xf0]  ;;  %v1899_v20 = vld [vmem:[%s3043_s1 + $0xcc] sm:$0xf] }
  0x10   : > { %522 = vmatpush.bf16.msra.mxu3 %v1612_v12  ;;  %v1592_v21 = vor.u32 %v1901_v19, %v1591_v18  ;;  %v1593_v22 = vld [vmem:[%s3043_s1 + $0xd8] sm:$0xf0]  ;;  %v1567_v23 = vld [vmem:[%s3043_s1 + $0xa0] sm:$0xf]  ;;  %v1896_v24 = vld [vmem:[%s3043_s1 + $0xac] sm:$0xf0] }
  0x11   : > { %v1596_v25 = vor.u32 %v1899_v20, %v1593_v22  ;;  %v1894_v26 = vld [vmem:[%s3043_s1 + $0xa4] sm:$0xf]  ;;  %v1569_v27 = vld [vmem:[%s3043_s1 + $0xb0] sm:$0xf0]  ;;  %v1575_v28 = vld [vmem:[%s3043_s1 + $0xa8] sm:$0xf]  ;;  %v1568_v29 = vor.u32 %v1896_v24, %v1567_v23 }
  0x12   : > { %454 = vmatpush.bf16.msra.mxu0 %v1584_v16  ;;  %v1897_v30 = vld [vmem:[%s3043_s1 + $0xb4] sm:$0xf0]  ;;  %v1895_v31 = vld [vmem:[%s3043_s1 + $0xac] sm:$0xf]  ;;  %v1577_v32 = vld [vmem:[%s3043_s1 + $0xb8] sm:$0xf0]  ;;  %v1572_v33 = vor.u32 %v1894_v26, %v1569_v27 }
  0x13   : > { %477 = vmatpush.bf16.msra.mxu1 %v1588_v17  ;;  %500 = vmatpush.bf16.msra.mxu2 %v1592_v21  ;;  %v1576_v34 = vor.u32 %v1897_v30, %v1575_v28  ;;  %v1551_v35 = vld [vmem:[%s3043_s1 + $0x80] sm:$0xf]  ;;  %v1892_v36 = vld [vmem:[%s3043_s1 + $0x8c] sm:$0xf0]  ;;  %v1890_v37 = vld [vmem:[%s3043_s1 + $0x84] sm:$0xf]  ;;  %v1580_v38 = vor.u32 %v1895_v31, %v1577_v32 }
  0x14   : > { %523 = vmatpush.bf16.msra.mxu3 %v1596_v25  ;;  %v1553_v39 = vld [vmem:[%s3043_s1 + $0x90] sm:$0xf0]  ;;  %v1559_v40 = vld [vmem:[%s3043_s1 + $0x88] sm:$0xf]  ;;  %v1893_v41 = vld [vmem:[%s3043_s1 + $0x94] sm:$0xf0]  ;;  %v1552_v44 = vor.u32 %v1892_v36, %v1551_v35 }
  0x15   : > { %v1891_v42 = vld [vmem:[%s3043_s1 + $0x8c] sm:$0xf]  ;;  %v1561_v43 = vld [vmem:[%s3043_s1 + $0x98] sm:$0xf0]  ;;  %v1556_v45 = vor.u32 %v1890_v37, %v1553_v39  ;;  %v1560_v46 = vor.u32 %v1893_v41, %v1559_v40  ;;  %v1535_v47 = vld [vmem:[%s3043_s1 + $0x60] sm:$0xf] }
  0x16   : > { %455 = vmatpush.bf16.msra.mxu0 %v1568_v29  ;;  %v1888_v48 = vld [vmem:[%s3043_s1 + $0x6c] sm:$0xf0]  ;;  %v1886_v49 = vld [vmem:[%s3043_s1 + $0x64] sm:$0xf]  ;;  %v1564_v50 = vor.u32 %v1891_v42, %v1561_v43  ;;  %v1537_v51 = vld [vmem:[%s3043_s1 + $0x70] sm:$0xf0] }
  0x17   : > { %478 = vmatpush.bf16.msra.mxu1 %v1572_v33  ;;  %501 = vmatpush.bf16.msra.mxu2 %v1576_v34  ;;  %v1543_v52 = vld [vmem:[%s3043_s1 + $0x68] sm:$0xf]  ;;  %v1889_v53 = vld [vmem:[%s3043_s1 + $0x74] sm:$0xf0]  ;;  %v1887_v54 = vld [vmem:[%s3043_s1 + $0x6c] sm:$0xf]  ;;  %v1536_v56 = vor.u32 %v1888_v48, %v1535_v47  ;;  %v1540_v57 = vor.u32 %v1886_v49, %v1537_v51 }
  0x18   : > { %524 = vmatpush.bf16.msra.mxu3 %v1580_v38  ;;  %v1545_v55 = vld [vmem:[%s3043_s1 + $0x78] sm:$0xf0]  ;;  %v1544_v58 = vor.u32 %v1889_v53, %v1543_v52  ;;  %v1519_v59 = vld [vmem:[%s3043_s1 + $0x40] sm:$0xf]  ;;  %v1884_v60 = vld [vmem:[%s3043_s1 + $0x4c] sm:$0xf0] }
  0x19   : > { %v1882_v61 = vld [vmem:[%s3043_s1 + $0x44] sm:$0xf]  ;;  %v1548_v62 = vor.u32 %v1887_v54, %v1545_v55  ;;  %v1521_v63 = vld [vmem:[%s3043_s1 + $0x50] sm:$0xf0]  ;;  %v1527_v0 = vld [vmem:[%s3043_s1 + $0x48] sm:$0xf]  ;;  %v1520_v4 = vor.u32 %v1884_v60, %v1519_v59 }
  0x1a   : > { %456 = vmatpush.bf16.msra.mxu0 %v1552_v44  ;;  %v1885_v1 = vld [vmem:[%s3043_s1 + $0x54] sm:$0xf0]  ;;  %v1883_v2 = vld [vmem:[%s3043_s1 + $0x4c] sm:$0xf]  ;;  %v1529_v3 = vld [vmem:[%s3043_s1 + $0x58] sm:$0xf0]  ;;  %v1524_v6 = vor.u32 %v1882_v61, %v1521_v63 }
  0x1b   : > { %479 = vmatpush.bf16.msra.mxu1 %v1556_v45  ;;  %502 = vmatpush.bf16.msra.mxu2 %v1560_v46  ;;  %v1503_v5 = vld [vmem:[%s3043_s1 + $0x20] sm:$0xf]  ;;  %v1528_v7 = vor.u32 %v1885_v1, %v1527_v0  ;;  %v1880_v8 = vld [vmem:[%s3043_s1 + $0x2c] sm:$0xf0]  ;;  %v1878_v9 = vld [vmem:[%s3043_s1 + $0x24] sm:$0xf]  ;;  %v1532_v11 = vor.u32 %v1883_v2, %v1529_v3 }
  0x1c   : > { %525 = vmatpush.bf16.msra.mxu3 %v1564_v50  ;;  %v1505_v10 = vld [vmem:[%s3043_s1 + $0x30] sm:$0xf0]  ;;  %v1511_v12 = vld [vmem:[%s3043_s1 + $0x28] sm:$0xf]  ;;  %v1881_v13 = vld [vmem:[%s3043_s1 + $0x34] sm:$0xf0]  ;;  %v1504_v16 = vor.u32 %v1880_v8, %v1503_v5 }
  0x1d   : > { %v1879_v14 = vld [vmem:[%s3043_s1 + $0x2c] sm:$0xf]  ;;  %v1513_v15 = vld [vmem:[%s3043_s1 + $0x38] sm:$0xf0]  ;;  %v1487_v17 = vld [vmem:[%s3043_s1] sm:$0xf]  ;;  %v1508_v18 = vor.u32 %v1878_v9, %v1505_v10  ;;  %v1512_v19 = vor.u32 %v1881_v13, %v1511_v12 }
  0x1e   : > { %457 = vmatpush.bf16.msra.mxu0 %v1536_v56  ;;  %v1876_v20 = vld [vmem:[%s3043_s1 + $0xc] sm:$0xf0]  ;;  %v1874_v21 = vld [vmem:[%s3043_s1 + $0x4] sm:$0xf]  ;;  %v1489_v22 = vld [vmem:[%s3043_s1 + $0x10] sm:$0xf0]  ;;  %v1516_v23 = vor.u32 %v1879_v14, %v1513_v15 }
  0x1f   : > { %480 = vmatpush.bf16.msra.mxu1 %v1540_v57  ;;  %503 = vmatpush.bf16.msra.mxu2 %v1544_v58  ;;  %v1495_v24 = vld [vmem:[%s3043_s1 + $0x8] sm:$0xf]  ;;  %v1877_v25 = vld [vmem:[%s3043_s1 + $0x14] sm:$0xf0]  ;;  %s3049_s11 = smov (!%p218_p3, %s217_s11), 9  ;;  %v1488_v28 = vor.u32 %v1876_v20, %v1487_v17  ;;  %v1492_v29 = vor.u32 %v1874_v21, %v1489_v22 }
  0x20   : > { %526 = vmatpush.bf16.msra.mxu3 %v1548_v62  ;;  %v1875_v26 = vld [vmem:[%s3043_s1 + $0xc] sm:$0xf]  ;;  %v1497_v27 = vld [vmem:[%s3043_s1 + $0x18] sm:$0xf0]  ;;  %s1474_s8 = sshll.u32 %s3049_s11, 2  ;;  %v1496_v30 = vor.u32 %v1877_v25, %v1495_v24  ;;  %s1871_s21 = sshll.u32 %s3049_s11, 4 }
  0x21   : > { %s2284_s12 = scalar_lea.vmem %s3042_s0, %s1474_s8  ;;  %v1500_v31 = vor.u32 %v1875_v26, %v1497_v27  ;;  %v1799_v33 = vld [vmem:[%s3045_s3 + $0x170] sm:$0xf]  ;;  %v1953_v34 = vld [vmem:[%s3045_s3 + $0x174] sm:$0xf0]  ;;  %v1663_v49 = vld [vmem:[%s3045_s3 + $0x60] sm:$0xf]  ;;  %s3019_s24 = scalar_lea.vmem %s3047_s5, %s1871_s21 }
  0x22   : > { %458 = vmatpush.bf16.msra.mxu0 %v1520_v4  ;;  %v1872_v32 = vld [vmem:[%s2284_s12] sm:$0xff]  ;;  %v1671_v35 = vld [vmem:[%s3045_s3 + $0x70] sm:$0xf]  ;;  %v1800_v36 = vor.u32 %v1953_v34, %v1799_v33  ;;  %v1921_v37 = vld [vmem:[%s3045_s3 + $0x74] sm:$0xf0] }
  0x23   : > { %481 = vmatpush.bf16.msra.mxu1 %v1524_v6  ;;  %504 = vmatpush.bf16.msra.mxu2 %v1528_v7  ;;  %v1863_v38 = vld [vmem:[%s3045_s3 + $0x1f0] sm:$0xf]  ;;  %v1969_v39 = vld [vmem:[%s3045_s3 + $0x1f4] sm:$0xf0]  ;;  %v1672_v40 = vor.u32 %v1921_v37, %v1671_v35  ;;  %v1873_v45 = vld [vmem:[%s2284_s12 + $0x8] sm:$0xff] }
  0x24   : > { %527 = vmatpush.bf16.msra.mxu3 %v1532_v11  ;;  %v1864_v41 = vor.u32 %v1969_v39, %v1863_v38  ;;  %v1735_v42 = vld [vmem:[%s3045_s3 + $0xf0] sm:$0xf]  ;;  %v1937_v43 = vld [vmem:[%s3045_s3 + $0xf4] sm:$0xf0]  ;;  %v1919_v50 = vld [vmem:[%s3045_s3 + $0x64] sm:$0xf0] }
  0x25   : > { %v1736_v44 = vor.u32 %v1937_v43, %v1735_v42  ;;  %v234_v46 = vld [vmem:[%s2284_s12 + $0x10] sm:$0xf]  ;;  %v1727_v51 = vld [vmem:[%s3045_s3 + $0xe0] sm:$0xf]  ;;  %v1664_v52 = vor.u32 %v1919_v50, %v1663_v49  ;;  %v1935_v53 = vld [vmem:[%s3045_s3 + $0xe4] sm:$0xf0] }
  0x26   : > { %459 = vmatpush.bf16.msra.mxu0 %v1504_v16  ;;  %v286_v47 = vunpack.c.l.b16 %v234_v46  ;;  %v1728_v54 = vor.u32 %v1935_v53, %v1727_v51  ;;  %v1655_v55 = vld [vmem:[%s3045_s3 + $0x50] sm:$0xf]  ;;  %v1917_v56 = vld [vmem:[%s3045_s3 + $0x54] sm:$0xf0]  ;;  %v1791_v60 = vld [vmem:[%s3045_s3 + $0x160] sm:$0xf] }
  0x27   : > { %482 = vmatpush.bf16.msra.mxu1 %v1508_v18  ;;  %505 = vmatpush.bf16.msra.mxu2 %v1512_v19  ;;  %v1719_v57 = vld [vmem:[%s3045_s3 + $0xd0] sm:$0xf]  ;;  %v1656_v58 = vor.u32 %v1917_v56, %v1655_v55  ;;  %v1933_v59 = vld [vmem:[%s3045_s3 + $0xd4] sm:$0xf0]  ;;  %v1951_v61 = vld [vmem:[%s3045_s3 + $0x164] sm:$0xf0] }
  0x28   : > { %528 = vmatpush.bf16.msra.mxu3 %v1516_v23  ;;  %v289_v48 = vpack.c.b16 %v286_v47, %v286_v47  ;;  %v1855_v62 = vld [vmem:[%s3045_s3 + $0x1e0] sm:$0xf]  ;;  %v1720_v63 = vor.u32 %v1933_v59, %v1719_v57  ;;  %v1792_v0 = vor.u32 %v1951_v61, %v1791_v60  ;;  %v1967_v1 = vld [vmem:[%s3045_s3 + $0x1e4] sm:$0xf0]  ;;  %v1783_v8 = vld [vmem:[%s3045_s3 + $0x150] sm:$0xf] }
  0x29   : > { %v1856_v2 = vor.u32 %v1967_v1, %v1855_v62  ;;  %v1647_v3 = vld [vmem:[%s3045_s3 + $0x40] sm:$0xf]  ;;  %v1915_v4 = vld [vmem:[%s3045_s3 + $0x44] sm:$0xf0]  ;;  %v1949_v9 = vld [vmem:[%s3045_s3 + $0x154] sm:$0xf0] }
  0x2a   : > { %460 = vmatpush.bf16.msra.mxu0 %v1488_v28  ;;  %v1711_v5 = vld [vmem:[%s3045_s3 + $0xc0] sm:$0xf]  ;;  %v1648_v6 = vor.u32 %v1915_v4, %v1647_v3  ;;  %v1931_v7 = vld [vmem:[%s3045_s3 + $0xc4] sm:$0xf0]  ;;  %v1847_v10 = vld [vmem:[%s3045_s3 + $0x1d0] sm:$0xf]  ;;  %v1784_v12 = vor.u32 %v1949_v9, %v1783_v8 }
  0x2b   : > { %483 = vmatpush.bf16.msra.mxu1 %v1492_v29  ;;  %506 = vmatpush.bf16.msra.mxu2 %v1496_v30  ;;  %v1712_v11 = vor.u32 %v1931_v7, %v1711_v5  ;;  %v1965_v13 = vld [vmem:[%s3045_s3 + $0x1d4] sm:$0xf0]  ;;  %v1639_v15 = vld [vmem:[%s3045_s3 + $0x30] sm:$0xf]  ;;  %v1775_v20 = vld [vmem:[%s3045_s3 + $0x140] sm:$0xf] }
  0x2c   : > { %529 = vmatpush.bf16.msra.mxu3 %v1500_v31  ;;  %v1848_v14 = vor.u32 %v1965_v13, %v1847_v10  ;;  %v1913_v16 = vld [vmem:[%s3045_s3 + $0x34] sm:$0xf0]  ;;  %v1703_v17 = vld [vmem:[%s3045_s3 + $0xb0] sm:$0xf]  ;;  %v1947_v21 = vld [vmem:[%s3045_s3 + $0x144] sm:$0xf0] }
  0x2d   : > { %461 = vmatmul.bf16.vlgmr.msra.gmra.mxu0 %v1872_v32  ;;  %v1640_v18 = vor.u32 %v1913_v16, %v1639_v15  ;;  %v1929_v19 = vld [vmem:[%s3045_s3 + $0xb4] sm:$0xf0]  ;;  %v1839_v22 = vld [vmem:[%s3045_s3 + $0x1c0] sm:$0xf]  ;;  %v1776_v24 = vor.u32 %v1947_v21, %v1775_v20  ;;  %v1963_v25 = vld [vmem:[%s3045_s3 + $0x1c4] sm:$0xf0] }
  0x2e   : > { %484 = vmatmul.bf16.vlgmr.msra.gmra.mxu1 %v1872_v32  ;;  %507 = vmatmul.bf16.vlgmr.msra.gmra.mxu2 %v1872_v32  ;;  %v1704_v23 = vor.u32 %v1929_v19, %v1703_v17  ;;  %v1840_v26 = vor.u32 %v1963_v25, %v1839_v22  ;;  %v1631_v27 = vld [vmem:[%s3045_s3 + $0x20] sm:$0xf]  ;;  %v1911_v28 = vld [vmem:[%s3045_s3 + $0x24] sm:$0xf0]  ;;  %v1767_v33 = vld [vmem:[%s3045_s3 + $0x130] sm:$0xf] }
  0x2f   : > { %530 = vmatmul.bf16.vlgmr.msra.gmra.mxu3 %v1872_v32  ;;  %1173 = vmatpush.bf16.msrb.mxu2 %v1800_v36  ;;  %v1695_v29 = vld [vmem:[%s3045_s3 + $0xa0] sm:$0xf]  ;;  %v1632_v31 = vor.u32 %v1911_v28, %v1631_v27  ;;  %v1927_v32 = vld [vmem:[%s3045_s3 + $0xa4] sm:$0xf0]  ;;  %v1945_v34 = vld [vmem:[%s3045_s3 + $0x134] sm:$0xf0] }
  0x30   : > { %1127 = vmatpush.bf16.msrb.mxu0 %v1672_v40  ;;  %1196 = vmatpush.bf16.msrb.mxu3 %v1864_v41  ;;  %v267_v30 = vld [vmem:[%s3044_s2] sm:$0xf]  ;;  %v1831_v35 = vld [vmem:[%s3045_s3 + $0x1b0] sm:$0xf]  ;;  %v1696_v36 = vor.u32 %v1927_v32, %v1695_v29  ;;  %v1768_v37 = vor.u32 %v1945_v34, %v1767_v33  ;;  %v1961_v38 = vld [vmem:[%s3045_s3 + $0x1b4] sm:$0xf0] }
  0x31   : > { %1150 = vmatpush.bf16.msrb.mxu1 %v1736_v44  ;;  %v1832_v39 = vor.u32 %v1961_v38, %v1831_v35  ;;  %v1623_v40 = vld [vmem:[%s3045_s3 + $0x10] sm:$0xf]  ;;  %v1909_v41 = vld [vmem:[%s3045_s3 + $0x14] sm:$0xf0]  ;;  %v2433_v43 = vperm.slane %v267_v30, 0  ;;  %v2435_v44 = vperm.slane %v267_v30, 1 }
  0x32   : > { %v1687_v42 = vld [vmem:[%s3045_s3 + $0x90] sm:$0xf]  ;;  %v1925_v46 = vld [vmem:[%s3045_s3 + $0x94] sm:$0xf0]  ;;  %v1759_v47 = vld [vmem:[%s3045_s3 + $0x120] sm:$0xf] }
  0x33   : > { %1174 = vmatpush.bf16.msrb.mxu2 %v1792_v0  ;;  %v1823_v49 = vld [vmem:[%s3045_s3 + $0x1a0] sm:$0xf]  ;;  %v1688_v50 = vor.u32 %v1925_v46, %v1687_v42  ;;  %v1907_v56 = vld [vmem:[%s3045_s3 + $0x4] sm:$0xf0]  ;;  %v1941_v0 = vld [vmem:[%s3045_s3 + $0x114] sm:$0xf0] }
  0x34   : > { %1128 = vmatpush.bf16.msrb.mxu0 %v1664_v52  ;;  %1197 = vmatpush.bf16.msrb.mxu3 %v1856_v2  ;;  %v1959_v52 = vld [vmem:[%s3045_s3 + $0x1a4] sm:$0xf0]  ;;  %v1615_v55 = vld [vmem:[%s3045_s3] sm:$0xf]  ;;  %v1815_v1 = vld [vmem:[%s3045_s3 + $0x190] sm:$0xf] }
  0x35   : > { %1151 = vmatpush.bf16.msrb.mxu1 %v1728_v54  ;;  %v1824_v54 = vor.u32 %v1959_v52, %v1823_v49  ;;  %v1679_v57 = vld [vmem:[%s3045_s3 + $0x80] sm:$0xf]  ;;  %v1616_v60 = vor.u32 %v1907_v56, %v1615_v55  ;;  %v1923_v61 = vld [vmem:[%s3045_s3 + $0x84] sm:$0xf0]  ;;  %v1957_v5 = vld [vmem:[%s3045_s3 + $0x194] sm:$0xf0] }
  0x36   : > { %v1680_v2 = vor.u32 %v1923_v61, %v1679_v57  ;;  %v2486_v7 = vperm.slane %v267_v30, 2  ;;  %v1816_v8 = vor.u32 %v1957_v5, %v1815_v1  ;;  %v2489_v10 = vperm.slane %v267_v30, 3  ;;  %v1939_v19 = vld [vmem:[%s3045_s3 + $0x104] sm:$0xf0]  ;;  %v1807_v25 = vld [vmem:[%s3045_s3 + $0x180] sm:$0xf] }
  0x37   : > { %1175 = vmatpush.bf16.msrb.mxu2 %v1784_v12 }
  0x38   : > { %1129 = vmatpush.bf16.msrb.mxu0 %v1656_v58  ;;  %1198 = vmatpush.bf16.msrb.mxu3 %v1848_v14 }
  0x39   : > { %1152 = vmatpush.bf16.msrb.mxu1 %v1720_v63  ;;  %v1751_v63 = vld [vmem:[%s3045_s3 + $0x110] sm:$0xf] }
  0x3a   : > { %v1752_v4 = vor.u32 %v1941_v0, %v1751_v63 }
  0x3b   : > { %1176 = vmatpush.bf16.msrb.mxu2 %v1776_v24 }
  0x3c   : > { %1130 = vmatpush.bf16.msrb.mxu0 %v1648_v6  ;;  %1199 = vmatpush.bf16.msrb.mxu3 %v1840_v26  ;;  %v1955_v26 = vld [vmem:[%s3045_s3 + $0x184] sm:$0xf0] }
  0x3d   : > { %466 = vmatmul.bf16.gmra.mxu0 %v1873_v45  ;;  %1153 = vmatpush.bf16.msrb.mxu1 %v1712_v11  ;;  %v1808_v30 = vor.u32 %v1955_v26, %v1807_v25 }
  0x3e   : > { %489 = vmatmul.bf16.gmra.mxu1 %v1873_v45  ;;  %512 = vmatmul.bf16.gmra.mxu2 %v1873_v45 }
  0x3f   : > { %535 = vmatmul.bf16.gmra.mxu3 %v1873_v45  ;;  %1177 = vmatpush.bf16.msrb.mxu2 %v1768_v37  ;;  %v1624_v45 = vor.u32 %v1909_v41, %v1623_v40 }
  0x40   : > { %1131 = vmatpush.bf16.msrb.mxu0 %v1640_v18  ;;  %1200 = vmatpush.bf16.msrb.mxu3 %v1832_v39  ;;  %v1743_v18 = vld [vmem:[%s3045_s3 + $0x100] sm:$0xf] }
  0x41   : > { %1154 = vmatpush.bf16.msrb.mxu1 %v1704_v23  ;;  %v1744_v24 = vor.u32 %v1939_v19, %v1743_v18 }
  0x44   : > { %1132 = vmatpush.bf16.msrb.mxu0 %v1632_v31  ;;  %1201 = vmatpush.bf16.msrb.mxu3 %v1824_v54 }
  0x45   : > { %1155 = vmatpush.bf16.msrb.mxu1 %v1696_v36 }
  0x48   : > { %1133 = vmatpush.bf16.msrb.mxu0 %v1624_v45  ;;  %1202 = vmatpush.bf16.msrb.mxu3 %v1816_v8 }
  0x49   : > { %1156 = vmatpush.bf16.msrb.mxu1 %v1688_v50 }
  0x4c   : > { %1134 = vmatpush.bf16.msrb.mxu0 %v1616_v60  ;;  %1203 = vmatpush.bf16.msrb.mxu3 %v1808_v30 }
  0x4d   : > { %471 = vmatmul.bf16.gmra.mxu0 %v289_v48  ;;  %1157 = vmatpush.bf16.msrb.mxu1 %v1680_v2 }
  0x4e   : > { %494 = vmatmul.bf16.gmra.mxu1 %v289_v48  ;;  %517 = vmatmul.bf16.gmra.mxu2 %v289_v48 }
  0x4f   : > { %540 = vmatmul.bf16.gmra.mxu3 %v289_v48  ;;  %v1943_v48 = vld [vmem:[%s3045_s3 + $0x124] sm:$0xf0] }
  0x50   : > { %v1760_v51 = vor.u32 %v1943_v48, %v1759_v47 }
  0x52   : > { %1178 = vmatpush.bf16.msrb.mxu2 %v1760_v51 }
  0x56   : > { %1179 = vmatpush.bf16.msrb.mxu2 %v1752_v4 }
  0x5a   : > { %1180 = vmatpush.bf16.msrb.mxu2 %v1744_v24 }
  0xaa   : > { %v462_v53 = vpop.f32.mrf.mxu0 }
  0xab   : > { %v2462_v58 = vadd.f32 %v462_v53, %v2433_v43  ;;  %v485_v59 = vpop.f32.mrf.mxu1 }
  0xac   : > { %v2468_v62 = vadd.f32 %v485_v59, %v2435_v44 }
  0xad   : > { %v545_v3 = vmul.f32 %v2462_v58, %v2462_v58 }
  0xae   : > { %v546_v6 = vmul.f32 %v2468_v62, %v2468_v62 }
  0xaf   : > { %v565_v9 = vmul.f32 %v545_v3, %v2462_v58 }
  0xb0   : > { %v566_v11 = vmul.f32 %v546_v6, %v2468_v62 }
  0xb1   : > { %v585_v12 = vmul.f32 0.044715, %v565_v9  ;;  %v508_v13 = vpop.f32.mrf.mxu2 }
  0xb2   : > { %v586_v14 = vmul.f32 0.044715, %v566_v11  ;;  %v2493_v15 = vadd.f32 %v508_v13, %v2486_v7  ;;  %v531_v16 = vpop.f32.mrf.mxu3  ;;  %v464_v17 = vpop.f32.mrf.mxu0 }
  0xb3   : > { %v605_v20 = vadd.f32 %v585_v12, %v2462_v58  ;;  %v2503_v21 = vadd.f32 %v531_v16, %v2489_v10  ;;  %v2506_v22 = vadd.f32 %v464_v17, %v2433_v43  ;;  %v487_v23 = vpop.f32.mrf.mxu1 }
  0xb4   : > { %v606_v27 = vadd.f32 %v586_v14, %v2468_v62  ;;  %v547_v28 = vmul.f32 %v2493_v15, %v2493_v15  ;;  %v2518_v29 = vadd.f32 %v487_v23, %v2435_v44 }
  0xb5   : > { %v625_v31 = vmul.f32 0.7978846, %v605_v20  ;;  %v548_v32 = vmul.f32 %v2503_v21, %v2503_v21  ;;  %v549_v33 = vmul.f32 %v2506_v22, %v2506_v22 }
  0xb6   : > { %v626_v34 = vmul.f32 0.7978846, %v606_v27  ;;  %v567_v35 = vmul.f32 %v547_v28, %v2493_v15  ;;  %v550_v36 = vmul.f32 %v2518_v29, %v2518_v29 }
  0xb7   : > { %1978 = vtanh.f32 %v625_v31  ;;  %v568_v37 = vmul.f32 %v548_v32, %v2503_v21  ;;  %v569_v38 = vmul.f32 %v549_v33, %v2506_v22 }
  0xb8   : > { %1980 = vtanh.f32 %v626_v34  ;;  %v587_v39 = vmul.f32 0.044715, %v567_v35  ;;  %v570_v40 = vmul.f32 %v550_v36, %v2518_v29 }
  0xb9   : > { %v588_v41 = vmul.f32 0.044715, %v568_v37  ;;  %v589_v42 = vmul.f32 0.044715, %v569_v38  ;;  %v510_v45 = vpop.f32.mrf.mxu2 }
  0xba   : > { %v607_v46 = vadd.f32 %v587_v39, %v2493_v15  ;;  %v590_v47 = vmul.f32 0.044715, %v570_v40  ;;  %v2532_v48 = vadd.f32 %v510_v45, %v2486_v7  ;;  %v533_v49 = vpop.f32.mrf.mxu3  ;;  %v467_v50 = vpop.f32.mrf.mxu0 }
  0xbb   : > { %v608_v51 = vadd.f32 %v588_v41, %v2503_v21  ;;  %v609_v52 = vadd.f32 %v589_v42, %v2506_v22  ;;  %v2537_v53 = vadd.f32 %v533_v49, %v2489_v10  ;;  %v2540_v54 = vadd.f32 %v467_v50, %v2433_v43  ;;  %v490_v55 = vpop.f32.mrf.mxu1 }
  0xbc   : > { %v627_v56 = vmul.f32 0.7978846, %v607_v46  ;;  %v610_v57 = vadd.f32 %v590_v47, %v2518_v29  ;;  %v551_v59 = vmul.f32 %v2532_v48, %v2532_v48  ;;  %v2546_v60 = vadd.f32 %v490_v55, %v2435_v44 }
  0xbd   : > { %v1979_v61 = vpop.eup %1978  ;;  %v628_v63 = vmul.f32 0.7978846, %v608_v51  ;;  %v629_v0 = vmul.f32 0.7978846, %v609_v52  ;;  %v552_v1 = vmul.f32 %v2537_v53, %v2537_v53  ;;  %v553_v2 = vmul.f32 %v2540_v54, %v2540_v54 }
  0xbe   : > { %v1981_v3 = vpop.eup %1980  ;;  %1982 = vtanh.f32 %v627_v56  ;;  %v630_v4 = vmul.f32 0.7978846, %v610_v57  ;;  %v571_v5 = vmul.f32 %v551_v59, %v2532_v48  ;;  %v554_v6 = vmul.f32 %v2546_v60, %v2546_v60 }
  0xbf   : > { %1984 = vtanh.f32 %v628_v63  ;;  %v572_v8 = vmul.f32 %v552_v1, %v2537_v53  ;;  %v573_v9 = vmul.f32 %v553_v2, %v2540_v54  ;;  %v665_v11 = vadd.f32 1.0, %v1979_v61 }
  0xc0   : > { %1986 = vtanh.f32 %v629_v0  ;;  %v591_v12 = vmul.f32 0.044715, %v571_v5  ;;  %v574_v13 = vmul.f32 %v554_v6, %v2546_v60  ;;  %v666_v14 = vadd.f32 1.0, %v1981_v3 }
  0xc1   : > { %1988 = vtanh.f32 %v630_v4  ;;  %v592_v16 = vmul.f32 0.044715, %v572_v8  ;;  %v593_v17 = vmul.f32 0.044715, %v573_v9  ;;  %v513_v18 = vpop.f32.mrf.mxu2  ;;  %v685_v19 = vmul.f32 0.5, %v665_v11 }
  0xc2   : > { %v611_v20 = vadd.f32 %v591_v12, %v2532_v48  ;;  %v594_v23 = vmul.f32 0.044715, %v574_v13  ;;  %v2560_v24 = vadd.f32 %v513_v18, %v2486_v7  ;;  %v536_v25 = vpop.f32.mrf.mxu3  ;;  %v469_v26 = vpop.f32.mrf.mxu0  ;;  %v686_v27 = vmul.f32 0.5, %v666_v14 }
  0xc3   : > { %v612_v28 = vadd.f32 %v592_v16, %v2537_v53  ;;  %v2564_v30 = vadd.f32 %v593_v17, %v2540_v54  ;;  %v2567_v31 = vadd.f32 %v536_v25, %v2489_v10  ;;  %v2570_v32 = vadd.f32 %v469_v26, %v2433_v43  ;;  %v492_v33 = vpop.f32.mrf.mxu1 }
  0xc4   : > { %v1983_v34 = vpop.eup %1982  ;;  %v631_v35 = vmul.f32 0.7978846, %v611_v20  ;;  %v2573_v36 = vadd.f32 %v594_v23, %v2546_v60  ;;  %v555_v37 = vmul.f32 %v2560_v24, %v2560_v24  ;;  %v2578_v38 = vadd.f32 %v492_v33, %v2435_v44 }
  0xc5   : > { %v1985_v39 = vpop.eup %1984  ;;  %v632_v40 = vmul.f32 0.7978846, %v612_v28  ;;  %v556_v41 = vmul.f32 %v2567_v31, %v2567_v31  ;;  %v557_v42 = vmul.f32 %v2570_v32, %v2570_v32  ;;  %v705_v45 = vmul.f32 %v685_v19, %v2462_v58 }
  0xc6   : > { %v1987_v46 = vpop.eup %1986  ;;  %1990 = vtanh.f32 %v631_v35  ;;  %v575_v47 = vmul.f32 %v555_v37, %v2560_v24  ;;  %v558_v49 = vmul.f32 %v2578_v38, %v2578_v38  ;;  %v706_v50 = vmul.f32 %v686_v27, %v2468_v62 }
  0xc7   : > { %v1989_v51 = vpop.eup %1988  ;;  %1992 = vtanh.f32 %v632_v40  ;;  %v576_v52 = vmul.f32 %v556_v41, %v2567_v31  ;;  %v577_v55 = vmul.f32 %v557_v42, %v2570_v32  ;;  %v669_v56 = vadd.f32 1.0, %v1987_v46  ;;  %v1801_v41 = vld [vmem:[%s3045_s3 + $0x178] sm:$0xf0]  ;;  %v1920_v42 = vld [vmem:[%s3045_s3 + $0x74] sm:$0xf] }
  0xc8   : > { %v595_v57 = vmul.f32 0.044715, %v575_v47  ;;  %v578_v59 = vmul.f32 %v558_v49, %v2578_v38  ;;  %v670_v58 = vadd.f32 1.0, %v1989_v51  ;;  %v667_v61 = vadd.f32 1.0, %v1983_v34  ;;  %v1968_v51 = vld [vmem:[%s3045_s3 + $0x1f4] sm:$0xf] }
  0xc9   : > { %v596_v63 = vmul.f32 0.044715, %v576_v52  ;;  %v597_v0 = vmul.f32 0.044715, %v577_v55  ;;  %v515_v1 = vpop.f32.mrf.mxu2  ;;  %v689_v2 = vmul.f32 0.5, %v669_v56  ;;  %v668_v3 = vadd.f32 1.0, %v1985_v39 }
  0xca   : > { %v2593_v4 = vadd.f32 %v595_v57, %v2560_v24  ;;  %v598_v62 = vmul.f32 0.044715, %v578_v59  ;;  %v2596_v5 = vadd.f32 %v515_v1, %v2486_v7  ;;  %v538_v6 = vpop.f32.mrf.mxu3  ;;  %v472_v8 = vpop.f32.mrf.mxu0  ;;  %v690_v9 = vmul.f32 0.5, %v670_v58  ;;  %v1865_v52 = vld [vmem:[%s3045_s3 + $0x1f8] sm:$0xf0] }
  0xcb   : > { %v2599_v11 = vadd.f32 %v596_v63, %v2567_v31  ;;  %v2602_v12 = vadd.f32 %v597_v0, %v2570_v32  ;;  %v2605_v13 = vadd.f32 %v538_v6, %v2489_v10  ;;  %v2608_v14 = vadd.f32 %v472_v8, %v2433_v43  ;;  %v495_v16 = vpop.f32.mrf.mxu1  ;;  %v1936_v55 = vld [vmem:[%s3045_s3 + $0xf4] sm:$0xf]  ;;  %v1737_v56 = vld [vmem:[%s3045_s3 + $0xf8] sm:$0xf0]  ;;  %v2668_v57 = vld [vmem:[%s3045_s3 + $0x168] sm:$0xf0] }
  0xcc   : > { %v1991_v17 = vpop.eup %1990  ;;  %v2611_v18 = vadd.f32 %v598_v62, %v2578_v38  ;;  %v559_v19 = vmul.f32 %v2596_v5, %v2596_v5  ;;  %v2616_v20 = vadd.f32 %v495_v16, %v2435_v44  ;;  %v709_v23 = vmul.f32 %v689_v2, %v2506_v22  ;;  %v2677_v1 = vld [vmem:[%s3045_s3 + $0x64] sm:$0xf]  ;;  %v2682_v2 = vld [vmem:[%s3045_s3 + $0x68] sm:$0xf0] }
  0xcd   : > { %v1993_v25 = vpop.eup %1992  ;;  %v560_v26 = vmul.f32 %v2605_v13, %v2605_v13  ;;  %v561_v43 = vmul.f32 %v2608_v14, %v2608_v14  ;;  %v710_v27 = vmul.f32 %v690_v9, %v2518_v29  ;;  %v671_v28 = vadd.f32 1.0, %v1991_v17  ;;  %v1952_v29 = vld [vmem:[%s3045_s3 + $0x174] sm:$0xf]  ;;  %v2695_v16 = vld [vmem:[%s3045_s3 + $0x1e4] sm:$0xf] }
  0xce   : > { %v579_v33 = vmul.f32 %v559_v19, %v2596_v5  ;;  %v562_v34 = vmul.f32 %v2616_v20, %v2616_v20  ;;  %v2627_v35 = vpack.c.bf16 %v709_v23, %v705_v45  ;;  %v687_v44 = vmul.f32 0.5, %v667_v61  ;;  %v1673_v45 = vld [vmem:[%s3045_s3 + $0x78] sm:$0xf0] }
  0xcf   : > { %v580_v22 = vmul.f32 %v560_v26, %v2605_v13  ;;  %v581_v37 = vmul.f32 %v561_v43, %v2608_v14  ;;  %v2631_v39 = vpack.c.bf16 %v710_v27, %v706_v50  ;;  %v691_v40 = vmul.f32 0.5, %v671_v28  ;;  %v1857_v26 = vld [vmem:[%s3045_s3 + $0x1e8] sm:$0xf0]  ;;  %v1934_v43 = vld [vmem:[%s3045_s3 + $0xe4] sm:$0xf] }
  0xd0   : > { %v599_v46 = vmul.f32 0.044715, %v579_v33  ;;  %v582_v47 = vmul.f32 %v562_v34, %v2616_v20  ;;  %1135 = vmatmul.bf16.vlgmr.msrb.gmra.mxu0 %v2627_v35  ;;  %v707_v49 = vmul.f32 %v687_v44, %v2493_v15  ;;  %v672_v50 = vadd.f32 1.0, %v1993_v25  ;;  %v2663_v15 = vld [vmem:[%s3045_s3 + $0x164] sm:$0xf] }
  0xd1   : > { %v600_v59 = vmul.f32 0.044715, %v580_v22  ;;  %v2670_v58 = vmul.f32 0.044715, %v581_v37  ;;  %1158 = vmatmul.bf16.vlgmr.msrb.gmra.mxu1 %v2631_v39  ;;  %v518_v61 = vpop.f32.mrf.mxu2  ;;  %v711_v63 = vmul.f32 %v691_v40, %v2532_v48  ;;  %v688_v0 = vmul.f32 0.5, %v668_v3 }
  0xd2   : > { %v2685_v62 = vadd.f32 %v599_v46, %v2596_v5  ;;  %v2687_v6 = vmul.f32 0.044715, %v582_v47  ;;  %v2690_v8 = vadd.f32 %v518_v61, %v2486_v7  ;;  %v541_v48 = vpop.f32.mrf.mxu3  ;;  %v692_v3 = vmul.f32 0.5, %v672_v50  ;;  %v474_v9 = vpop.f32.mrf.mxu0  ;;  %v1729_v27 = vld [vmem:[%s3045_s3 + $0xe8] sm:$0xf0] }
  0xd3   : > { %v2698_v17 = vadd.f32 %v600_v59, %v2605_v13  ;;  %v2701_v19 = vadd.f32 %v541_v48, %v2489_v10  ;;  %v2703_v23 = vpack.c.bf16 %v711_v63, %v707_v49  ;;  %v708_v25 = vmul.f32 %v688_v0, %v2503_v21  ;;  %v497_v7 = vpop.f32.mrf.mxu1  ;;  %v2721_v34 = vld [vmem:[%s3045_s3 + $0x154] sm:$0xf]  ;;  %v2726_v44 = vld [vmem:[%s3045_s3 + $0x158] sm:$0xf0]  ;;  %v2781_v59 = vld [vmem:[%s3045_s3 + $0x148] sm:$0xf0] }
  0xd4   : > { %v563_v10 = vmul.f32 %v2690_v8, %v2690_v8  ;;  %v712_v28 = vmul.f32 %v692_v3, %v2537_v53  ;;  %v1804_v33 = vor.u32 %v1952_v29, %v1801_v41  ;;  %v1676_v21 = vor.u32 %v1920_v42, %v1673_v45  ;;  %v2731_v22 = vld [vmem:[%s3045_s3 + $0x54] sm:$0xf]  ;;  %v2741_v41 = vld [vmem:[%s3045_s3 + $0x58] sm:$0xf0]  ;;  %v2786_v61 = vld [vmem:[%s3045_s3 + $0x44] sm:$0xf] }
  0xd5   : > { %v564_v53 = vmul.f32 %v2701_v19, %v2701_v19  ;;  %1181 = vmatmul.bf16.vlgmr.msrb.gmra.mxu2 %v2703_v23  ;;  %v1868_v37 = vor.u32 %v1968_v51, %v1865_v52  ;;  %v1740_v40 = vor.u32 %v1936_v55, %v1737_v56  ;;  %v1796_v29 = vor.u32 %v2663_v15, %v2668_v57  ;;  %v2746_v42 = vld [vmem:[%s3045_s3 + $0x1d4] sm:$0xf]  ;;  %v2751_v45 = vld [vmem:[%s3045_s3 + $0x1d8] sm:$0xf0]  ;;  %v2776_v57 = vld [vmem:[%s3045_s3 + $0x144] sm:$0xf] }
  0xd6   : > { %v583_v46 = vmul.f32 %v563_v10, %v2690_v8  ;;  %v2754_v47 = vpack.c.bf16 %v712_v28, %v708_v25  ;;  %1265 = vmatpush.bf16.msra.mxu2 %v1804_v33  ;;  %1219 = vmatpush.bf16.msra.mxu0 %v1676_v21  ;;  %v1668_v49 = vor.u32 %v2677_v1, %v2682_v2  ;;  %v633_v50 = vmul.f32 0.7978846, %v2564_v30  ;;  %v2762_v51 = vld [vmem:[%s3045_s3 + $0xd4] sm:$0xf]  ;;  %v2767_v52 = vld [vmem:[%s3045_s3 + $0xd8] sm:$0xf0] }
  0xd7   : > { %v584_v55 = vmul.f32 %v564_v53, %v2701_v19  ;;  %1288 = vmatpush.bf16.msra.mxu3 %v1868_v37  ;;  %1242 = vmatpush.bf16.msra.mxu1 %v1740_v40  ;;  %v1860_v56 = vor.u32 %v2695_v16, %v1857_v26  ;;  %v637_v15 = vmul.f32 0.7978846, %v2602_v12  ;;  %v634_v30 = vmul.f32 0.7978846, %v2573_v36  ;;  %v2791_v12 = vld [vmem:[%s3045_s3 + $0x48] sm:$0xf0] }
  0xd8   : > { %v2793_v36 = vmul.f32 0.044715, %v583_v46  ;;  %1204 = vmatmul.bf16.vlgmr.msrb.gmra.mxu3 %v2754_v47  ;;  %1994 = vtanh.f32 %v633_v50  ;;  %v638_v63 = vmul.f32 0.7978846, %v2611_v18  ;;  %v1732_v0 = vor.u32 %v1934_v43, %v1729_v27  ;;  %v2800_v1 = vld [vmem:[%s3045_s3 + $0x1c4] sm:$0xf] }
  0xd9   : > { %v2805_v2 = vld [vmem:[%s3045_s3 + $0x1c8] sm:$0xf0]  ;;  %v2810_v48 = vld [vmem:[%s3045_s3 + $0xc4] sm:$0xf]  ;;  %v2817_v3 = vmul.f32 0.044715, %v584_v55  ;;  %v520_v9 = vpop.f32.mrf.mxu2  ;;  %1996 = vtanh.f32 %v637_v15  ;;  %v1788_v16 = vor.u32 %v2721_v34, %v2726_v44  ;;  %v1660_v25 = vor.u32 %v2731_v22, %v2741_v41 }
  0xda   : > { %v2815_v18 = vld [vmem:[%s3045_s3 + $0xc8] sm:$0xf0]  ;;  %v2826_v7 = vld [vmem:[%s3045_s3 + $0x134] sm:$0xf]  ;;  %v2831_v26 = vld [vmem:[%s3045_s3 + $0x138] sm:$0xf0]  ;;  %v543_v43 = vpop.f32.mrf.mxu3  ;;  %1266 = vmatpush.bf16.msra.mxu2 %v1796_v29  ;;  %1220 = vmatpush.bf16.msra.mxu0 %v1668_v49  ;;  %1998 = vtanh.f32 %v634_v30  ;;  %v1852_v27 = vor.u32 %v2746_v42, %v2751_v45  ;;  %v1724_v44 = vor.u32 %v2762_v51, %v2767_v52  ;;  %v1652_v22 = vor.u32 %v2786_v61, %v2791_v12 }
  0xdb   : > { %v635_v10 = vmul.f32 0.7978846, %v2593_v4  ;;  %v639_v28 = vmul.f32 0.7978846, %v2685_v62  ;;  %v2840_v33 = vld [vmem:[%s3045_s3 + $0x34] sm:$0xf]  ;;  %1289 = vmatpush.bf16.msra.mxu3 %v1860_v56  ;;  %2000 = vtanh.f32 %v638_v63  ;;  %1243 = vmatpush.bf16.msra.mxu1 %v1732_v0  ;;  %v1780_v62 = vor.u32 %v2776_v57, %v2781_v59 }
  0xdc   : > { %v636_v21 = vmul.f32 0.7978846, %v2599_v11  ;;  %v640_v34 = vmul.f32 0.7978846, %v2698_v17  ;;  %v2849_v4 = vld [vmem:[%s3045_s3 + $0x38] sm:$0xf0]  ;;  %v1844_v37 = vor.u32 %v2800_v1, %v2805_v2  ;;  %v1716_v40 = vor.u32 %v2810_v48, %v2815_v18 }
  0xdd   : > { %2002 = vtanh.f32 %v635_v10  ;;  %v2858_v11 = vld [vmem:[%s3045_s3 + $0x1b4] sm:$0xf]  ;;  %v2863_v17 = vld [vmem:[%s3045_s3 + $0x1b8] sm:$0xf0]  ;;  %v621_v29 = vadd.f32 %v2670_v58, %v2608_v14  ;;  %v2884_v42 = vld [vmem:[%s3045_s3 + $0x124] sm:$0xf]  ;;  %v1772_v58 = vor.u32 %v2826_v7, %v2831_v26  ;;  %v622_v49 = vadd.f32 %v2687_v6, %v2616_v20 }
  0xde   : > { %v2868_v53 = vld [vmem:[%s3045_s3 + $0xb4] sm:$0xf]  ;;  %2004 = vtanh.f32 %v639_v28  ;;  %v2879_v41 = vld [vmem:[%s3045_s3 + $0xb8] sm:$0xf0]  ;;  %v2889_v45 = vld [vmem:[%s3045_s3 + $0x128] sm:$0xf0]  ;;  %v1995_v46 = vpop.eup %1994  ;;  %1267 = vmatpush.bf16.msra.mxu2 %v1788_v16  ;;  %1221 = vmatpush.bf16.msra.mxu0 %v1660_v25  ;;  %v1644_v50 = vor.u32 %v2840_v33, %v2849_v4  ;;  %v1836_v6 = vor.u32 %v2858_v11, %v2863_v17  ;;  %v623_v16 = vadd.f32 %v2793_v36, %v2690_v8 }
  0xdf   : > { %2006 = vtanh.f32 %v636_v21  ;;  %v2900_v51 = vld [vmem:[%s3045_s3 + $0x24] sm:$0xf]  ;;  %v2905_v52 = vld [vmem:[%s3045_s3 + $0x28] sm:$0xf0]  ;;  %v1997_v55 = vpop.eup %1996  ;;  %v673_v56 = vadd.f32 1.0, %v1995_v46  ;;  %1290 = vmatpush.bf16.msra.mxu3 %v1852_v27  ;;  %1244 = vmatpush.bf16.msra.mxu1 %v1724_v44  ;;  %v1708_v61 = vor.u32 %v2868_v53, %v2879_v41  ;;  %v1764_v12 = vor.u32 %v2884_v42, %v2889_v45 }
  0xe0   : > { %2008 = vtanh.f32 %v640_v34  ;;  %v641_v15 = vmul.f32 0.7978846, %v621_v29  ;;  %v1999_v30 = vpop.eup %1998  ;;  %v677_v57 = vadd.f32 1.0, %v1997_v55  ;;  %v642_v59 = vmul.f32 0.7978846, %v622_v49 }
  0xe1   : > { %v2001_v63 = vpop.eup %2000  ;;  %v693_v0 = vmul.f32 0.5, %v673_v56  ;;  %v674_v1 = vadd.f32 1.0, %v1999_v30  ;;  %v1636_v2 = vor.u32 %v2900_v51, %v2905_v52  ;;  %v1926_v27 = vld [vmem:[%s3045_s3 + $0xa4] sm:$0xf]  ;;  %v1697_v10 = vld [vmem:[%s3045_s3 + $0xa8] sm:$0xf0]  ;;  %v624_v28 = vadd.f32 %v2817_v3, %v2701_v19 }
  0xe2   : > { %2010 = vtanh.f32 %v641_v15  ;;  %v697_v18 = vmul.f32 0.5, %v677_v57  ;;  %v678_v9 = vadd.f32 1.0, %v2001_v63  ;;  %1268 = vmatpush.bf16.msra.mxu2 %v1780_v62  ;;  %1222 = vmatpush.bf16.msra.mxu0 %v1652_v22  ;;  %v643_v34 = vmul.f32 0.7978846, %v623_v16  ;;  %v1958_v44 = vld [vmem:[%s3045_s3 + $0x1a4] sm:$0xf] }
  0xe3   : > { %v2003_v48 = vpop.eup %2002  ;;  %2012 = vtanh.f32 %v642_v59  ;;  %v713_v7 = vmul.f32 %v693_v0, %v2540_v54  ;;  %v694_v26 = vmul.f32 0.5, %v674_v1  ;;  %1291 = vmatpush.bf16.msra.mxu3 %v1844_v37  ;;  %1245 = vmatpush.bf16.msra.mxu1 %v1716_v40  ;;  %v644_v17 = vmul.f32 0.7978846, %v624_v28  ;;  %v1825_v3 = vld [vmem:[%s3045_s3 + $0x1a8] sm:$0xf0] }
  0xe4   : > { %v2005_v25 = vpop.eup %2004  ;;  %v675_v43 = vadd.f32 1.0, %v2003_v48  ;;  %v717_v36 = vmul.f32 %v697_v18, %v2570_v32  ;;  %v698_v21 = vmul.f32 0.5, %v678_v9  ;;  %v1908_v29 = vld [vmem:[%s3045_s3 + $0x14] sm:$0xf]  ;;  %v1700_v55 = vor.u32 %v1926_v27, %v1697_v10  ;;  %v1753_v57 = vld [vmem:[%s3045_s3 + $0x118] sm:$0xf0] }
  0xe5   : > { %v2007_v33 = vpop.eup %2006  ;;  %v679_v54 = vadd.f32 1.0, %v2005_v25  ;;  %v714_v62 = vmul.f32 %v694_v26, %v2546_v60  ;;  %v1625_v60 = vld [vmem:[%s3045_s3 + $0x18] sm:$0xf0]  ;;  %2014 = vtanh.f32 %v643_v34  ;;  %v1940_v30 = vld [vmem:[%s3045_s3 + $0x114] sm:$0xf] }
  0xe6   : > { %v2009_v4 = vpop.eup %2008  ;;  %v695_v22 = vmul.f32 0.5, %v675_v43  ;;  %v676_v11 = vadd.f32 1.0, %v2007_v33  ;;  %v2934_v53 = vpack.c.bf16 %v717_v36, %v713_v7  ;;  %v718_v32 = vmul.f32 %v698_v21, %v2578_v38  ;;  %1269 = vmatpush.bf16.msra.mxu2 %v1772_v58  ;;  %1223 = vmatpush.bf16.msra.mxu0 %v1644_v50  ;;  %v1924_v38 = vld [vmem:[%s3045_s3 + $0x94] sm:$0xf]  ;;  %v1689_v58 = vld [vmem:[%s3045_s3 + $0x98] sm:$0xf0] }
  0xe7   : > { %v699_v37 = vmul.f32 0.5, %v679_v54  ;;  %v680_v40 = vadd.f32 1.0, %v2009_v4  ;;  %1292 = vmatpush.bf16.msra.mxu3 %v1836_v6  ;;  %1246 = vmatpush.bf16.msra.mxu1 %v1708_v61  ;;  %v1828_v6 = vor.u32 %v1958_v44, %v1825_v3  ;;  %2016 = vtanh.f32 %v644_v17  ;;  %v1956_v59 = vld [vmem:[%s3045_s3 + $0x194] sm:$0xf]  ;;  %v1817_v61 = vld [vmem:[%s3045_s3 + $0x198] sm:$0xf0] }
  0xe8   : > { %v2011_v41 = vpop.eup %2010  ;;  %v715_v46 = vmul.f32 %v695_v22, %v2560_v24  ;;  %v696_v49 = vmul.f32 0.5, %v676_v11  ;;  %1140 = vmatmul.bf16.gmra.mxu0 %v2934_v53  ;;  %v2951_v56 = vpack.c.bf16 %v718_v32, %v714_v62  ;;  %v1906_v48 = vld [vmem:[%s3045_s3 + $0x4] sm:$0xf]  ;;  %v1628_v18 = vor.u32 %v1908_v29, %v1625_v60  ;;  %v1745_v42 = vld [vmem:[%s3045_s3 + $0x108] sm:$0xf0] }
  0xe9   : > { %v2013_v50 = vpop.eup %2012  ;;  %v719_v24 = vmul.f32 %v699_v37, %v2596_v5  ;;  %v700_v15 = vmul.f32 0.5, %v680_v40  ;;  %v681_v1 = vadd.f32 1.0, %v2011_v41  ;;  %v1692_v9 = vor.u32 %v1924_v38, %v1689_v58  ;;  %v1954_v7 = vld [vmem:[%s3045_s3 + $0x184] sm:$0xf]  ;;  %v1809_v26 = vld [vmem:[%s3045_s3 + $0x188] sm:$0xf0] }
  0xea   : > { %1163 = vmatmul.bf16.gmra.mxu1 %v2951_v56  ;;  %v716_v63 = vmul.f32 %v696_v49, %v2567_v31  ;;  %1270 = vmatpush.bf16.msra.mxu2 %v1764_v12  ;;  %v1756_v16 = vor.u32 %v1940_v30, %v1753_v57  ;;  %v1617_v31 = vld [vmem:[%s3045_s3 + $0x8] sm:$0xf0]  ;;  %v682_v51 = vadd.f32 1.0, %v2013_v50  ;;  %v1820_v52 = vor.u32 %v1956_v59, %v1817_v61  ;;  %v1922_v12 = vld [vmem:[%s3045_s3 + $0x84] sm:$0xf] }
  0xeb   : > { %v731_v5 = vpack.c.bf16 %v719_v24, %v715_v46  ;;  %v720_v0 = vmul.f32 %v700_v15, %v2605_v13  ;;  %1224 = vmatpush.bf16.msra.mxu0 %v1636_v2  ;;  %1247 = vmatpush.bf16.msra.mxu1 %v1700_v55  ;;  %v1938_v13 = vld [vmem:[%s3045_s3 + $0x104] sm:$0xf]  ;;  %v1681_v2 = vld [vmem:[%s3045_s3 + $0x88] sm:$0xf0]  ;;  %v2015_v25 = vpop.eup %2014  ;;  %v701_v43 = vmul.f32 0.5, %v681_v1  ;;  %v1620_v33 = vor.u32 %v1906_v48, %v1617_v31 }
  0xec   : > { %1293 = vmatpush.bf16.msra.mxu3 %v1828_v6  ;;  %v683_v27 = vadd.f32 1.0, %v2015_v25  ;;  %v1748_v10 = vor.u32 %v1938_v13, %v1745_v42  ;;  %v1684_v36 = vor.u32 %v1922_v12, %v1681_v2  ;;  %v702_v21 = vmul.f32 0.5, %v682_v51 }
  0xed   : > { %1186 = vmatmul.bf16.gmra.mxu2 %v731_v5  ;;  %v732_v45 = vpack.c.bf16 %v720_v0, %v716_v63  ;;  %v2017_v28 = vpop.eup %2016  ;;  %v1812_v34 = vor.u32 %v1954_v7, %v1809_v26  ;;  %v721_v44 = vmul.f32 %v701_v43, %v2608_v14  ;;  %v3012_v14 = vld [vmem:[%s3046_s4] sm:$0x3] }
  0xee   : > { %1271 = vmatpush.bf16.msra.mxu2 %v1756_v16  ;;  %v684_v54 = vadd.f32 1.0, %v2017_v28  ;;  %v703_v4 = vmul.f32 0.5, %v683_v27  ;;  %v722_v62 = vmul.f32 %v702_v21, %v2616_v20 }
  0xef   : > { %1209 = vmatmul.bf16.gmra.mxu3 %v732_v45  ;;  %1225 = vmatpush.bf16.msra.mxu0 %v1628_v18  ;;  %v733_v11 = vpack.c.bf16 %v721_v44, %v721_v44 }
  0xf0   : > { %1248 = vmatpush.bf16.msra.mxu1 %v1692_v9  ;;  %1294 = vmatpush.bf16.msra.mxu3 %v1820_v52  ;;  %v704_v22 = vmul.f32 0.5, %v684_v54  ;;  %v723_v17 = vmul.f32 %v703_v4, %v2690_v8  ;;  %v734_v3 = vpack.c.bf16 %v722_v62, %v722_v62 }
  0xf2   : > { %1272 = vmatpush.bf16.msra.mxu2 %v1748_v10  ;;  %v724_v32 = vmul.f32 %v704_v22, %v2701_v19  ;;  %v735_v37 = vpack.c.bf16 %v723_v17, %v723_v17 }
  0xf3   : > { %1226 = vmatpush.bf16.msra.mxu0 %v1620_v33 }
  0xf4   : > { %1249 = vmatpush.bf16.msra.mxu1 %v1684_v36  ;;  %1295 = vmatpush.bf16.msra.mxu3 %v1812_v34  ;;  %v736_v40 = vpack.c.bf16 %v724_v32, %v724_v32 }
  0xf8   : > { %1145 = vmatmul.bf16.gmra.mxu0 %v733_v11 }
  0xfa   : > { %1168 = vmatmul.bf16.gmra.mxu1 %v734_v3 }
  0xfd   : > { %1191 = vmatmul.bf16.gmra.mxu2 %v735_v37 }
  0xff   : > { %1214 = vmatmul.bf16.gmra.mxu3 %v736_v40 }
 0x108   : > { %1227 = vmatmul.bf16.vlgmr.msra.gmra.mxu0 %v2627_v35  ;;  %v803_v35 = vperm.slane %v3012_v14, 0 }
 0x10a   : > { %1250 = vmatmul.bf16.vlgmr.msra.gmra.mxu1 %v2631_v39 }
 0x10d   : > { %1273 = vmatmul.bf16.vlgmr.msra.gmra.mxu2 %v2703_v23 }
 0x10f   : > { %1296 = vmatmul.bf16.vlgmr.msra.gmra.mxu3 %v2754_v47 }
 0x118   : > { %1232 = vmatmul.bf16.gmra.mxu0 %v2934_v53 }
 0x11a   : > { %1255 = vmatmul.bf16.gmra.mxu1 %v2951_v56 }
 0x11d   : > { %1278 = vmatmul.bf16.gmra.mxu2 %v731_v5 }
 0x11f   : > { %1301 = vmatmul.bf16.gmra.mxu3 %v732_v45 }
 0x128   : > { %1237 = vmatmul.bf16.gmra.mxu0 %v733_v11 }
 0x12a   : > { %1260 = vmatmul.bf16.gmra.mxu1 %v734_v3 }
 0x12d   : > { %1283 = vmatmul.bf16.gmra.mxu2 %v735_v37 }
 0x12f   : > { %1306 = vmatmul.bf16.gmra.mxu3 %v736_v40 }
 0x14d   : > { %v1136_v20 = vpop.f32.mrf.mxu0 }
 0x14e   : > { %v1137_v39 = vadd.f32 %v1136_v20, %v803_v35  ;;  %v1159_v8 = vpop.f32.mrf.mxu1 }
 0x150   : > { %v1160_v19 = vadd.f32 %v1159_v8, %v1137_v39 }
 0x155   : > { %v1138_v23 = vpop.f32.mrf.mxu0 }
 0x156   : > { %v1139_v29 = vadd.f32 %v1138_v23, %v803_v35  ;;  %v1161_v46 = vpop.f32.mrf.mxu1 }
 0x158   : > { %v1182_v47 = vpop.f32.mrf.mxu2  ;;  %v1162_v55 = vadd.f32 %v1161_v46, %v1139_v29 }
 0x159   : > { %v1183_v53 = vadd.f32 %v1182_v47, %v1160_v19 }
 0x15b   : > { %v1205_v60 = vpop.f32.mrf.mxu3 }
 0x15c   : > { %v1206_v41 = vadd.f32 %v1205_v60, %v1183_v53 }
 0x15e   : > { %v1311_v49 = vmul.f32 %v1206_v41, %v1206_v41 }
 0x160   : > { %v1321_v38 = vmul.f32 %v1311_v49, %v1206_v41  ;;  %v1184_v58 = vpop.f32.mrf.mxu2 }
 0x161   : > { %v1185_v50 = vadd.f32 %v1184_v58, %v1162_v55  ;;  %v3024_v55 = vperm.slane %v3012_v14, 1 }
 0x162   : > { %v1331_v56 = vmul.f32 0.044715, %v1321_v38 }
 0x163   : > { %v1207_v24 = vpop.f32.mrf.mxu3 }
 0x164   : > { %v1341_v15 = vadd.f32 %v1331_v56, %v1206_v41  ;;  %v1208_v6 = vadd.f32 %v1207_v24, %v1185_v50 }
 0x165   : > { %v1141_v30 = vpop.f32.mrf.mxu0 }
 0x166   : > { %v1351_v57 = vmul.f32 0.7978846, %v1341_v15  ;;  %v1313_v59 = vmul.f32 %v1208_v6, %v1208_v6  ;;  %v1142_v63 = vadd.f32 %v1141_v30, %v803_v35 }
 0x167   : > { %v1164_v61 = vpop.f32.mrf.mxu1 }
 0x168   : > { %2018 = vtanh.f32 %v1351_v57  ;;  %v1323_v5 = vmul.f32 %v1313_v59, %v1208_v6  ;;  %v1165_v9 = vadd.f32 %v1164_v61, %v1142_v63 }
 0x16a   : > { %v1333_v0 = vmul.f32 0.044715, %v1323_v5 }
 0x16c   : > { %v1343_v1 = vadd.f32 %v1333_v0, %v1208_v6 }
 0x16d   : > { %v1143_v48 = vpop.f32.mrf.mxu0 }
 0x16e   : > { %v2019_v18 = vpop.eup %2018  ;;  %v1353_v16 = vmul.f32 0.7978846, %v1343_v1  ;;  %v1144_v12 = vadd.f32 %v1143_v48, %v803_v35 }
 0x16f   : > { %v1371_v31 = vadd.f32 1.0, %v2019_v18  ;;  %v1166_v13 = vpop.f32.mrf.mxu1 }
 0x170   : > { %v1187_v42 = vpop.f32.mrf.mxu2  ;;  %2020 = vtanh.f32 %v1353_v16  ;;  %v1167_v27 = vadd.f32 %v1166_v13, %v1144_v12 }
 0x171   : > { %v1188_v45 = vadd.f32 %v1187_v42, %v1165_v9  ;;  %v1381_v51 = vmul.f32 0.5, %v1371_v31 }
 0x172   : > { %v1210_v52 = vpop.f32.mrf.mxu3 }
 0x173   : > { %v1211_v2 = vadd.f32 %v1210_v52, %v1188_v45  ;;  %v1391_v25 = vmul.f32 %v1381_v51, %v1206_v41 }
 0x175   : > { %v1315_v7 = vmul.f32 %v1211_v2, %v1211_v2  ;;  %1401 = vst [vmem:[%s3019_s24] sm:$0xff] %v1391_v25  ;;  %v1146_v26 = vpop.f32.mrf.mxu0 }
 0x176   : > { %v2021_v43 = vpop.eup %2020  ;;  %v1147_v62 = vadd.f32 %v1146_v26, %v803_v35 }
 0x177   : > { %v1325_v10 = vmul.f32 %v1315_v7, %v1211_v2  ;;  %v1373_v28 = vadd.f32 1.0, %v2021_v43  ;;  %v1169_v33 = vpop.f32.mrf.mxu1 }
 0x178   : > { %v1189_v36 = vpop.f32.mrf.mxu2  ;;  %v1170_v37 = vadd.f32 %v1169_v33, %v1147_v62 }
 0x179   : > { %v1335_v21 = vmul.f32 0.044715, %v1325_v10  ;;  %v1190_v54 = vadd.f32 %v1189_v36, %v1167_v27  ;;  %v1383_v34 = vmul.f32 0.5, %v1373_v28 }
 0x17a   : > { %v1212_v44 = vpop.f32.mrf.mxu3 }
 0x17b   : > { %v1345_v4 = vadd.f32 %v1335_v21, %v1211_v2  ;;  %v1213_v22 = vadd.f32 %v1212_v44, %v1190_v54  ;;  %v1393_v11 = vmul.f32 %v1383_v34, %v1208_v6 }
 0x17d   : > { %v1355_v17 = vmul.f32 0.7978846, %v1345_v4  ;;  %v1317_v3 = vmul.f32 %v1213_v22, %v1213_v22  ;;  %1403 = vst [vmem:[%s3019_s24 + $0x10] sm:$0xff] %v1393_v11  ;;  %v1148_v32 = vpop.f32.mrf.mxu0 }
 0x17f   : > { %2022 = vtanh.f32 %v1355_v17  ;;  %v1327_v40 = vmul.f32 %v1317_v3, %v1213_v22  ;;  %v1171_v20 = vpop.f32.mrf.mxu1 }
 0x180   : > { %v1192_v39 = vpop.f32.mrf.mxu2 }
 0x181   : > { %v1337_v8 = vmul.f32 0.044715, %v1327_v40  ;;  %v1193_v19 = vadd.f32 %v1192_v39, %v1170_v37 }
 0x182   : > { %v1215_v23 = vpop.f32.mrf.mxu3 }
 0x183   : > { %v1347_v47 = vadd.f32 %v1337_v8, %v1213_v22  ;;  %v1216_v53 = vadd.f32 %v1215_v23, %v1193_v19 }
 0x185   : > { %v2023_v29 = vpop.eup %2022  ;;  %v1357_v60 = vmul.f32 0.7978846, %v1347_v47  ;;  %v1319_v35 = vmul.f32 %v1216_v53, %v1216_v53  ;;  %v1228_v46 = vpop.f32.mrf.mxu0 }
 0x186   : > { %v1375_v41 = vadd.f32 1.0, %v2023_v29  ;;  %v1229_v30 = vadd.f32 %v1228_v46, %v3024_v55 }
 0x187   : > { %2024 = vtanh.f32 %v1357_v60  ;;  %v1329_v49 = vmul.f32 %v1319_v35, %v1216_v53  ;;  %v1251_v58 = vpop.f32.mrf.mxu1 }
 0x188   : > { %v1385_v38 = vmul.f32 0.5, %v1375_v41  ;;  %v1194_v50 = vpop.f32.mrf.mxu2  ;;  %v1252_v63 = vadd.f32 %v1251_v58, %v1229_v30 }
 0x189   : > { %v1339_v56 = vmul.f32 0.044715, %v1329_v49 }
 0x18a   : > { %v1395_v24 = vmul.f32 %v1385_v38, %v1211_v2  ;;  %v1217_v15 = vpop.f32.mrf.mxu3 }
 0x18b   : > { %v1349_v6 = vadd.f32 %v1339_v56, %v1216_v53 }
 0x18c   : > { %1405 = vst [vmem:[%s3019_s24 + $0x20] sm:$0xff] %v1395_v24 }
 0x18d   : > { %v2025_v57 = vpop.eup %2024  ;;  %v1359_v59 = vmul.f32 0.7978846, %v1349_v6  ;;  %v1230_v5 = vpop.f32.mrf.mxu0 }
 0x18e   : > { %v1377_v61 = vadd.f32 1.0, %v2025_v57  ;;  %v1231_v16 = vadd.f32 %v1230_v5, %v3024_v55 }
 0x18f   : > { %2026 = vtanh.f32 %v1359_v59  ;;  %v1253_v14 = vpop.f32.mrf.mxu1 }
 0x190   : > { %v1387_v0 = vmul.f32 0.5, %v1377_v61  ;;  %v1274_v1 = vpop.f32.mrf.mxu2  ;;  %v1254_v52 = vadd.f32 %v1253_v14, %v1231_v16 }
 0x191   : > { %v1275_v48 = vadd.f32 %v1274_v1, %v1252_v63 }
 0x192   : > { %v1397_v18 = vmul.f32 %v1387_v0, %v1213_v22  ;;  %v1297_v9 = vpop.f32.mrf.mxu3 }
 0x193   : > { %v1298_v31 = vadd.f32 %v1297_v9, %v1275_v48 }
 0x194   : > { %1407 = vst [vmem:[%s3019_s24 + $0x30] sm:$0xff] %v1397_v18 }
 0x195   : > { %v2027_v13 = vpop.eup %2026  ;;  %v1312_v42 = vmul.f32 %v1298_v31, %v1298_v31  ;;  %v1233_v51 = vpop.f32.mrf.mxu0 }
 0x196   : > { %v1379_v45 = vadd.f32 1.0, %v2027_v13  ;;  %v1234_v33 = vadd.f32 %v1233_v51, %v3024_v55 }
 0x197   : > { %v1322_v12 = vmul.f32 %v1312_v42, %v1298_v31  ;;  %v1256_v25 = vpop.f32.mrf.mxu1 }
 0x198   : > { %v1389_v2 = vmul.f32 0.5, %v1379_v45  ;;  %v1276_v7 = vpop.f32.mrf.mxu2  ;;  %v1257_v44 = vadd.f32 %v1256_v25, %v1234_v33 }
 0x199   : > { %v1332_v26 = vmul.f32 0.044715, %v1322_v12  ;;  %v1277_v43 = vadd.f32 %v1276_v7, %v1254_v52 }
 0x19a   : > { %v1399_v27 = vmul.f32 %v1389_v2, %v1216_v53  ;;  %v1299_v10 = vpop.f32.mrf.mxu3 }
 0x19b   : > { %v1342_v28 = vadd.f32 %v1332_v26, %v1298_v31  ;;  %v1300_v36 = vadd.f32 %v1299_v10, %v1277_v43 }
 0x19c   : > { %1409 = vst [vmem:[%s3019_s24 + $0x40] sm:$0xff] %v1399_v27 }
 0x19d   : > { %v1352_v21 = vmul.f32 0.7978846, %v1342_v28  ;;  %v1314_v54 = vmul.f32 %v1300_v36, %v1300_v36  ;;  %v1235_v34 = vpop.f32.mrf.mxu0 }
 0x19e   : > { %v1236_v37 = vadd.f32 %v1235_v34, %v3024_v55 }
 0x19f   : > { %2028 = vtanh.f32 %v1352_v21  ;;  %v1324_v4 = vmul.f32 %v1314_v54, %v1300_v36  ;;  %v1258_v62 = vpop.f32.mrf.mxu1 }
 0x1a0   : > { %v1279_v22 = vpop.f32.mrf.mxu2  ;;  %v1259_v47 = vadd.f32 %v1258_v62, %v1236_v37 }
 0x1a1   : > { %v1334_v11 = vmul.f32 0.044715, %v1324_v4  ;;  %v1280_v17 = vadd.f32 %v1279_v22, %v1257_v44 }
 0x1a2   : > { %v1302_v3 = vpop.f32.mrf.mxu3 }
 0x1a3   : > { %v1344_v32 = vadd.f32 %v1334_v11, %v1300_v36  ;;  %v1303_v40 = vadd.f32 %v1302_v3, %v1280_v17 }
 0x1a5   : > { %v2029_v20 = vpop.eup %2028  ;;  %v1354_v39 = vmul.f32 0.7978846, %v1344_v32  ;;  %v1316_v8 = vmul.f32 %v1303_v40, %v1303_v40  ;;  %v1238_v23 = vpop.f32.mrf.mxu0 }
 0x1a6   : > { %v1372_v19 = vadd.f32 1.0, %v2029_v20  ;;  %v1239_v50 = vadd.f32 %v1238_v23, %v3024_v55 }
 0x1a7   : > { %2030 = vtanh.f32 %v1354_v39  ;;  %v1326_v53 = vmul.f32 %v1316_v8, %v1303_v40  ;;  %v1261_v60 = vpop.f32.mrf.mxu1 }
 0x1a8   : > { %v1382_v29 = vmul.f32 0.5, %v1372_v19  ;;  %v1281_v35 = vpop.f32.mrf.mxu2  ;;  %v1262_v59 = vadd.f32 %v1261_v60, %v1239_v50 }
 0x1a9   : > { %v1336_v41 = vmul.f32 0.044715, %v1326_v53  ;;  %v1282_v46 = vadd.f32 %v1281_v35, %v1259_v47 }
 0x1aa   : > { %v1392_v49 = vmul.f32 %v1382_v29, %v1298_v31  ;;  %v1304_v38 = vpop.f32.mrf.mxu3 }
 0x1ab   : > { %v1346_v58 = vadd.f32 %v1336_v41, %v1303_v40  ;;  %v1305_v56 = vadd.f32 %v1304_v38, %v1282_v46 }
 0x1ac   : > { %1402 = vst [vmem:[%s3019_s24 + $0x8] sm:$0xff] %v1392_v49 }
 0x1ad   : > { %v2031_v24 = vpop.eup %2030  ;;  %v1356_v15 = vmul.f32 0.7978846, %v1346_v58  ;;  %v1318_v6 = vmul.f32 %v1305_v56, %v1305_v56  ;;  %v1240_v57 = vpop.f32.mrf.mxu0 }
 0x1ae   : > { %v1374_v30 = vadd.f32 1.0, %v2031_v24 }
 0x1af   : > { %2032 = vtanh.f32 %v1356_v15  ;;  %v1328_v61 = vmul.f32 %v1318_v6, %v1305_v56  ;;  %v1263_v63 = vpop.f32.mrf.mxu1 }
 0x1b0   : > { %v1384_v5 = vmul.f32 0.5, %v1374_v30  ;;  %v1284_v0 = vpop.f32.mrf.mxu2 }
 0x1b1   : > { %v1338_v14 = vmul.f32 0.044715, %v1328_v61  ;;  %v1285_v1 = vadd.f32 %v1284_v0, %v1262_v59 }
 0x1b2   : > { %v1394_v48 = vmul.f32 %v1384_v5, %v1300_v36  ;;  %v1307_v18 = vpop.f32.mrf.mxu3 }
 0x1b3   : > { %v1348_v55 = vadd.f32 %v1338_v14, %v1305_v56  ;;  %v1308_v9 = vadd.f32 %v1307_v18, %v1285_v1 }
 0x1b4   : > { %1404 = vst [vmem:[%s3019_s24 + $0x18] sm:$0xff] %v1394_v48 }
 0x1b5   : > { %v2033_v16 = vpop.eup %2032  ;;  %v1358_v31 = vmul.f32 0.7978846, %v1348_v55  ;;  %v1320_v13 = vmul.f32 %v1308_v9, %v1308_v9 }
 0x1b6   : > { %v1376_v42 = vadd.f32 1.0, %v2033_v16 }
 0x1b7   : > { %2034 = vtanh.f32 %v1358_v31  ;;  %v1330_v45 = vmul.f32 %v1320_v13, %v1308_v9 }
 0x1b8   : > { %v1386_v51 = vmul.f32 0.5, %v1376_v42  ;;  %v1286_v52 = vpop.f32.mrf.mxu2 }
 0x1b9   : > { %v1340_v12 = vmul.f32 0.044715, %v1330_v45 }
 0x1ba   : > { %v1396_v2 = vmul.f32 %v1386_v51, %v1303_v40  ;;  %v1309_v25 = vpop.f32.mrf.mxu3 }
 0x1bb   : > { %v1350_v7 = vadd.f32 %v1340_v12, %v1308_v9 }
 0x1bc   : > { %1406 = vst [vmem:[%s3019_s24 + $0x28] sm:$0xff] %v1396_v2 }
 0x1bd   : > { %v2035_v26 = vpop.eup %2034  ;;  %v1360_v43 = vmul.f32 0.7978846, %v1350_v7 }
 0x1be   : > { %v1378_v27 = vadd.f32 1.0, %v2035_v26 }
 0x1bf   : > { %2036 = vtanh.f32 %v1360_v43 }
 0x1c0   : > { %v1388_v10 = vmul.f32 0.5, %v1378_v27 }
 0x1c2   : > { %v1398_v28 = vmul.f32 %v1388_v10, %v1305_v56 }
 0x1c4   : > { %1408 = vst [vmem:[%s3019_s24 + $0x38] sm:$0xff] %v1398_v28 }
 0x1c5   : > { %v2037_v33 = vpop.eup %2036 }
 0x1c6   : > { %v1380_v36 = vadd.f32 1.0, %v2037_v33 }
 0x1c8   : > { %v1390_v21 = vmul.f32 0.5, %v1380_v36 }
 0x1ca   : > { %v1400_v54 = vmul.f32 %v1390_v21, %v1308_v9 }
 0x1cc   : > { %1410 = vst [vmem:[%s3019_s24 + $0x48] sm:$0xff] %v1400_v54 }
 0x1cd PF: > { %s15_s18 = sadd.s32 1, %s2044_s18  }
 0x1ce   : > { %p12_p4 = scmp.ge.s32.totalorder %s15_s18, 4  }
 0x1d0   :  { %14 = sbr.rel (!%p12_p4) target bundleno = 1 (0x1), region = 70 }

</bundles_post_ra>
